<compile_context>
chip_gen: v7x
topology: tpu7x:2x2x1
jax: 0.10.0
libtpu: 0.0.40
codegen_flags: <defaults>
</compile_context>

<pallas_src>
import jax
import jax.numpy as jnp
import numpy as np
from jax.experimental import pallas as pl
from jax.experimental.pallas import tpu as pltpu


def _round_up(n, m):
    return ((n + m - 1) // m) * m


def _fused_gru_step(gi, gh, bh_n, h, HP):
    """One GRU update with fused, 128-lane-padded gates.

    gi   : (B, 3*HP) input-side pre-activations, biases already folded in
           (layout [r | z | n], PyTorch gate order, each gate padded to HP).
    gh   : (B, 3*HP) = h @ Wh_cat (no bias added).
    bh_n : (1, HP) hidden bias of the n gate (must stay inside the r-scaling).
    All slice boundaries are multiples of 128 lanes -> whole-vreg slices.
    """
    rz = jax.nn.sigmoid(gi[:, :2 * HP] + gh[:, :2 * HP])
    r = rz[:, :HP]
    z = rz[:, HP:]
    n = jnp.tanh(gi[:, 2 * HP:] + r * (gh[:, 2 * HP:] + bh_n))
    return (1.0 - z) * n + z * h


def seq2seq_gru_kernel(x2_ref, ewi_ref, ewh_ref, eb1_ref, ebhn_ref,
                       dwi_ref, dwhfc_ref, db1_ref, dbhn_ref,
                       fcb_ref, ow_ref, ob_ref, out_ref):
    B, T_out = out_ref.shape
    HP = ewh_ref.shape[0]            # hidden size padded to a 128-lane multiple
    G = 3 * HP                       # fused-gate width
    T_in = x2_ref.shape[0] // B

    # ---- encoder: all input-side projections hoisted into ONE dense matmul,
    #      result kept in registers (no scratch store/reload round-trip) ----
    gi_all = jnp.dot(x2_ref[...], ewi_ref[...],
                     preferred_element_type=jnp.float32) + eb1_ref[...]
    ewh = ewh_ref[...]
    ebhn = ebhn_ref[...]

    h = jnp.zeros((B, HP), jnp.float32)         # encoder.init_hidden()
    for ei in range(T_in):                      # static full unroll (toy T_in)
        gi = gi_all[ei * B:(ei + 1) * B, :]     # static slice, registers only
        gh = jnp.dot(h, ewh, preferred_element_type=jnp.float32)
        h = _fused_gru_step(gi, gh, ebhn, h, HP)

    # ---- decoder: autoregressive, ONE fused MXU push per step ----
    dwi = dwi_ref[...]                          # (1, 3*HP)
    dwhfc = dwhfc_ref[...]                      # (HP, 3*HP + FCP) = [Wh | fc_w]
    db1 = db1_ref[...]                          # (1, 3*HP)
    dbhn = dbhn_ref[...]                        # (1, HP)
    fcb = fcb_ref[...]                          # (1, FCP)
    ow = ow_ref[...]                            # (1, FCP)
    ob = ob_ref[...]                            # (1, 1)

    # prologue: gh entering the first decoder step (fc half of result unused)
    gh = jnp.dot(h, dwhfc, preferred_element_type=jnp.float32)[:, :G]
    y = jnp.zeros((B, 1), jnp.float32)          # decoder_input = 0.0

    for di in range(T_out):                     # static full unroll (toy T_out)
        gi = y * dwi + db1                      # K=1 matmul -> VPU broadcast
        h = _fused_gru_step(gi, gh, dbhn, h, HP)
        comb = jnp.dot(h, dwhfc, preferred_element_type=jnp.float32)
        gh = comb[:, :G]                        # next step's hidden-side preact
        f = jnp.maximum(comb[:, G:] + fcb, 0.0)            # fc + ReLU
        y = jnp.sum(f * ow, axis=-1, keepdims=True) + ob   # N=1 -> lane reduce
        out_ref[:, di:di + 1] = y               # 1-col store rides the vst slot


def init_params(key, n_feats, hidden, fc_units):
    """Deterministic PyTorch-like init: U(-1/sqrt(fan), 1/sqrt(fan))."""
    ks = jax.random.split(key, 13)
    kg = 1.0 / np.sqrt(hidden)

    def u(k, shape, bound):
        return jax.random.uniform(k, shape, jnp.float32, -bound, bound)

    return dict(
        # encoder GRU (gate order r, z, n), weights pre-transposed to (in, H)
        enc_wi=u(ks[0], (3, n_feats, hidden), kg),
        enc_wh=u(ks[1], (3, hidden, hidden), kg),
        enc_bi=u(ks[2], (3, 1, hidden), kg),
        enc_bh=u(ks[3], (3, 1, hidden), kg),
        # decoder GRU (input_size = 1)
        dec_wi=u(ks[4], (3, 1, hidden), kg),
        dec_wh=u(ks[5], (3, hidden, hidden), kg),
        dec_bi=u(ks[6], (3, 1, hidden), kg),
        dec_bh=u(ks[7], (3, 1, hidden), kg),
        # decoder head: Linear(H, fc) -> ReLU -> Linear(fc, 1)
        fc_w=u(ks[8], (hidden, fc_units), kg),
        fc_b=u(ks[9], (1, fc_units), kg),
        out_w=u(ks[10], (fc_units, 1), 1.0 / np.sqrt(fc_units)),
        out_b=u(ks[11], (1, 1), 1.0 / np.sqrt(fc_units)),
    )


def _pack_params(params):
    """Fuse per-gate weights, pre-fold biases, pad gates / fc to 128 lanes.

    Zero padding is exact: padded h lanes stay 0 through the GRU update and
    padded fc lanes contribute 0 to the output reduce.
    """
    H = params["enc_wh"].shape[-1]
    FC = params["fc_w"].shape[-1]
    HP = _round_up(H, 128)
    FCP = _round_up(FC, 128)

    def pad_last(a, n):
        return jnp.pad(a, [(0, 0)] * (a.ndim - 1) + [(0, n - a.shape[-1])])

    def pad_rows(a, n):
        cfg = [(0, 0)] * a.ndim
        cfg[-2] = (0, n - a.shape[-2])
        return jnp.pad(a, cfg)

    def cat_gates(w):      # (3, in, H) -> (in, 3*HP), gate order [r | z | n]
        return jnp.concatenate([pad_last(w[0], HP), pad_last(w[1], HP),
                                pad_last(w[2], HP)], axis=-1)

    def fold_bias(bi, bh):  # r,z: bi+bh folded; n: bi only (bh_n kept separate)
        return jnp.concatenate([pad_last(bi[0] + bh[0], HP),
                                pad_last(bi[1] + bh[1], HP),
                                pad_last(bi[2], HP)], axis=-1)

    dwh = cat_gates(pad_rows(params["dec_wh"], HP))            # (HP, 3*HP)
    fcw = pad_last(pad_rows(params["fc_w"], HP), FCP)          # (HP, FCP)

    # TODO(synk): cast ewi/ewh/dwhfc to bf16 for v6e/v7x MXU (keep state f32);
    #             would require loosening the test tolerance to ~1e-2.
    return dict(
        ewi=cat_gates(params["enc_wi"]),                       # (F, 3*HP)
        ewh=cat_gates(pad_rows(params["enc_wh"], HP)),         # (HP, 3*HP)
        eb1=fold_bias(params["enc_bi"], params["enc_bh"]),     # (1, 3*HP)
        ebhn=pad_last(params["enc_bh"][2], HP),                # (1, HP)
        dwi=cat_gates(params["dec_wi"]),                       # (1, 3*HP)
        dwhfc=jnp.concatenate([dwh, fcw], axis=-1),            # (HP, 3*HP+FCP)
        db1=fold_bias(params["dec_bi"], params["dec_bh"]),     # (1, 3*HP)
        dbhn=pad_last(params["dec_bh"][2], HP),                # (1, HP)
        fcb=pad_last(params["fc_b"], FCP),                     # (1, FCP)
        ow=pad_last(params["out_w"].T, FCP),                   # (1, FCP)
        ob=params["out_b"],                                    # (1, 1)
    )


def net_gru_pallas(x, params, target_length):
    """x: (B, T_in, n_feats) float32 -> outputs (B, target_length, 1)."""
    B, T_in, F = x.shape
    H = params["enc_wh"].shape[-1]
    FC = params["fc_w"].shape[-1]
    HP = _round_up(H, 128)
    FCP = _round_up(FC, 128)

    p = _pack_params(params)
    # time-major, flattened over (time, batch) so the encoder input projection
    # is a single dense matmul inside the kernel.
    x2 = jnp.transpose(x, (1, 0, 2)).reshape(T_in * B, F)

    args = (x2, p["ewi"], p["ewh"], p["eb1"], p["ebhn"],
            p["dwi"], p["dwhfc"], p["db1"], p["dbhn"],
            p["fcb"], p["ow"], p["ob"])

    flops = int(2 * T_in * B * F * 3 * HP                 # hoisted input proj
                + T_in * 2 * B * HP * 3 * HP              # encoder recurrence
                + (target_length + 1) * 2 * B * HP * (3 * HP + FCP)  # fused dec
                + target_length * 2 * B * FCP)            # output reduce
    transcendentals = int((T_in + target_length) * B * 3 * HP)
    bytes_accessed = int(sum(int(np.prod(a.shape)) for a in args) * 4
                         + B * target_length * 4)

    vmem = pl.BlockSpec(memory_space=pltpu.MemorySpace.VMEM)
    out = pl.pallas_call(
        seq2seq_gru_kernel,
        out_shape=jax.ShapeDtypeStruct((B, target_length), jnp.float32),
        in_specs=[vmem] * len(args),
        out_specs=vmem,
        cost_estimate=pl.CostEstimate(flops=flops,
                                      transcendentals=transcendentals,
                                      bytes_accessed=bytes_accessed),
    )(*args)
    # TODO(synk): at production B add grid=(B // TB,) with batch-sliced x2/out
    #             BlockSpecs, dimension_semantics=("parallel",) (v7x 2nd TC)
    #             and pltpu.CompilerParams(vmem_limit_bytes=...) to budget the
    #             (then chunked, bf16) hoisted projection under v7x's 64 MiB.
    return out[:, :, None]                        # (B, target_length, 1)


def net_gru_reference(x, params, target_length):
    """Pure-JAX reference with the original (unfused, unpadded) semantics."""
    B, T_in, F = x.shape
    H = params["enc_wh"].shape[-1]

    def cell(x_t, h, wi, wh, bi, bh):
        gi = [x_t @ wi[g] + bi[g] for g in range(3)]
        gh = [h @ wh[g] + bh[g] for g in range(3)]
        r = jax.nn.sigmoid(gi[0] + gh[0])
        z = jax.nn.sigmoid(gi[1] + gh[1])
        n = jnp.tanh(gi[2] + r * gh[2])
        return (1.0 - z) * n + z * h

    h = jnp.zeros((B, H), jnp.float32)
    for ei in range(T_in):
        h = cell(x[:, ei, :], h,
                 params["enc_wi"], params["enc_wh"],
                 params["enc_bi"], params["enc_bh"])

    y = jnp.zeros((B, 1), jnp.float32)
    outs = []
    for _ in range(target_length):
        h = cell(y, h,
                 params["dec_wi"], params["dec_wh"],
                 params["dec_bi"], params["dec_bh"])
        f = jax.nn.relu(h @ params["fc_w"] + params["fc_b"])
        y = f @ params["out_w"] + params["out_b"]
        outs.append(y)
    return jnp.stack(outs, axis=1)                # (B, target_length, 1)


if __name__ == "__main__":
    B, T_IN, N_FEATS = 2, 8, 3
    HIDDEN, FC_UNITS, TARGET_LEN = 32, 16, 10

    key = jax.random.PRNGKey(0)
    k_x, k_p = jax.random.split(key)
    x = jax.random.normal(k_x, (B, T_IN, N_FEATS), jnp.float32)
    params = init_params(k_p, N_FEATS, HIDDEN, FC_UNITS)

    out = net_gru_pallas(x, params, TARGET_LEN)
    out = jax.block_until_ready(out)

    ref = jax.block_until_ready(net_gru_reference(x, params, TARGET_LEN))
    assert out.shape == (B, TARGET_LEN, 1), out.shape
    # f32 everywhere, zero padding is exact -> tight tolerance validates the
    # fused/folded/padded math against the unfused reference.
    np.testing.assert_allclose(np.asarray(out), np.asarray(ref),
                               rtol=1e-4, atol=1e-4)
    print("KERNEL_OK")
</pallas_src>

<mosaic_0001>
module attributes {stable_mosaic.version = 11 : i64} {
  func.func @seq2seq_gru_kernel(%arg0: memref<16x3xf32, #tpu.memory_space<vmem>>, %arg1: memref<3x384xf32, #tpu.memory_space<vmem>>, %arg2: memref<128x384xf32, #tpu.memory_space<vmem>>, %arg3: memref<1x384xf32, #tpu.memory_space<vmem>>, %arg4: memref<1x128xf32, #tpu.memory_space<vmem>>, %arg5: memref<1x384xf32, #tpu.memory_space<vmem>>, %arg6: memref<128x512xf32, #tpu.memory_space<vmem>>, %arg7: memref<1x384xf32, #tpu.memory_space<vmem>>, %arg8: memref<1x128xf32, #tpu.memory_space<vmem>>, %arg9: memref<1x128xf32, #tpu.memory_space<vmem>>, %arg10: memref<1x128xf32, #tpu.memory_space<vmem>>, %arg11: memref<1x1xf32, #tpu.memory_space<vmem>>, %arg12: memref<2x10xf32, #tpu.memory_space<vmem>>) attributes {dimension_semantics = [], scalar_prefetch = 0 : i64, scratch_operands = 0 : i64, tpu.core_type = #tpu.core_type<tc>} {
    %c0 = arith.constant 0 : index
    %c0_0 = arith.constant 0 : index
    %0 = vector.load %arg0[%c0, %c0_0] : memref<16x3xf32, #tpu.memory_space<vmem>>, vector<16x3xf32>
    %c0_1 = arith.constant 0 : index
    %c0_2 = arith.constant 0 : index
    %1 = vector.load %arg1[%c0_1, %c0_2] : memref<3x384xf32, #tpu.memory_space<vmem>>, vector<3x384xf32>
    %cst = arith.constant dense<0.000000e+00> : vector<16x384xf32>
    %2 = tpu.matmul %0, %1, %cst {dimension_numbers = #tpu.dot_dimension_numbers<[1], [0], [0], [1], [0, 0, 1, 1], [], []>} : vector<16x3xf32>, vector<3x384xf32>, vector<16x384xf32> -> vector<16x384xf32>
    %c0_3 = arith.constant 0 : index
    %c0_4 = arith.constant 0 : index
    %3 = vector.load %arg3[%c0_3, %c0_4] : memref<1x384xf32, #tpu.memory_space<vmem>>, vector<1x384xf32>
    %4 = vector.broadcast %3 : vector<1x384xf32> to vector<16x384xf32>
    %5 = arith.addf %2, %4 : vector<16x384xf32>
    %c0_5 = arith.constant 0 : index
    %c0_6 = arith.constant 0 : index
    %6 = vector.load %arg2[%c0_5, %c0_6] : memref<128x384xf32, #tpu.memory_space<vmem>>, vector<128x384xf32>
    %c0_7 = arith.constant 0 : index
    %c0_8 = arith.constant 0 : index
    %7 = vector.load %arg4[%c0_7, %c0_8] : memref<1x128xf32, #tpu.memory_space<vmem>>, vector<1x128xf32>
    %cst_9 = arith.constant 0.000000e+00 : f32
    %8 = vector.broadcast %cst_9 : f32 to vector<2x128xf32>
    %9 = vector.extract_strided_slice %5 {offsets = [0, 0], sizes = [2, 384], strides = [1, 1]} : vector<16x384xf32> to vector<2x384xf32>
    %cst_10 = arith.constant dense<0.000000e+00> : vector<2x384xf32>
    %10 = tpu.matmul %8, %6, %cst_10 {dimension_numbers = #tpu.dot_dimension_numbers<[1], [0], [0], [1], [0, 0, 1, 1], [], []>} : vector<2x128xf32>, vector<128x384xf32>, vector<2x384xf32> -> vector<2x384xf32>
    %11 = vector.extract_strided_slice %9 {offsets = [0, 0], sizes = [2, 256], strides = [1, 1]} : vector<2x384xf32> to vector<2x256xf32>
    %12 = vector.extract_strided_slice %10 {offsets = [0, 0], sizes = [2, 256], strides = [1, 1]} : vector<2x384xf32> to vector<2x256xf32>
    %13 = arith.addf %11, %12 : vector<2x256xf32>
    %14 = arith.negf %13 : vector<2x256xf32>
    %15 = math.exp %14 : vector<2x256xf32>
    %cst_11 = arith.constant 1.000000e+00 : f32
    %16 = vector.broadcast %cst_11 : f32 to vector<2x256xf32>
    %17 = arith.addf %16, %15 : vector<2x256xf32>
    %18 = arith.divf %16, %17 : vector<2x256xf32>
    %19 = vector.extract_strided_slice %18 {offsets = [0, 0], sizes = [2, 128], strides = [1, 1]} : vector<2x256xf32> to vector<2x128xf32>
    %20 = vector.extract_strided_slice %18 {offsets = [0, 128], sizes = [2, 128], strides = [1, 1]} : vector<2x256xf32> to vector<2x128xf32>
    %21 = vector.extract_strided_slice %9 {offsets = [0, 256], sizes = [2, 128], strides = [1, 1]} : vector<2x384xf32> to vector<2x128xf32>
    %22 = vector.extract_strided_slice %10 {offsets = [0, 256], sizes = [2, 128], strides = [1, 1]} : vector<2x384xf32> to vector<2x128xf32>
    %23 = vector.broadcast %7 : vector<1x128xf32> to vector<2x128xf32>
    %24 = arith.addf %22, %23 : vector<2x128xf32>
    %25 = arith.mulf %19, %24 : vector<2x128xf32>
    %26 = arith.addf %21, %25 : vector<2x128xf32>
    %27 = math.tanh %26 : vector<2x128xf32>
    %cst_12 = arith.constant 1.000000e+00 : f32
    %28 = vector.broadcast %cst_12 : f32 to vector<2x128xf32>
    %29 = arith.subf %28, %20 : vector<2x128xf32>
    %30 = arith.mulf %29, %27 : vector<2x128xf32>
    %31 = arith.mulf %20, %8 : vector<2x128xf32>
    %32 = arith.addf %30, %31 : vector<2x128xf32>
    %33 = vector.extract_strided_slice %5 {offsets = [2, 0], sizes = [2, 384], strides = [1, 1]} : vector<16x384xf32> to vector<2x384xf32>
    %cst_13 = arith.constant dense<0.000000e+00> : vector<2x384xf32>
    %34 = tpu.matmul %32, %6, %cst_13 {dimension_numbers = #tpu.dot_dimension_numbers<[1], [0], [0], [1], [0, 0, 1, 1], [], []>} : vector<2x128xf32>, vector<128x384xf32>, vector<2x384xf32> -> vector<2x384xf32>
    %35 = vector.extract_strided_slice %33 {offsets = [0, 0], sizes = [2, 256], strides = [1, 1]} : vector<2x384xf32> to vector<2x256xf32>
    %36 = vector.extract_strided_slice %34 {offsets = [0, 0], sizes = [2, 256], strides = [1, 1]} : vector<2x384xf32> to vector<2x256xf32>
    %37 = arith.addf %35, %36 : vector<2x256xf32>
    %38 = arith.negf %37 : vector<2x256xf32>
    %39 = math.exp %38 : vector<2x256xf32>
    %cst_14 = arith.constant 1.000000e+00 : f32
    %40 = vector.broadcast %cst_14 : f32 to vector<2x256xf32>
    %41 = arith.addf %40, %39 : vector<2x256xf32>
    %42 = arith.divf %40, %41 : vector<2x256xf32>
    %43 = vector.extract_strided_slice %42 {offsets = [0, 0], sizes = [2, 128], strides = [1, 1]} : vector<2x256xf32> to vector<2x128xf32>
    %44 = vector.extract_strided_slice %42 {offsets = [0, 128], sizes = [2, 128], strides = [1, 1]} : vector<2x256xf32> to vector<2x128xf32>
    %45 = vector.extract_strided_slice %33 {offsets = [0, 256], sizes = [2, 128], strides = [1, 1]} : vector<2x384xf32> to vector<2x128xf32>
    %46 = vector.extract_strided_slice %34 {offsets = [0, 256], sizes = [2, 128], strides = [1, 1]} : vector<2x384xf32> to vector<2x128xf32>
    %47 = vector.broadcast %7 : vector<1x128xf32> to vector<2x128xf32>
    %48 = arith.addf %46, %47 : vector<2x128xf32>
    %49 = arith.mulf %43, %48 : vector<2x128xf32>
    %50 = arith.addf %45, %49 : vector<2x128xf32>
    %51 = math.tanh %50 : vector<2x128xf32>
    %cst_15 = arith.constant 1.000000e+00 : f32
    %52 = vector.broadcast %cst_15 : f32 to vector<2x128xf32>
    %53 = arith.subf %52, %44 : vector<2x128xf32>
    %54 = arith.mulf %53, %51 : vector<2x128xf32>
    %55 = arith.mulf %44, %32 : vector<2x128xf32>
    %56 = arith.addf %54, %55 : vector<2x128xf32>
    %57 = vector.extract_strided_slice %5 {offsets = [4, 0], sizes = [2, 384], strides = [1, 1]} : vector<16x384xf32> to vector<2x384xf32>
    %cst_16 = arith.constant dense<0.000000e+00> : vector<2x384xf32>
    %58 = tpu.matmul %56, %6, %cst_16 {dimension_numbers = #tpu.dot_dimension_numbers<[1], [0], [0], [1], [0, 0, 1, 1], [], []>} : vector<2x128xf32>, vector<128x384xf32>, vector<2x384xf32> -> vector<2x384xf32>
    %59 = vector.extract_strided_slice %57 {offsets = [0, 0], sizes = [2, 256], strides = [1, 1]} : vector<2x384xf32> to vector<2x256xf32>
    %60 = vector.extract_strided_slice %58 {offsets = [0, 0], sizes = [2, 256], strides = [1, 1]} : vector<2x384xf32> to vector<2x256xf32>
    %61 = arith.addf %59, %60 : vector<2x256xf32>
    %62 = arith.negf %61 : vector<2x256xf32>
    %63 = math.exp %62 : vector<2x256xf32>
    %cst_17 = arith.constant 1.000000e+00 : f32
    %64 = vector.broadcast %cst_17 : f32 to vector<2x256xf32>
    %65 = arith.addf %64, %63 : vector<2x256xf32>
    %66 = arith.divf %64, %65 : vector<2x256xf32>
    %67 = vector.extract_strided_slice %66 {offsets = [0, 0], sizes = [2, 128], strides = [1, 1]} : vector<2x256xf32> to vector<2x128xf32>
    %68 = vector.extract_strided_slice %66 {offsets = [0, 128], sizes = [2, 128], strides = [1, 1]} : vector<2x256xf32> to vector<2x128xf32>
    %69 = vector.extract_strided_slice %57 {offsets = [0, 256], sizes = [2, 128], strides = [1, 1]} : vector<2x384xf32> to vector<2x128xf32>
    %70 = vector.extract_strided_slice %58 {offsets = [0, 256], sizes = [2, 128], strides = [1, 1]} : vector<2x384xf32> to vector<2x128xf32>
    %71 = vector.broadcast %7 : vector<1x128xf32> to vector<2x128xf32>
    %72 = arith.addf %70, %71 : vector<2x128xf32>
    %73 = arith.mulf %67, %72 : vector<2x128xf32>
    %74 = arith.addf %69, %73 : vector<2x128xf32>
    %75 = math.tanh %74 : vector<2x128xf32>
    %cst_18 = arith.constant 1.000000e+00 : f32
    %76 = vector.broadcast %cst_18 : f32 to vector<2x128xf32>
    %77 = arith.subf %76, %68 : vector<2x128xf32>
    %78 = arith.mulf %77, %75 : vector<2x128xf32>
    %79 = arith.mulf %68, %56 : vector<2x128xf32>
    %80 = arith.addf %78, %79 : vector<2x128xf32>
    %81 = vector.extract_strided_slice %5 {offsets = [6, 0], sizes = [2, 384], strides = [1, 1]} : vector<16x384xf32> to vector<2x384xf32>
    %cst_19 = arith.constant dense<0.000000e+00> : vector<2x384xf32>
    %82 = tpu.matmul %80, %6, %cst_19 {dimension_numbers = #tpu.dot_dimension_numbers<[1], [0], [0], [1], [0, 0, 1, 1], [], []>} : vector<2x128xf32>, vector<128x384xf32>, vector<2x384xf32> -> vector<2x384xf32>
    %83 = vector.extract_strided_slice %81 {offsets = [0, 0], sizes = [2, 256], strides = [1, 1]} : vector<2x384xf32> to vector<2x256xf32>
    %84 = vector.extract_strided_slice %82 {offsets = [0, 0], sizes = [2, 256], strides = [1, 1]} : vector<2x384xf32> to vector<2x256xf32>
    %85 = arith.addf %83, %84 : vector<2x256xf32>
    %86 = arith.negf %85 : vector<2x256xf32>
    %87 = math.exp %86 : vector<2x256xf32>
    %cst_20 = arith.constant 1.000000e+00 : f32
    %88 = vector.broadcast %cst_20 : f32 to vector<2x256xf32>
    %89 = arith.addf %88, %87 : vector<2x256xf32>
    %90 = arith.divf %88, %89 : vector<2x256xf32>
    %91 = vector.extract_strided_slice %90 {offsets = [0, 0], sizes = [2, 128], strides = [1, 1]} : vector<2x256xf32> to vector<2x128xf32>
    %92 = vector.extract_strided_slice %90 {offsets = [0, 128], sizes = [2, 128], strides = [1, 1]} : vector<2x256xf32> to vector<2x128xf32>
    %93 = vector.extract_strided_slice %81 {offsets = [0, 256], sizes = [2, 128], strides = [1, 1]} : vector<2x384xf32> to vector<2x128xf32>
    %94 = vector.extract_strided_slice %82 {offsets = [0, 256], sizes = [2, 128], strides = [1, 1]} : vector<2x384xf32> to vector<2x128xf32>
    %95 = vector.broadcast %7 : vector<1x128xf32> to vector<2x128xf32>
    %96 = arith.addf %94, %95 : vector<2x128xf32>
    %97 = arith.mulf %91, %96 : vector<2x128xf32>
    %98 = arith.addf %93, %97 : vector<2x128xf32>
    %99 = math.tanh %98 : vector<2x128xf32>
    %cst_21 = arith.constant 1.000000e+00 : f32
    %100 = vector.broadcast %cst_21 : f32 to vector<2x128xf32>
    %101 = arith.subf %100, %92 : vector<2x128xf32>
    %102 = arith.mulf %101, %99 : vector<2x128xf32>
    %103 = arith.mulf %92, %80 : vector<2x128xf32>
    %104 = arith.addf %102, %103 : vector<2x128xf32>
    %105 = vector.extract_strided_slice %5 {offsets = [8, 0], sizes = [2, 384], strides = [1, 1]} : vector<16x384xf32> to vector<2x384xf32>
    %cst_22 = arith.constant dense<0.000000e+00> : vector<2x384xf32>
    %106 = tpu.matmul %104, %6, %cst_22 {dimension_numbers = #tpu.dot_dimension_numbers<[1], [0], [0], [1], [0, 0, 1, 1], [], []>} : vector<2x128xf32>, vector<128x384xf32>, vector<2x384xf32> -> vector<2x384xf32>
    %107 = vector.extract_strided_slice %105 {offsets = [0, 0], sizes = [2, 256], strides = [1, 1]} : vector<2x384xf32> to vector<2x256xf32>
    %108 = vector.extract_strided_slice %106 {offsets = [0, 0], sizes = [2, 256], strides = [1, 1]} : vector<2x384xf32> to vector<2x256xf32>
    %109 = arith.addf %107, %108 : vector<2x256xf32>
    %110 = arith.negf %109 : vector<2x256xf32>
    %111 = math.exp %110 : vector<2x256xf32>
    %cst_23 = arith.constant 1.000000e+00 : f32
    %112 = vector.broadcast %cst_23 : f32 to vector<2x256xf32>
    %113 = arith.addf %112, %111 : vector<2x256xf32>
    %114 = arith.divf %112, %113 : vector<2x256xf32>
    %115 = vector.extract_strided_slice %114 {offsets = [0, 0], sizes = [2, 128], strides = [1, 1]} : vector<2x256xf32> to vector<2x128xf32>
    %116 = vector.extract_strided_slice %114 {offsets = [0, 128], sizes = [2, 128], strides = [1, 1]} : vector<2x256xf32> to vector<2x128xf32>
    %117 = vector.extract_strided_slice %105 {offsets = [0, 256], sizes = [2, 128], strides = [1, 1]} : vector<2x384xf32> to vector<2x128xf32>
    %118 = vector.extract_strided_slice %106 {offsets = [0, 256], sizes = [2, 128], strides = [1, 1]} : vector<2x384xf32> to vector<2x128xf32>
    %119 = vector.broadcast %7 : vector<1x128xf32> to vector<2x128xf32>
    %120 = arith.addf %118, %119 : vector<2x128xf32>
    %121 = arith.mulf %115, %120 : vector<2x128xf32>
    %122 = arith.addf %117, %121 : vector<2x128xf32>
    %123 = math.tanh %122 : vector<2x128xf32>
    %cst_24 = arith.constant 1.000000e+00 : f32
    %124 = vector.broadcast %cst_24 : f32 to vector<2x128xf32>
    %125 = arith.subf %124, %116 : vector<2x128xf32>
    %126 = arith.mulf %125, %123 : vector<2x128xf32>
    %127 = arith.mulf %116, %104 : vector<2x128xf32>
    %128 = arith.addf %126, %127 : vector<2x128xf32>
    %129 = vector.extract_strided_slice %5 {offsets = [10, 0], sizes = [2, 384], strides = [1, 1]} : vector<16x384xf32> to vector<2x384xf32>
    %cst_25 = arith.constant dense<0.000000e+00> : vector<2x384xf32>
    %130 = tpu.matmul %128, %6, %cst_25 {dimension_numbers = #tpu.dot_dimension_numbers<[1], [0], [0], [1], [0, 0, 1, 1], [], []>} : vector<2x128xf32>, vector<128x384xf32>, vector<2x384xf32> -> vector<2x384xf32>
    %131 = vector.extract_strided_slice %129 {offsets = [0, 0], sizes = [2, 256], strides = [1, 1]} : vector<2x384xf32> to vector<2x256xf32>
    %132 = vector.extract_strided_slice %130 {offsets = [0, 0], sizes = [2, 256], strides = [1, 1]} : vector<2x384xf32> to vector<2x256xf32>
    %133 = arith.addf %131, %132 : vector<2x256xf32>
    %134 = arith.negf %133 : vector<2x256xf32>
    %135 = math.exp %134 : vector<2x256xf32>
    %cst_26 = arith.constant 1.000000e+00 : f32
    %136 = vector.broadcast %cst_26 : f32 to vector<2x256xf32>
    %137 = arith.addf %136, %135 : vector<2x256xf32>
    %138 = arith.divf %136, %137 : vector<2x256xf32>
    %139 = vector.extract_strided_slice %138 {offsets = [0, 0], sizes = [2, 128], strides = [1, 1]} : vector<2x256xf32> to vector<2x128xf32>
    %140 = vector.extract_strided_slice %138 {offsets = [0, 128], sizes = [2, 128], strides = [1, 1]} : vector<2x256xf32> to vector<2x128xf32>
    %141 = vector.extract_strided_slice %129 {offsets = [0, 256], sizes = [2, 128], strides = [1, 1]} : vector<2x384xf32> to vector<2x128xf32>
    %142 = vector.extract_strided_slice %130 {offsets = [0, 256], sizes = [2, 128], strides = [1, 1]} : vector<2x384xf32> to vector<2x128xf32>
    %143 = vector.broadcast %7 : vector<1x128xf32> to vector<2x128xf32>
    %144 = arith.addf %142, %143 : vector<2x128xf32>
    %145 = arith.mulf %139, %144 : vector<2x128xf32>
    %146 = arith.addf %141, %145 : vector<2x128xf32>
    %147 = math.tanh %146 : vector<2x128xf32>
    %cst_27 = arith.constant 1.000000e+00 : f32
    %148 = vector.broadcast %cst_27 : f32 to vector<2x128xf32>
    %149 = arith.subf %148, %140 : vector<2x128xf32>
    %150 = arith.mulf %149, %147 : vector<2x128xf32>
    %151 = arith.mulf %140, %128 : vector<2x128xf32>
    %152 = arith.addf %150, %151 : vector<2x128xf32>
    %153 = vector.extract_strided_slice %5 {offsets = [12, 0], sizes = [2, 384], strides = [1, 1]} : vector<16x384xf32> to vector<2x384xf32>
    %cst_28 = arith.constant dense<0.000000e+00> : vector<2x384xf32>
    %154 = tpu.matmul %152, %6, %cst_28 {dimension_numbers = #tpu.dot_dimension_numbers<[1], [0], [0], [1], [0, 0, 1, 1], [], []>} : vector<2x128xf32>, vector<128x384xf32>, vector<2x384xf32> -> vector<2x384xf32>
    %155 = vector.extract_strided_slice %153 {offsets = [0, 0], sizes = [2, 256], strides = [1, 1]} : vector<2x384xf32> to vector<2x256xf32>
    %156 = vector.extract_strided_slice %154 {offsets = [0, 0], sizes = [2, 256], strides = [1, 1]} : vector<2x384xf32> to vector<2x256xf32>
    %157 = arith.addf %155, %156 : vector<2x256xf32>
    %158 = arith.negf %157 : vector<2x256xf32>
    %159 = math.exp %158 : vector<2x256xf32>
    %cst_29 = arith.constant 1.000000e+00 : f32
    %160 = vector.broadcast %cst_29 : f32 to vector<2x256xf32>
    %161 = arith.addf %160, %159 : vector<2x256xf32>
    %162 = arith.divf %160, %161 : vector<2x256xf32>
    %163 = vector.extract_strided_slice %162 {offsets = [0, 0], sizes = [2, 128], strides = [1, 1]} : vector<2x256xf32> to vector<2x128xf32>
    %164 = vector.extract_strided_slice %162 {offsets = [0, 128], sizes = [2, 128], strides = [1, 1]} : vector<2x256xf32> to vector<2x128xf32>
    %165 = vector.extract_strided_slice %153 {offsets = [0, 256], sizes = [2, 128], strides = [1, 1]} : vector<2x384xf32> to vector<2x128xf32>
    %166 = vector.extract_strided_slice %154 {offsets = [0, 256], sizes = [2, 128], strides = [1, 1]} : vector<2x384xf32> to vector<2x128xf32>
    %167 = vector.broadcast %7 : vector<1x128xf32> to vector<2x128xf32>
    %168 = arith.addf %166, %167 : vector<2x128xf32>
    %169 = arith.mulf %163, %168 : vector<2x128xf32>
    %170 = arith.addf %165, %169 : vector<2x128xf32>
    %171 = math.tanh %170 : vector<2x128xf32>
    %cst_30 = arith.constant 1.000000e+00 : f32
    %172 = vector.broadcast %cst_30 : f32 to vector<2x128xf32>
    %173 = arith.subf %172, %164 : vector<2x128xf32>
    %174 = arith.mulf %173, %171 : vector<2x128xf32>
    %175 = arith.mulf %164, %152 : vector<2x128xf32>
    %176 = arith.addf %174, %175 : vector<2x128xf32>
    %177 = vector.extract_strided_slice %5 {offsets = [14, 0], sizes = [2, 384], strides = [1, 1]} : vector<16x384xf32> to vector<2x384xf32>
    %cst_31 = arith.constant dense<0.000000e+00> : vector<2x384xf32>
    %178 = tpu.matmul %176, %6, %cst_31 {dimension_numbers = #tpu.dot_dimension_numbers<[1], [0], [0], [1], [0, 0, 1, 1], [], []>} : vector<2x128xf32>, vector<128x384xf32>, vector<2x384xf32> -> vector<2x384xf32>
    %179 = vector.extract_strided_slice %177 {offsets = [0, 0], sizes = [2, 256], strides = [1, 1]} : vector<2x384xf32> to vector<2x256xf32>
    %180 = vector.extract_strided_slice %178 {offsets = [0, 0], sizes = [2, 256], strides = [1, 1]} : vector<2x384xf32> to vector<2x256xf32>
    %181 = arith.addf %179, %180 : vector<2x256xf32>
    %182 = arith.negf %181 : vector<2x256xf32>
    %183 = math.exp %182 : vector<2x256xf32>
    %cst_32 = arith.constant 1.000000e+00 : f32
    %184 = vector.broadcast %cst_32 : f32 to vector<2x256xf32>
    %185 = arith.addf %184, %183 : vector<2x256xf32>
    %186 = arith.divf %184, %185 : vector<2x256xf32>
    %187 = vector.extract_strided_slice %186 {offsets = [0, 0], sizes = [2, 128], strides = [1, 1]} : vector<2x256xf32> to vector<2x128xf32>
    %188 = vector.extract_strided_slice %186 {offsets = [0, 128], sizes = [2, 128], strides = [1, 1]} : vector<2x256xf32> to vector<2x128xf32>
    %189 = vector.extract_strided_slice %177 {offsets = [0, 256], sizes = [2, 128], strides = [1, 1]} : vector<2x384xf32> to vector<2x128xf32>
    %190 = vector.extract_strided_slice %178 {offsets = [0, 256], sizes = [2, 128], strides = [1, 1]} : vector<2x384xf32> to vector<2x128xf32>
    %191 = vector.broadcast %7 : vector<1x128xf32> to vector<2x128xf32>
    %192 = arith.addf %190, %191 : vector<2x128xf32>
    %193 = arith.mulf %187, %192 : vector<2x128xf32>
    %194 = arith.addf %189, %193 : vector<2x128xf32>
    %195 = math.tanh %194 : vector<2x128xf32>
    %cst_33 = arith.constant 1.000000e+00 : f32
    %196 = vector.broadcast %cst_33 : f32 to vector<2x128xf32>
    %197 = arith.subf %196, %188 : vector<2x128xf32>
    %198 = arith.mulf %197, %195 : vector<2x128xf32>
    %199 = arith.mulf %188, %176 : vector<2x128xf32>
    %200 = arith.addf %198, %199 : vector<2x128xf32>
    %c0_34 = arith.constant 0 : index
    %c0_35 = arith.constant 0 : index
    %201 = vector.load %arg5[%c0_34, %c0_35] : memref<1x384xf32, #tpu.memory_space<vmem>>, vector<1x384xf32>
    %c0_36 = arith.constant 0 : index
    %c0_37 = arith.constant 0 : index
    %202 = vector.load %arg6[%c0_36, %c0_37] : memref<128x512xf32, #tpu.memory_space<vmem>>, vector<128x512xf32>
    %c0_38 = arith.constant 0 : index
    %c0_39 = arith.constant 0 : index
    %203 = vector.load %arg7[%c0_38, %c0_39] : memref<1x384xf32, #tpu.memory_space<vmem>>, vector<1x384xf32>
    %c0_40 = arith.constant 0 : index
    %c0_41 = arith.constant 0 : index
    %204 = vector.load %arg8[%c0_40, %c0_41] : memref<1x128xf32, #tpu.memory_space<vmem>>, vector<1x128xf32>
    %c0_42 = arith.constant 0 : index
    %c0_43 = arith.constant 0 : index
    %205 = vector.load %arg9[%c0_42, %c0_43] : memref<1x128xf32, #tpu.memory_space<vmem>>, vector<1x128xf32>
    %c0_44 = arith.constant 0 : index
    %c0_45 = arith.constant 0 : index
    %206 = vector.load %arg10[%c0_44, %c0_45] : memref<1x128xf32, #tpu.memory_space<vmem>>, vector<1x128xf32>
    %c0_46 = arith.constant 0 : index
    %c0_47 = arith.constant 0 : index
    %207 = vector.load %arg11[%c0_46, %c0_47] : memref<1x1xf32, #tpu.memory_space<vmem>>, vector<1x1xf32>
    %cst_48 = arith.constant dense<0.000000e+00> : vector<2x512xf32>
    %208 = tpu.matmul %200, %202, %cst_48 {dimension_numbers = #tpu.dot_dimension_numbers<[1], [0], [0], [1], [0, 0, 1, 1], [], []>} : vector<2x128xf32>, vector<128x512xf32>, vector<2x512xf32> -> vector<2x512xf32>
    %209 = vector.extract_strided_slice %208 {offsets = [0, 0], sizes = [2, 384], strides = [1, 1]} : vector<2x512xf32> to vector<2x384xf32>
    %cst_49 = arith.constant 0.000000e+00 : f32
    %210 = vector.broadcast %cst_49 : f32 to vector<2x1xf32>
    %211 = vector.broadcast %210 : vector<2x1xf32> to vector<2x384xf32>
    %212 = vector.broadcast %201 : vector<1x384xf32> to vector<2x384xf32>
    %213 = arith.mulf %211, %212 : vector<2x384xf32>
    %214 = vector.broadcast %203 : vector<1x384xf32> to vector<2x384xf32>
    %215 = arith.addf %213, %214 : vector<2x384xf32>
    %216 = vector.extract_strided_slice %215 {offsets = [0, 0], sizes = [2, 256], strides = [1, 1]} : vector<2x384xf32> to vector<2x256xf32>
    %217 = vector.extract_strided_slice %209 {offsets = [0, 0], sizes = [2, 256], strides = [1, 1]} : vector<2x384xf32> to vector<2x256xf32>
    %218 = arith.addf %216, %217 : vector<2x256xf32>
    %219 = arith.negf %218 : vector<2x256xf32>
    %220 = math.exp %219 : vector<2x256xf32>
    %cst_50 = arith.constant 1.000000e+00 : f32
    %221 = vector.broadcast %cst_50 : f32 to vector<2x256xf32>
    %222 = arith.addf %221, %220 : vector<2x256xf32>
    %223 = arith.divf %221, %222 : vector<2x256xf32>
    %224 = vector.extract_strided_slice %223 {offsets = [0, 0], sizes = [2, 128], strides = [1, 1]} : vector<2x256xf32> to vector<2x128xf32>
    %225 = vector.extract_strided_slice %223 {offsets = [0, 128], sizes = [2, 128], strides = [1, 1]} : vector<2x256xf32> to vector<2x128xf32>
    %226 = vector.extract_strided_slice %215 {offsets = [0, 256], sizes = [2, 128], strides = [1, 1]} : vector<2x384xf32> to vector<2x128xf32>
    %227 = vector.extract_strided_slice %209 {offsets = [0, 256], sizes = [2, 128], strides = [1, 1]} : vector<2x384xf32> to vector<2x128xf32>
    %228 = vector.broadcast %204 : vector<1x128xf32> to vector<2x128xf32>
    %229 = arith.addf %227, %228 : vector<2x128xf32>
    %230 = arith.mulf %224, %229 : vector<2x128xf32>
    %231 = arith.addf %226, %230 : vector<2x128xf32>
    %232 = math.tanh %231 : vector<2x128xf32>
    %cst_51 = arith.constant 1.000000e+00 : f32
    %233 = vector.broadcast %cst_51 : f32 to vector<2x128xf32>
    %234 = arith.subf %233, %225 : vector<2x128xf32>
    %235 = arith.mulf %234, %232 : vector<2x128xf32>
    %236 = arith.mulf %225, %200 : vector<2x128xf32>
    %237 = arith.addf %235, %236 : vector<2x128xf32>
    %cst_52 = arith.constant dense<0.000000e+00> : vector<2x512xf32>
    %238 = tpu.matmul %237, %202, %cst_52 {dimension_numbers = #tpu.dot_dimension_numbers<[1], [0], [0], [1], [0, 0, 1, 1], [], []>} : vector<2x128xf32>, vector<128x512xf32>, vector<2x512xf32> -> vector<2x512xf32>
    %239 = vector.extract_strided_slice %238 {offsets = [0, 0], sizes = [2, 384], strides = [1, 1]} : vector<2x512xf32> to vector<2x384xf32>
    %240 = vector.extract_strided_slice %238 {offsets = [0, 384], sizes = [2, 128], strides = [1, 1]} : vector<2x512xf32> to vector<2x128xf32>
    %241 = vector.broadcast %205 : vector<1x128xf32> to vector<2x128xf32>
    %242 = arith.addf %240, %241 : vector<2x128xf32>
    %cst_53 = arith.constant 0.000000e+00 : f32
    %243 = vector.broadcast %cst_53 : f32 to vector<2x128xf32>
    %244 = arith.maximumf %242, %243 : vector<2x128xf32>
    %245 = vector.broadcast %206 : vector<1x128xf32> to vector<2x128xf32>
    %246 = arith.mulf %244, %245 : vector<2x128xf32>
    %cst_54 = arith.constant dense<0.000000e+00> : vector<2xf32>
    %247 = vector.multi_reduction <add>, %246, %cst_54 [1] : vector<2x128xf32> to vector<2xf32>
    %248 = vector.shape_cast %247 : vector<2xf32> to vector<2x1xf32>
    %249 = vector.broadcast %207 : vector<1x1xf32> to vector<2x1xf32>
    %250 = arith.addf %248, %249 : vector<2x1xf32>
    %c0_55 = arith.constant 0 : index
    %c0_56 = arith.constant 0 : index
    %251 = vector.load %arg12[%c0_55, %c0_56] : memref<2x10xf32, #tpu.memory_space<vmem>>, vector<2x1xf32>
    tpu.vector_store %arg12[%c0_55, %c0_56], %250 {strides = array<i32>} : memref<2x10xf32, #tpu.memory_space<vmem>>, vector<2x1xf32>,
    %252 = vector.broadcast %250 : vector<2x1xf32> to vector<2x384xf32>
    %253 = vector.broadcast %201 : vector<1x384xf32> to vector<2x384xf32>
    %254 = arith.mulf %252, %253 : vector<2x384xf32>
    %255 = vector.broadcast %203 : vector<1x384xf32> to vector<2x384xf32>
    %256 = arith.addf %254, %255 : vector<2x384xf32>
    %257 = vector.extract_strided_slice %256 {offsets = [0, 0], sizes = [2, 256], strides = [1, 1]} : vector<2x384xf32> to vector<2x256xf32>
    %258 = vector.extract_strided_slice %239 {offsets = [0, 0], sizes = [2, 256], strides = [1, 1]} : vector<2x384xf32> to vector<2x256xf32>
    %259 = arith.addf %257, %258 : vector<2x256xf32>
    %260 = arith.negf %259 : vector<2x256xf32>
    %261 = math.exp %260 : vector<2x256xf32>
    %cst_57 = arith.constant 1.000000e+00 : f32
    %262 = vector.broadcast %cst_57 : f32 to vector<2x256xf32>
    %263 = arith.addf %262, %261 : vector<2x256xf32>
    %264 = arith.divf %262, %263 : vector<2x256xf32>
    %265 = vector.extract_strided_slice %264 {offsets = [0, 0], sizes = [2, 128], strides = [1, 1]} : vector<2x256xf32> to vector<2x128xf32>
    %266 = vector.extract_strided_slice %264 {offsets = [0, 128], sizes = [2, 128], strides = [1, 1]} : vector<2x256xf32> to vector<2x128xf32>
    %267 = vector.extract_strided_slice %256 {offsets = [0, 256], sizes = [2, 128], strides = [1, 1]} : vector<2x384xf32> to vector<2x128xf32>
    %268 = vector.extract_strided_slice %239 {offsets = [0, 256], sizes = [2, 128], strides = [1, 1]} : vector<2x384xf32> to vector<2x128xf32>
    %269 = vector.broadcast %204 : vector<1x128xf32> to vector<2x128xf32>
    %270 = arith.addf %268, %269 : vector<2x128xf32>
    %271 = arith.mulf %265, %270 : vector<2x128xf32>
    %272 = arith.addf %267, %271 : vector<2x128xf32>
    %273 = math.tanh %272 : vector<2x128xf32>
    %cst_58 = arith.constant 1.000000e+00 : f32
    %274 = vector.broadcast %cst_58 : f32 to vector<2x128xf32>
    %275 = arith.subf %274, %266 : vector<2x128xf32>
    %276 = arith.mulf %275, %273 : vector<2x128xf32>
    %277 = arith.mulf %266, %237 : vector<2x128xf32>
    %278 = arith.addf %276, %277 : vector<2x128xf32>
    %cst_59 = arith.constant dense<0.000000e+00> : vector<2x512xf32>
    %279 = tpu.matmul %278, %202, %cst_59 {dimension_numbers = #tpu.dot_dimension_numbers<[1], [0], [0], [1], [0, 0, 1, 1], [], []>} : vector<2x128xf32>, vector<128x512xf32>, vector<2x512xf32> -> vector<2x512xf32>
    %280 = vector.extract_strided_slice %279 {offsets = [0, 0], sizes = [2, 384], strides = [1, 1]} : vector<2x512xf32> to vector<2x384xf32>
    %281 = vector.extract_strided_slice %279 {offsets = [0, 384], sizes = [2, 128], strides = [1, 1]} : vector<2x512xf32> to vector<2x128xf32>
    %282 = vector.broadcast %205 : vector<1x128xf32> to vector<2x128xf32>
    %283 = arith.addf %281, %282 : vector<2x128xf32>
    %cst_60 = arith.constant 0.000000e+00 : f32
    %284 = vector.broadcast %cst_60 : f32 to vector<2x128xf32>
    %285 = arith.maximumf %283, %284 : vector<2x128xf32>
    %286 = vector.broadcast %206 : vector<1x128xf32> to vector<2x128xf32>
    %287 = arith.mulf %285, %286 : vector<2x128xf32>
    %cst_61 = arith.constant dense<0.000000e+00> : vector<2xf32>
    %288 = vector.multi_reduction <add>, %287, %cst_61 [1] : vector<2x128xf32> to vector<2xf32>
    %289 = vector.shape_cast %288 : vector<2xf32> to vector<2x1xf32>
    %290 = vector.broadcast %207 : vector<1x1xf32> to vector<2x1xf32>
    %291 = arith.addf %289, %290 : vector<2x1xf32>
    %c0_62 = arith.constant 0 : index
    %c1 = arith.constant 1 : index
    %292 = vector.load %arg12[%c0_62, %c1] : memref<2x10xf32, #tpu.memory_space<vmem>>, vector<2x1xf32>
    tpu.vector_store %arg12[%c0_62, %c1], %291 {strides = array<i32>} : memref<2x10xf32, #tpu.memory_space<vmem>>, vector<2x1xf32>,
    %293 = vector.broadcast %291 : vector<2x1xf32> to vector<2x384xf32>
    %294 = vector.broadcast %201 : vector<1x384xf32> to vector<2x384xf32>
    %295 = arith.mulf %293, %294 : vector<2x384xf32>
    %296 = vector.broadcast %203 : vector<1x384xf32> to vector<2x384xf32>
    %297 = arith.addf %295, %296 : vector<2x384xf32>
    %298 = vector.extract_strided_slice %297 {offsets = [0, 0], sizes = [2, 256], strides = [1, 1]} : vector<2x384xf32> to vector<2x256xf32>
    %299 = vector.extract_strided_slice %280 {offsets = [0, 0], sizes = [2, 256], strides = [1, 1]} : vector<2x384xf32> to vector<2x256xf32>
    %300 = arith.addf %298, %299 : vector<2x256xf32>
    %301 = arith.negf %300 : vector<2x256xf32>
    %302 = math.exp %301 : vector<2x256xf32>
    %cst_63 = arith.constant 1.000000e+00 : f32
    %303 = vector.broadcast %cst_63 : f32 to vector<2x256xf32>
    %304 = arith.addf %303, %302 : vector<2x256xf32>
    %305 = arith.divf %303, %304 : vector<2x256xf32>
    %306 = vector.extract_strided_slice %305 {offsets = [0, 0], sizes = [2, 128], strides = [1, 1]} : vector<2x256xf32> to vector<2x128xf32>
    %307 = vector.extract_strided_slice %305 {offsets = [0, 128], sizes = [2, 128], strides = [1, 1]} : vector<2x256xf32> to vector<2x128xf32>
    %308 = vector.extract_strided_slice %297 {offsets = [0, 256], sizes = [2, 128], strides = [1, 1]} : vector<2x384xf32> to vector<2x128xf32>
    %309 = vector.extract_strided_slice %280 {offsets = [0, 256], sizes = [2, 128], strides = [1, 1]} : vector<2x384xf32> to vector<2x128xf32>
    %310 = vector.broadcast %204 : vector<1x128xf32> to vector<2x128xf32>
    %311 = arith.addf %309, %310 : vector<2x128xf32>
    %312 = arith.mulf %306, %311 : vector<2x128xf32>
    %313 = arith.addf %308, %312 : vector<2x128xf32>
    %314 = math.tanh %313 : vector<2x128xf32>
    %cst_64 = arith.constant 1.000000e+00 : f32
    %315 = vector.broadcast %cst_64 : f32 to vector<2x128xf32>
    %316 = arith.subf %315, %307 : vector<2x128xf32>
    %317 = arith.mulf %316, %314 : vector<2x128xf32>
    %318 = arith.mulf %307, %278 : vector<2x128xf32>
    %319 = arith.addf %317, %318 : vector<2x128xf32>
    %cst_65 = arith.constant dense<0.000000e+00> : vector<2x512xf32>
    %320 = tpu.matmul %319, %202, %cst_65 {dimension_numbers = #tpu.dot_dimension_numbers<[1], [0], [0], [1], [0, 0, 1, 1], [], []>} : vector<2x128xf32>, vector<128x512xf32>, vector<2x512xf32> -> vector<2x512xf32>
    %321 = vector.extract_strided_slice %320 {offsets = [0, 0], sizes = [2, 384], strides = [1, 1]} : vector<2x512xf32> to vector<2x384xf32>
    %322 = vector.extract_strided_slice %320 {offsets = [0, 384], sizes = [2, 128], strides = [1, 1]} : vector<2x512xf32> to vector<2x128xf32>
    %323 = vector.broadcast %205 : vector<1x128xf32> to vector<2x128xf32>
    %324 = arith.addf %322, %323 : vector<2x128xf32>
    %cst_66 = arith.constant 0.000000e+00 : f32
    %325 = vector.broadcast %cst_66 : f32 to vector<2x128xf32>
    %326 = arith.maximumf %324, %325 : vector<2x128xf32>
    %327 = vector.broadcast %206 : vector<1x128xf32> to vector<2x128xf32>
    %328 = arith.mulf %326, %327 : vector<2x128xf32>
    %cst_67 = arith.constant dense<0.000000e+00> : vector<2xf32>
    %329 = vector.multi_reduction <add>, %328, %cst_67 [1] : vector<2x128xf32> to vector<2xf32>
    %330 = vector.shape_cast %329 : vector<2xf32> to vector<2x1xf32>
    %331 = vector.broadcast %207 : vector<1x1xf32> to vector<2x1xf32>
    %332 = arith.addf %330, %331 : vector<2x1xf32>
    %c0_68 = arith.constant 0 : index
    %c2 = arith.constant 2 : index
    %333 = vector.load %arg12[%c0_68, %c2] : memref<2x10xf32, #tpu.memory_space<vmem>>, vector<2x1xf32>
    tpu.vector_store %arg12[%c0_68, %c2], %332 {strides = array<i32>} : memref<2x10xf32, #tpu.memory_space<vmem>>, vector<2x1xf32>,
    %334 = vector.broadcast %332 : vector<2x1xf32> to vector<2x384xf32>
    %335 = vector.broadcast %201 : vector<1x384xf32> to vector<2x384xf32>
    %336 = arith.mulf %334, %335 : vector<2x384xf32>
    %337 = vector.broadcast %203 : vector<1x384xf32> to vector<2x384xf32>
    %338 = arith.addf %336, %337 : vector<2x384xf32>
    %339 = vector.extract_strided_slice %338 {offsets = [0, 0], sizes = [2, 256], strides = [1, 1]} : vector<2x384xf32> to vector<2x256xf32>
    %340 = vector.extract_strided_slice %321 {offsets = [0, 0], sizes = [2, 256], strides = [1, 1]} : vector<2x384xf32> to vector<2x256xf32>
    %341 = arith.addf %339, %340 : vector<2x256xf32>
    %342 = arith.negf %341 : vector<2x256xf32>
    %343 = math.exp %342 : vector<2x256xf32>
    %cst_69 = arith.constant 1.000000e+00 : f32
    %344 = vector.broadcast %cst_69 : f32 to vector<2x256xf32>
    %345 = arith.addf %344, %343 : vector<2x256xf32>
    %346 = arith.divf %344, %345 : vector<2x256xf32>
    %347 = vector.extract_strided_slice %346 {offsets = [0, 0], sizes = [2, 128], strides = [1, 1]} : vector<2x256xf32> to vector<2x128xf32>
    %348 = vector.extract_strided_slice %346 {offsets = [0, 128], sizes = [2, 128], strides = [1, 1]} : vector<2x256xf32> to vector<2x128xf32>
    %349 = vector.extract_strided_slice %338 {offsets = [0, 256], sizes = [2, 128], strides = [1, 1]} : vector<2x384xf32> to vector<2x128xf32>
    %350 = vector.extract_strided_slice %321 {offsets = [0, 256], sizes = [2, 128], strides = [1, 1]} : vector<2x384xf32> to vector<2x128xf32>
    %351 = vector.broadcast %204 : vector<1x128xf32> to vector<2x128xf32>
    %352 = arith.addf %350, %351 : vector<2x128xf32>
    %353 = arith.mulf %347, %352 : vector<2x128xf32>
    %354 = arith.addf %349, %353 : vector<2x128xf32>
    %355 = math.tanh %354 : vector<2x128xf32>
    %cst_70 = arith.constant 1.000000e+00 : f32
    %356 = vector.broadcast %cst_70 : f32 to vector<2x128xf32>
    %357 = arith.subf %356, %348 : vector<2x128xf32>
    %358 = arith.mulf %357, %355 : vector<2x128xf32>
    %359 = arith.mulf %348, %319 : vector<2x128xf32>
    %360 = arith.addf %358, %359 : vector<2x128xf32>
    %cst_71 = arith.constant dense<0.000000e+00> : vector<2x512xf32>
    %361 = tpu.matmul %360, %202, %cst_71 {dimension_numbers = #tpu.dot_dimension_numbers<[1], [0], [0], [1], [0, 0, 1, 1], [], []>} : vector<2x128xf32>, vector<128x512xf32>, vector<2x512xf32> -> vector<2x512xf32>
    %362 = vector.extract_strided_slice %361 {offsets = [0, 0], sizes = [2, 384], strides = [1, 1]} : vector<2x512xf32> to vector<2x384xf32>
    %363 = vector.extract_strided_slice %361 {offsets = [0, 384], sizes = [2, 128], strides = [1, 1]} : vector<2x512xf32> to vector<2x128xf32>
    %364 = vector.broadcast %205 : vector<1x128xf32> to vector<2x128xf32>
    %365 = arith.addf %363, %364 : vector<2x128xf32>
    %cst_72 = arith.constant 0.000000e+00 : f32
    %366 = vector.broadcast %cst_72 : f32 to vector<2x128xf32>
    %367 = arith.maximumf %365, %366 : vector<2x128xf32>
    %368 = vector.broadcast %206 : vector<1x128xf32> to vector<2x128xf32>
    %369 = arith.mulf %367, %368 : vector<2x128xf32>
    %cst_73 = arith.constant dense<0.000000e+00> : vector<2xf32>
    %370 = vector.multi_reduction <add>, %369, %cst_73 [1] : vector<2x128xf32> to vector<2xf32>
    %371 = vector.shape_cast %370 : vector<2xf32> to vector<2x1xf32>
    %372 = vector.broadcast %207 : vector<1x1xf32> to vector<2x1xf32>
    %373 = arith.addf %371, %372 : vector<2x1xf32>
    %c0_74 = arith.constant 0 : index
    %c3 = arith.constant 3 : index
    %374 = vector.load %arg12[%c0_74, %c3] : memref<2x10xf32, #tpu.memory_space<vmem>>, vector<2x1xf32>
    tpu.vector_store %arg12[%c0_74, %c3], %373 {strides = array<i32>} : memref<2x10xf32, #tpu.memory_space<vmem>>, vector<2x1xf32>,
    %375 = vector.broadcast %373 : vector<2x1xf32> to vector<2x384xf32>
    %376 = vector.broadcast %201 : vector<1x384xf32> to vector<2x384xf32>
    %377 = arith.mulf %375, %376 : vector<2x384xf32>
    %378 = vector.broadcast %203 : vector<1x384xf32> to vector<2x384xf32>
    %379 = arith.addf %377, %378 : vector<2x384xf32>
    %380 = vector.extract_strided_slice %379 {offsets = [0, 0], sizes = [2, 256], strides = [1, 1]} : vector<2x384xf32> to vector<2x256xf32>
    %381 = vector.extract_strided_slice %362 {offsets = [0, 0], sizes = [2, 256], strides = [1, 1]} : vector<2x384xf32> to vector<2x256xf32>
    %382 = arith.addf %380, %381 : vector<2x256xf32>
    %383 = arith.negf %382 : vector<2x256xf32>
    %384 = math.exp %383 : vector<2x256xf32>
    %cst_75 = arith.constant 1.000000e+00 : f32
    %385 = vector.broadcast %cst_75 : f32 to vector<2x256xf32>
    %386 = arith.addf %385, %384 : vector<2x256xf32>
    %387 = arith.divf %385, %386 : vector<2x256xf32>
    %388 = vector.extract_strided_slice %387 {offsets = [0, 0], sizes = [2, 128], strides = [1, 1]} : vector<2x256xf32> to vector<2x128xf32>
    %389 = vector.extract_strided_slice %387 {offsets = [0, 128], sizes = [2, 128], strides = [1, 1]} : vector<2x256xf32> to vector<2x128xf32>
    %390 = vector.extract_strided_slice %379 {offsets = [0, 256], sizes = [2, 128], strides = [1, 1]} : vector<2x384xf32> to vector<2x128xf32>
    %391 = vector.extract_strided_slice %362 {offsets = [0, 256], sizes = [2, 128], strides = [1, 1]} : vector<2x384xf32> to vector<2x128xf32>
    %392 = vector.broadcast %204 : vector<1x128xf32> to vector<2x128xf32>
    %393 = arith.addf %391, %392 : vector<2x128xf32>
    %394 = arith.mulf %388, %393 : vector<2x128xf32>
    %395 = arith.addf %390, %394 : vector<2x128xf32>
    %396 = math.tanh %395 : vector<2x128xf32>
    %cst_76 = arith.constant 1.000000e+00 : f32
    %397 = vector.broadcast %cst_76 : f32 to vector<2x128xf32>
    %398 = arith.subf %397, %389 : vector<2x128xf32>
    %399 = arith.mulf %398, %396 : vector<2x128xf32>
    %400 = arith.mulf %389, %360 : vector<2x128xf32>
    %401 = arith.addf %399, %400 : vector<2x128xf32>
    %cst_77 = arith.constant dense<0.000000e+00> : vector<2x512xf32>
    %402 = tpu.matmul %401, %202, %cst_77 {dimension_numbers = #tpu.dot_dimension_numbers<[1], [0], [0], [1], [0, 0, 1, 1], [], []>} : vector<2x128xf32>, vector<128x512xf32>, vector<2x512xf32> -> vector<2x512xf32>
    %403 = vector.extract_strided_slice %402 {offsets = [0, 0], sizes = [2, 384], strides = [1, 1]} : vector<2x512xf32> to vector<2x384xf32>
    %404 = vector.extract_strided_slice %402 {offsets = [0, 384], sizes = [2, 128], strides = [1, 1]} : vector<2x512xf32> to vector<2x128xf32>
    %405 = vector.broadcast %205 : vector<1x128xf32> to vector<2x128xf32>
    %406 = arith.addf %404, %405 : vector<2x128xf32>
    %cst_78 = arith.constant 0.000000e+00 : f32
    %407 = vector.broadcast %cst_78 : f32 to vector<2x128xf32>
    %408 = arith.maximumf %406, %407 : vector<2x128xf32>
    %409 = vector.broadcast %206 : vector<1x128xf32> to vector<2x128xf32>
    %410 = arith.mulf %408, %409 : vector<2x128xf32>
    %cst_79 = arith.constant dense<0.000000e+00> : vector<2xf32>
    %411 = vector.multi_reduction <add>, %410, %cst_79 [1] : vector<2x128xf32> to vector<2xf32>
    %412 = vector.shape_cast %411 : vector<2xf32> to vector<2x1xf32>
    %413 = vector.broadcast %207 : vector<1x1xf32> to vector<2x1xf32>
    %414 = arith.addf %412, %413 : vector<2x1xf32>
    %c0_80 = arith.constant 0 : index
    %c4 = arith.constant 4 : index
    %415 = vector.load %arg12[%c0_80, %c4] : memref<2x10xf32, #tpu.memory_space<vmem>>, vector<2x1xf32>
    tpu.vector_store %arg12[%c0_80, %c4], %414 {strides = array<i32>} : memref<2x10xf32, #tpu.memory_space<vmem>>, vector<2x1xf32>,
    %416 = vector.broadcast %414 : vector<2x1xf32> to vector<2x384xf32>
    %417 = vector.broadcast %201 : vector<1x384xf32> to vector<2x384xf32>
    %418 = arith.mulf %416, %417 : vector<2x384xf32>
    %419 = vector.broadcast %203 : vector<1x384xf32> to vector<2x384xf32>
    %420 = arith.addf %418, %419 : vector<2x384xf32>
    %421 = vector.extract_strided_slice %420 {offsets = [0, 0], sizes = [2, 256], strides = [1, 1]} : vector<2x384xf32> to vector<2x256xf32>
    %422 = vector.extract_strided_slice %403 {offsets = [0, 0], sizes = [2, 256], strides = [1, 1]} : vector<2x384xf32> to vector<2x256xf32>
    %423 = arith.addf %421, %422 : vector<2x256xf32>
    %424 = arith.negf %423 : vector<2x256xf32>
    %425 = math.exp %424 : vector<2x256xf32>
    %cst_81 = arith.constant 1.000000e+00 : f32
    %426 = vector.broadcast %cst_81 : f32 to vector<2x256xf32>
    %427 = arith.addf %426, %425 : vector<2x256xf32>
    %428 = arith.divf %426, %427 : vector<2x256xf32>
    %429 = vector.extract_strided_slice %428 {offsets = [0, 0], sizes = [2, 128], strides = [1, 1]} : vector<2x256xf32> to vector<2x128xf32>
    %430 = vector.extract_strided_slice %428 {offsets = [0, 128], sizes = [2, 128], strides = [1, 1]} : vector<2x256xf32> to vector<2x128xf32>
    %431 = vector.extract_strided_slice %420 {offsets = [0, 256], sizes = [2, 128], strides = [1, 1]} : vector<2x384xf32> to vector<2x128xf32>
    %432 = vector.extract_strided_slice %403 {offsets = [0, 256], sizes = [2, 128], strides = [1, 1]} : vector<2x384xf32> to vector<2x128xf32>
    %433 = vector.broadcast %204 : vector<1x128xf32> to vector<2x128xf32>
    %434 = arith.addf %432, %433 : vector<2x128xf32>
    %435 = arith.mulf %429, %434 : vector<2x128xf32>
    %436 = arith.addf %431, %435 : vector<2x128xf32>
    %437 = math.tanh %436 : vector<2x128xf32>
    %cst_82 = arith.constant 1.000000e+00 : f32
    %438 = vector.broadcast %cst_82 : f32 to vector<2x128xf32>
    %439 = arith.subf %438, %430 : vector<2x128xf32>
    %440 = arith.mulf %439, %437 : vector<2x128xf32>
    %441 = arith.mulf %430, %401 : vector<2x128xf32>
    %442 = arith.addf %440, %441 : vector<2x128xf32>
    %cst_83 = arith.constant dense<0.000000e+00> : vector<2x512xf32>
    %443 = tpu.matmul %442, %202, %cst_83 {dimension_numbers = #tpu.dot_dimension_numbers<[1], [0], [0], [1], [0, 0, 1, 1], [], []>} : vector<2x128xf32>, vector<128x512xf32>, vector<2x512xf32> -> vector<2x512xf32>
    %444 = vector.extract_strided_slice %443 {offsets = [0, 0], sizes = [2, 384], strides = [1, 1]} : vector<2x512xf32> to vector<2x384xf32>
    %445 = vector.extract_strided_slice %443 {offsets = [0, 384], sizes = [2, 128], strides = [1, 1]} : vector<2x512xf32> to vector<2x128xf32>
    %446 = vector.broadcast %205 : vector<1x128xf32> to vector<2x128xf32>
    %447 = arith.addf %445, %446 : vector<2x128xf32>
    %cst_84 = arith.constant 0.000000e+00 : f32
    %448 = vector.broadcast %cst_84 : f32 to vector<2x128xf32>
    %449 = arith.maximumf %447, %448 : vector<2x128xf32>
    %450 = vector.broadcast %206 : vector<1x128xf32> to vector<2x128xf32>
    %451 = arith.mulf %449, %450 : vector<2x128xf32>
    %cst_85 = arith.constant dense<0.000000e+00> : vector<2xf32>
    %452 = vector.multi_reduction <add>, %451, %cst_85 [1] : vector<2x128xf32> to vector<2xf32>
    %453 = vector.shape_cast %452 : vector<2xf32> to vector<2x1xf32>
    %454 = vector.broadcast %207 : vector<1x1xf32> to vector<2x1xf32>
    %455 = arith.addf %453, %454 : vector<2x1xf32>
    %c0_86 = arith.constant 0 : index
    %c5 = arith.constant 5 : index
    %456 = vector.load %arg12[%c0_86, %c5] : memref<2x10xf32, #tpu.memory_space<vmem>>, vector<2x1xf32>
    tpu.vector_store %arg12[%c0_86, %c5], %455 {strides = array<i32>} : memref<2x10xf32, #tpu.memory_space<vmem>>, vector<2x1xf32>,
    %457 = vector.broadcast %455 : vector<2x1xf32> to vector<2x384xf32>
    %458 = vector.broadcast %201 : vector<1x384xf32> to vector<2x384xf32>
    %459 = arith.mulf %457, %458 : vector<2x384xf32>
    %460 = vector.broadcast %203 : vector<1x384xf32> to vector<2x384xf32>
    %461 = arith.addf %459, %460 : vector<2x384xf32>
    %462 = vector.extract_strided_slice %461 {offsets = [0, 0], sizes = [2, 256], strides = [1, 1]} : vector<2x384xf32> to vector<2x256xf32>
    %463 = vector.extract_strided_slice %444 {offsets = [0, 0], sizes = [2, 256], strides = [1, 1]} : vector<2x384xf32> to vector<2x256xf32>
    %464 = arith.addf %462, %463 : vector<2x256xf32>
    %465 = arith.negf %464 : vector<2x256xf32>
    %466 = math.exp %465 : vector<2x256xf32>
    %cst_87 = arith.constant 1.000000e+00 : f32
    %467 = vector.broadcast %cst_87 : f32 to vector<2x256xf32>
    %468 = arith.addf %467, %466 : vector<2x256xf32>
    %469 = arith.divf %467, %468 : vector<2x256xf32>
    %470 = vector.extract_strided_slice %469 {offsets = [0, 0], sizes = [2, 128], strides = [1, 1]} : vector<2x256xf32> to vector<2x128xf32>
    %471 = vector.extract_strided_slice %469 {offsets = [0, 128], sizes = [2, 128], strides = [1, 1]} : vector<2x256xf32> to vector<2x128xf32>
    %472 = vector.extract_strided_slice %461 {offsets = [0, 256], sizes = [2, 128], strides = [1, 1]} : vector<2x384xf32> to vector<2x128xf32>
    %473 = vector.extract_strided_slice %444 {offsets = [0, 256], sizes = [2, 128], strides = [1, 1]} : vector<2x384xf32> to vector<2x128xf32>
    %474 = vector.broadcast %204 : vector<1x128xf32> to vector<2x128xf32>
    %475 = arith.addf %473, %474 : vector<2x128xf32>
    %476 = arith.mulf %470, %475 : vector<2x128xf32>
    %477 = arith.addf %472, %476 : vector<2x128xf32>
    %478 = math.tanh %477 : vector<2x128xf32>
    %cst_88 = arith.constant 1.000000e+00 : f32
    %479 = vector.broadcast %cst_88 : f32 to vector<2x128xf32>
    %480 = arith.subf %479, %471 : vector<2x128xf32>
    %481 = arith.mulf %480, %478 : vector<2x128xf32>
    %482 = arith.mulf %471, %442 : vector<2x128xf32>
    %483 = arith.addf %481, %482 : vector<2x128xf32>
    %cst_89 = arith.constant dense<0.000000e+00> : vector<2x512xf32>
    %484 = tpu.matmul %483, %202, %cst_89 {dimension_numbers = #tpu.dot_dimension_numbers<[1], [0], [0], [1], [0, 0, 1, 1], [], []>} : vector<2x128xf32>, vector<128x512xf32>, vector<2x512xf32> -> vector<2x512xf32>
    %485 = vector.extract_strided_slice %484 {offsets = [0, 0], sizes = [2, 384], strides = [1, 1]} : vector<2x512xf32> to vector<2x384xf32>
    %486 = vector.extract_strided_slice %484 {offsets = [0, 384], sizes = [2, 128], strides = [1, 1]} : vector<2x512xf32> to vector<2x128xf32>
    %487 = vector.broadcast %205 : vector<1x128xf32> to vector<2x128xf32>
    %488 = arith.addf %486, %487 : vector<2x128xf32>
    %cst_90 = arith.constant 0.000000e+00 : f32
    %489 = vector.broadcast %cst_90 : f32 to vector<2x128xf32>
    %490 = arith.maximumf %488, %489 : vector<2x128xf32>
    %491 = vector.broadcast %206 : vector<1x128xf32> to vector<2x128xf32>
    %492 = arith.mulf %490, %491 : vector<2x128xf32>
    %cst_91 = arith.constant dense<0.000000e+00> : vector<2xf32>
    %493 = vector.multi_reduction <add>, %492, %cst_91 [1] : vector<2x128xf32> to vector<2xf32>
    %494 = vector.shape_cast %493 : vector<2xf32> to vector<2x1xf32>
    %495 = vector.broadcast %207 : vector<1x1xf32> to vector<2x1xf32>
    %496 = arith.addf %494, %495 : vector<2x1xf32>
    %c0_92 = arith.constant 0 : index
    %c6 = arith.constant 6 : index
    %497 = vector.load %arg12[%c0_92, %c6] : memref<2x10xf32, #tpu.memory_space<vmem>>, vector<2x1xf32>
    tpu.vector_store %arg12[%c0_92, %c6], %496 {strides = array<i32>} : memref<2x10xf32, #tpu.memory_space<vmem>>, vector<2x1xf32>,
    %498 = vector.broadcast %496 : vector<2x1xf32> to vector<2x384xf32>
    %499 = vector.broadcast %201 : vector<1x384xf32> to vector<2x384xf32>
    %500 = arith.mulf %498, %499 : vector<2x384xf32>
    %501 = vector.broadcast %203 : vector<1x384xf32> to vector<2x384xf32>
    %502 = arith.addf %500, %501 : vector<2x384xf32>
    %503 = vector.extract_strided_slice %502 {offsets = [0, 0], sizes = [2, 256], strides = [1, 1]} : vector<2x384xf32> to vector<2x256xf32>
    %504 = vector.extract_strided_slice %485 {offsets = [0, 0], sizes = [2, 256], strides = [1, 1]} : vector<2x384xf32> to vector<2x256xf32>
    %505 = arith.addf %503, %504 : vector<2x256xf32>
    %506 = arith.negf %505 : vector<2x256xf32>
    %507 = math.exp %506 : vector<2x256xf32>
    %cst_93 = arith.constant 1.000000e+00 : f32
    %508 = vector.broadcast %cst_93 : f32 to vector<2x256xf32>
    %509 = arith.addf %508, %507 : vector<2x256xf32>
    %510 = arith.divf %508, %509 : vector<2x256xf32>
    %511 = vector.extract_strided_slice %510 {offsets = [0, 0], sizes = [2, 128], strides = [1, 1]} : vector<2x256xf32> to vector<2x128xf32>
    %512 = vector.extract_strided_slice %510 {offsets = [0, 128], sizes = [2, 128], strides = [1, 1]} : vector<2x256xf32> to vector<2x128xf32>
    %513 = vector.extract_strided_slice %502 {offsets = [0, 256], sizes = [2, 128], strides = [1, 1]} : vector<2x384xf32> to vector<2x128xf32>
    %514 = vector.extract_strided_slice %485 {offsets = [0, 256], sizes = [2, 128], strides = [1, 1]} : vector<2x384xf32> to vector<2x128xf32>
    %515 = vector.broadcast %204 : vector<1x128xf32> to vector<2x128xf32>
    %516 = arith.addf %514, %515 : vector<2x128xf32>
    %517 = arith.mulf %511, %516 : vector<2x128xf32>
    %518 = arith.addf %513, %517 : vector<2x128xf32>
    %519 = math.tanh %518 : vector<2x128xf32>
    %cst_94 = arith.constant 1.000000e+00 : f32
    %520 = vector.broadcast %cst_94 : f32 to vector<2x128xf32>
    %521 = arith.subf %520, %512 : vector<2x128xf32>
    %522 = arith.mulf %521, %519 : vector<2x128xf32>
    %523 = arith.mulf %512, %483 : vector<2x128xf32>
    %524 = arith.addf %522, %523 : vector<2x128xf32>
    %cst_95 = arith.constant dense<0.000000e+00> : vector<2x512xf32>
    %525 = tpu.matmul %524, %202, %cst_95 {dimension_numbers = #tpu.dot_dimension_numbers<[1], [0], [0], [1], [0, 0, 1, 1], [], []>} : vector<2x128xf32>, vector<128x512xf32>, vector<2x512xf32> -> vector<2x512xf32>
    %526 = vector.extract_strided_slice %525 {offsets = [0, 0], sizes = [2, 384], strides = [1, 1]} : vector<2x512xf32> to vector<2x384xf32>
    %527 = vector.extract_strided_slice %525 {offsets = [0, 384], sizes = [2, 128], strides = [1, 1]} : vector<2x512xf32> to vector<2x128xf32>
    %528 = vector.broadcast %205 : vector<1x128xf32> to vector<2x128xf32>
    %529 = arith.addf %527, %528 : vector<2x128xf32>
    %cst_96 = arith.constant 0.000000e+00 : f32
    %530 = vector.broadcast %cst_96 : f32 to vector<2x128xf32>
    %531 = arith.maximumf %529, %530 : vector<2x128xf32>
    %532 = vector.broadcast %206 : vector<1x128xf32> to vector<2x128xf32>
    %533 = arith.mulf %531, %532 : vector<2x128xf32>
    %cst_97 = arith.constant dense<0.000000e+00> : vector<2xf32>
    %534 = vector.multi_reduction <add>, %533, %cst_97 [1] : vector<2x128xf32> to vector<2xf32>
    %535 = vector.shape_cast %534 : vector<2xf32> to vector<2x1xf32>
    %536 = vector.broadcast %207 : vector<1x1xf32> to vector<2x1xf32>
    %537 = arith.addf %535, %536 : vector<2x1xf32>
    %c0_98 = arith.constant 0 : index
    %c7 = arith.constant 7 : index
    %538 = vector.load %arg12[%c0_98, %c7] : memref<2x10xf32, #tpu.memory_space<vmem>>, vector<2x1xf32>
    tpu.vector_store %arg12[%c0_98, %c7], %537 {strides = array<i32>} : memref<2x10xf32, #tpu.memory_space<vmem>>, vector<2x1xf32>,
    %539 = vector.broadcast %537 : vector<2x1xf32> to vector<2x384xf32>
    %540 = vector.broadcast %201 : vector<1x384xf32> to vector<2x384xf32>
    %541 = arith.mulf %539, %540 : vector<2x384xf32>
    %542 = vector.broadcast %203 : vector<1x384xf32> to vector<2x384xf32>
    %543 = arith.addf %541, %542 : vector<2x384xf32>
    %544 = vector.extract_strided_slice %543 {offsets = [0, 0], sizes = [2, 256], strides = [1, 1]} : vector<2x384xf32> to vector<2x256xf32>
    %545 = vector.extract_strided_slice %526 {offsets = [0, 0], sizes = [2, 256], strides = [1, 1]} : vector<2x384xf32> to vector<2x256xf32>
    %546 = arith.addf %544, %545 : vector<2x256xf32>
    %547 = arith.negf %546 : vector<2x256xf32>
    %548 = math.exp %547 : vector<2x256xf32>
    %cst_99 = arith.constant 1.000000e+00 : f32
    %549 = vector.broadcast %cst_99 : f32 to vector<2x256xf32>
    %550 = arith.addf %549, %548 : vector<2x256xf32>
    %551 = arith.divf %549, %550 : vector<2x256xf32>
    %552 = vector.extract_strided_slice %551 {offsets = [0, 0], sizes = [2, 128], strides = [1, 1]} : vector<2x256xf32> to vector<2x128xf32>
    %553 = vector.extract_strided_slice %551 {offsets = [0, 128], sizes = [2, 128], strides = [1, 1]} : vector<2x256xf32> to vector<2x128xf32>
    %554 = vector.extract_strided_slice %543 {offsets = [0, 256], sizes = [2, 128], strides = [1, 1]} : vector<2x384xf32> to vector<2x128xf32>
    %555 = vector.extract_strided_slice %526 {offsets = [0, 256], sizes = [2, 128], strides = [1, 1]} : vector<2x384xf32> to vector<2x128xf32>
    %556 = vector.broadcast %204 : vector<1x128xf32> to vector<2x128xf32>
    %557 = arith.addf %555, %556 : vector<2x128xf32>
    %558 = arith.mulf %552, %557 : vector<2x128xf32>
    %559 = arith.addf %554, %558 : vector<2x128xf32>
    %560 = math.tanh %559 : vector<2x128xf32>
    %cst_100 = arith.constant 1.000000e+00 : f32
    %561 = vector.broadcast %cst_100 : f32 to vector<2x128xf32>
    %562 = arith.subf %561, %553 : vector<2x128xf32>
    %563 = arith.mulf %562, %560 : vector<2x128xf32>
    %564 = arith.mulf %553, %524 : vector<2x128xf32>
    %565 = arith.addf %563, %564 : vector<2x128xf32>
    %cst_101 = arith.constant dense<0.000000e+00> : vector<2x512xf32>
    %566 = tpu.matmul %565, %202, %cst_101 {dimension_numbers = #tpu.dot_dimension_numbers<[1], [0], [0], [1], [0, 0, 1, 1], [], []>} : vector<2x128xf32>, vector<128x512xf32>, vector<2x512xf32> -> vector<2x512xf32>
    %567 = vector.extract_strided_slice %566 {offsets = [0, 0], sizes = [2, 384], strides = [1, 1]} : vector<2x512xf32> to vector<2x384xf32>
    %568 = vector.extract_strided_slice %566 {offsets = [0, 384], sizes = [2, 128], strides = [1, 1]} : vector<2x512xf32> to vector<2x128xf32>
    %569 = vector.broadcast %205 : vector<1x128xf32> to vector<2x128xf32>
    %570 = arith.addf %568, %569 : vector<2x128xf32>
    %cst_102 = arith.constant 0.000000e+00 : f32
    %571 = vector.broadcast %cst_102 : f32 to vector<2x128xf32>
    %572 = arith.maximumf %570, %571 : vector<2x128xf32>
    %573 = vector.broadcast %206 : vector<1x128xf32> to vector<2x128xf32>
    %574 = arith.mulf %572, %573 : vector<2x128xf32>
    %cst_103 = arith.constant dense<0.000000e+00> : vector<2xf32>
    %575 = vector.multi_reduction <add>, %574, %cst_103 [1] : vector<2x128xf32> to vector<2xf32>
    %576 = vector.shape_cast %575 : vector<2xf32> to vector<2x1xf32>
    %577 = vector.broadcast %207 : vector<1x1xf32> to vector<2x1xf32>
    %578 = arith.addf %576, %577 : vector<2x1xf32>
    %c0_104 = arith.constant 0 : index
    %c8 = arith.constant 8 : index
    %579 = vector.load %arg12[%c0_104, %c8] : memref<2x10xf32, #tpu.memory_space<vmem>>, vector<2x1xf32>
    tpu.vector_store %arg12[%c0_104, %c8], %578 {strides = array<i32>} : memref<2x10xf32, #tpu.memory_space<vmem>>, vector<2x1xf32>,
    %580 = vector.broadcast %578 : vector<2x1xf32> to vector<2x384xf32>
    %581 = vector.broadcast %201 : vector<1x384xf32> to vector<2x384xf32>
    %582 = arith.mulf %580, %581 : vector<2x384xf32>
    %583 = vector.broadcast %203 : vector<1x384xf32> to vector<2x384xf32>
    %584 = arith.addf %582, %583 : vector<2x384xf32>
    %585 = vector.extract_strided_slice %584 {offsets = [0, 0], sizes = [2, 256], strides = [1, 1]} : vector<2x384xf32> to vector<2x256xf32>
    %586 = vector.extract_strided_slice %567 {offsets = [0, 0], sizes = [2, 256], strides = [1, 1]} : vector<2x384xf32> to vector<2x256xf32>
    %587 = arith.addf %585, %586 : vector<2x256xf32>
    %588 = arith.negf %587 : vector<2x256xf32>
    %589 = math.exp %588 : vector<2x256xf32>
    %cst_105 = arith.constant 1.000000e+00 : f32
    %590 = vector.broadcast %cst_105 : f32 to vector<2x256xf32>
    %591 = arith.addf %590, %589 : vector<2x256xf32>
    %592 = arith.divf %590, %591 : vector<2x256xf32>
    %593 = vector.extract_strided_slice %592 {offsets = [0, 0], sizes = [2, 128], strides = [1, 1]} : vector<2x256xf32> to vector<2x128xf32>
    %594 = vector.extract_strided_slice %592 {offsets = [0, 128], sizes = [2, 128], strides = [1, 1]} : vector<2x256xf32> to vector<2x128xf32>
    %595 = vector.extract_strided_slice %584 {offsets = [0, 256], sizes = [2, 128], strides = [1, 1]} : vector<2x384xf32> to vector<2x128xf32>
    %596 = vector.extract_strided_slice %567 {offsets = [0, 256], sizes = [2, 128], strides = [1, 1]} : vector<2x384xf32> to vector<2x128xf32>
    %597 = vector.broadcast %204 : vector<1x128xf32> to vector<2x128xf32>
    %598 = arith.addf %596, %597 : vector<2x128xf32>
    %599 = arith.mulf %593, %598 : vector<2x128xf32>
    %600 = arith.addf %595, %599 : vector<2x128xf32>
    %601 = math.tanh %600 : vector<2x128xf32>
    %cst_106 = arith.constant 1.000000e+00 : f32
    %602 = vector.broadcast %cst_106 : f32 to vector<2x128xf32>
    %603 = arith.subf %602, %594 : vector<2x128xf32>
    %604 = arith.mulf %603, %601 : vector<2x128xf32>
    %605 = arith.mulf %594, %565 : vector<2x128xf32>
    %606 = arith.addf %604, %605 : vector<2x128xf32>
    %cst_107 = arith.constant dense<0.000000e+00> : vector<2x512xf32>
    %607 = tpu.matmul %606, %202, %cst_107 {dimension_numbers = #tpu.dot_dimension_numbers<[1], [0], [0], [1], [0, 0, 1, 1], [], []>} : vector<2x128xf32>, vector<128x512xf32>, vector<2x512xf32> -> vector<2x512xf32>
    %608 = vector.extract_strided_slice %607 {offsets = [0, 384], sizes = [2, 128], strides = [1, 1]} : vector<2x512xf32> to vector<2x128xf32>
    %609 = vector.broadcast %205 : vector<1x128xf32> to vector<2x128xf32>
    %610 = arith.addf %608, %609 : vector<2x128xf32>
    %cst_108 = arith.constant 0.000000e+00 : f32
    %611 = vector.broadcast %cst_108 : f32 to vector<2x128xf32>
    %612 = arith.maximumf %610, %611 : vector<2x128xf32>
    %613 = vector.broadcast %206 : vector<1x128xf32> to vector<2x128xf32>
    %614 = arith.mulf %612, %613 : vector<2x128xf32>
    %cst_109 = arith.constant dense<0.000000e+00> : vector<2xf32>
    %615 = vector.multi_reduction <add>, %614, %cst_109 [1] : vector<2x128xf32> to vector<2xf32>
    %616 = vector.shape_cast %615 : vector<2xf32> to vector<2x1xf32>
    %617 = vector.broadcast %207 : vector<1x1xf32> to vector<2x1xf32>
    %618 = arith.addf %616, %617 : vector<2x1xf32>
    %c0_110 = arith.constant 0 : index
    %c9 = arith.constant 9 : index
    %619 = vector.load %arg12[%c0_110, %c9] : memref<2x10xf32, #tpu.memory_space<vmem>>, vector<2x1xf32>
    tpu.vector_store %arg12[%c0_110, %c9], %618 {strides = array<i32>} : memref<2x10xf32, #tpu.memory_space<vmem>>, vector<2x1xf32>,
    return
  }
}

</mosaic_0001>

<bundles_post_ra>
// kernel: tpu_custom_call.1
= control target key start
LH: loop header
LB: loop body
LE: loop exit
PB: predicated region body
PF: predicated region fallthrough
CT: control target
= control target key end

     0   :  { %s6872_s0 = inlined_call_operand.vmem [shape: f32[16,3], index: 0, kind: input, shape index: {}]   ;;  %s6873_s1 = inlined_call_operand.vmem [shape: f32[3,384], index: 1, kind: input, shape index: {}]   ;;  %s6874_s2 = inlined_call_operand.hbm [shape: f32[128,384], index: 2, kind: input, shape index: {}]   ;;  %s6875_s3 = inlined_call_operand.vmem [shape: f32[1,384], index: 3, kind: input, shape index: {}]   ;;  %s6876_s4 = inlined_call_operand.vmem [shape: f32[1,128], index: 4, kind: input, shape index: {}]   ;;  %s6877_s5 = inlined_call_operand.vmem [shape: f32[1,384], index: 5, kind: input, shape index: {}]   ;;  %s6878_s6 = inlined_call_operand.hbm [shape: f32[128,512], index: 6, kind: input, shape index: {}]   ;;  %s6879_s7 = inlined_call_operand.vmem [shape: f32[1,384], index: 7, kind: input, shape index: {}]   ;;  %s6880_s8 = inlined_call_operand.vmem [shape: f32[1,128], index: 8, kind: input, shape index: {}]   ;;  %s6881_s9 = inlined_call_operand.vmem [shape: f32[1,128], index: 9, kind: input, shape index: {}]   ;;  %s6882_s10 = inlined_call_operand.vmem [shape: f32[1,128], index: 10, kind: input, shape index: {}]   ;;  %s6883_s11 = inlined_call_operand.<no memory space> [shape: f32[1,1], index: 11, kind: input, shape index: {}]   ;;  %s6884_s12 = inlined_call_operand.hbm [shape: f32[2,10], index: 12, kind: output, shape index: {}]  }
   0x1   :  { %v17_v0 = vstv %s6883_s11 }
   0x2   :  { %18 = vst [vmem:[#allocation2] sm:$0x1] %v17_v0 }
   0x3   :  { %19 = vsyncpa [#allocation4], 0 }
   0x4   :  { %20 = vsyncpa [#allocation7], 0 }
   0x5   :  { %21 = vsyncpa [#allocation5], 0  ;;  %s5654_s23 = smov [#allocation3]   ;;  %s5582_s27 = scalar_lea.hbm %s6874_s2, 6144 }
   0x6   :  { %s31_s24 = sshll.u32 %s5654_s23, 4  ;;  %p5583_p0 = scmp.ne.s32.totalorder %s6874_s2, %s5582_s27  ;;  %s32_s24 = int_to_ptr.vmem [resolvable:$true] %s31_s24 }
   0x7   :  { %p5586_p1 = scmp.lt.u32.totalorder %s5582_s27, %s6874_s2 }
   0x9   :  { %p5588_p2 = pnand %p5586_p1, %p5583_p0 }
   0xb   :  { %5591 = shalt.err (!%p5588_p2)
}
   0xc   :  { %s5592_s11 = scalar_lea.vmem %s32_s24, 6144  ;;  %p5597_p4 = scmp.lt.s32.totalorder %s32_s24, %s32_s24 }
   0xd   :  { %p5593_p3 = scmp.ne.s32.totalorder %s32_s24, %s5592_s11  ;;  %p5598_p5 = scmp.lt.s32.totalorder %s5592_s11, %s5592_s11 }
   0xf   :  { %p5599_p6 = por %p5598_p5, %p5597_p4 }
  0x11   :  { %p5600_p7 = pnand %p5599_p6, %p5593_p3 }
  0x13   :  { %5603 = shalt.err (!%p5600_p7)
}
  0x14   :  { %s5655_s14 = smov 384   ;;  %s5656_s15 = smov 24  }
  0x15   :  { %37 = dma.hbm_to_vmem [thread:$0]  %s6874_s2, 6144, %s32_s24, [#allocation4], %s5655_s14, %s5655_s14, %s5656_s15  }
  0x16   :  { %s5657_s18 = smov [#allocation6]   ;;  %s5604_s22 = scalar_lea.hbm %s6878_s6, 8192 }
  0x17   :  { %s49_s19 = sshll.u32 %s5657_s18, 4  ;;  %p5605_p8 = scmp.ne.s32.totalorder %s6878_s6, %s5604_s22  ;;  %s50_s19 = int_to_ptr.vmem [resolvable:$true] %s49_s19 }
  0x18   :  { %p5608_p9 = scmp.lt.u32.totalorder %s5604_s22, %s6878_s6 }
  0x1a   :  { %p5610_p10 = pnand %p5608_p9, %p5605_p8 }
  0x1c   :  { %5613 = shalt.err (!%p5610_p10)
}
  0x1d   :  { %s5614_s28 = scalar_lea.vmem %s50_s19, 8192  ;;  %p5619_p12 = scmp.lt.s32.totalorder %s50_s19, %s50_s19 }
  0x1e   :  { %p5615_p11 = scmp.ne.s32.totalorder %s50_s19, %s5614_s28  ;;  %p5620_p13 = scmp.lt.s32.totalorder %s5614_s28, %s5614_s28 }
  0x20   :  { %p5621_p0 = por %p5620_p13, %p5619_p12 }
  0x22   :  { %p5622_p1 = pnand %p5621_p0, %p5615_p11 }
  0x24   :  { %5625 = shalt.err (!%p5622_p1)
}
  0x25   :  { %s5658_s2 = smov 512   ;;  %s5659_s24 = smov 32  }
  0x26   :  { %55 = dma.hbm_to_vmem [thread:$0]  %s6878_s6, 8192, %s50_s19, [#allocation7], %s5658_s2, %s5658_s2, %s5659_s24  }
  0x27   :  { %5648 = dma.done.wait [#allocation4], 6144  }
  0x28   :  { %5649 = vsyncadd [#allocation4], 4294961152 }
  0x29   :  { %5650 = dma.done.wait [#allocation7], 8192  }
  0x2a   :  { %5651 = vsyncadd [#allocation7], 4294959104  ;;  %v6885_v1 = vmov 0.0   ;;  %v263_v2 = vld [vmem:[#allocation3 + $0x8] sm:$0xff]  ;;  %v266_v3 = vld [vmem:[#allocation3 + $0x20] sm:$0xff]  ;;  %vm103_vm0 = vcmask 1042432  }
  0x2b   :  { %174 = vmatprep.mubr.f32.mxu1 %v6885_v1  ;;  %375 = vmatprep.mubr.f32.mxu0 %v6885_v1  ;;  %v262_v4 = vld [vmem:[#allocation3] sm:$0xff]  ;;  %v5768_v5 = vpack.c.bf16 %v266_v3, %v263_v2  ;;  %v265_v6 = vld [vmem:[#allocation3 + $0x18] sm:$0xff]  ;;  %v272_v8 = vld [vmem:[#allocation3 + $0x50] sm:$0xff]  ;;  %vm96_vm1 = vcmask 23552   ;;  %v5661_v33 = vmov 0.0|0.0   ;;  %vm5662_vm2 = vmmov 0  }
  0x2c   :  { %v269_v7 = vld [vmem:[#allocation3 + $0x38] sm:$0xff]  ;;  %v5770_v9 = vpack.c.bf16 %v265_v6, %v262_v4  ;;  %v268_v11 = vld [vmem:[#allocation3 + $0x30] sm:$0xff]  ;;  %v271_v12 = vld [vmem:[#allocation3 + $0x48] sm:$0xff]  ;;  %vm2141_vm3 = vcmask 1041408   ;;  %vm2152_vm4 = vcmask 1024   ;;  %s5666_s11 = smov 3  }
  0x2d   :  { %v5772_v10 = vpack.c.bf16 %v272_v8, %v269_v7  ;;  %v275_v13 = vld [vmem:[#allocation3 + $0x68] sm:$0xff]  ;;  %4255 = vmatprep.subr.bf16.mxu0 %v5768_v5  ;;  %v278_v14 = vld [vmem:[#allocation3 + $0x80] sm:$0xff]  ;;  %v5776_v15 = vpack.c.bf16 %v271_v12, %v268_v11  ;;  %v277_v18 = vld [vmem:[#allocation3 + $0x78] sm:$0xff]  ;;  %s5667_s14 = smov 4   ;;  %s5668_s15 = smov 6   ;;  %vm2340_vm5 = vcmask 9224  }
  0x2e   :  { %4257 = vmatpush1.bf16.msra.mxu0 %v5770_v9  ;;  %v5779_v16 = vpack.c.bf16 %v278_v14, %v275_v13  ;;  %v274_v17 = vld [vmem:[#allocation3 + $0x60] sm:$0xff]  ;;  %v281_v20 = vld [vmem:[#allocation3 + $0x98] sm:$0xff]  ;;  %v284_v21 = vld [vmem:[#allocation3 + $0xb0] sm:$0xff]  ;;  %s5669_s16 = smov 7   ;;  %vm2527_vm6 = vcmask 17424   ;;  %vm2714_vm7 = vcmask 25624  }
  0x2f   :  { %4259 = vmatprep.subr.bf16.mxu0 %v5772_v10  ;;  %v74_v19 = vld [vmem:[%s6873_s1] sm:$0x77]  ;;  %v75_v24 = vld [vmem:[%s6873_s1 + $0x8] sm:$0x7]  ;;  %v5791_v25 = vpack.c.bf16 %v277_v18, %v274_v17  ;;  %v5795_v26 = vpack.c.bf16 %v284_v21, %v281_v20  ;;  %v280_v27 = vld [vmem:[#allocation3 + $0x90] sm:$0xff]  ;;  %s5670_s1 = smov 8  }
  0x30   :  { %v95_v22 = vcombine.high %v74_v19, %v74_v19  ;;  %v72_v23 = vld [vmem:[%s6872_s0] sm:$0xff]  ;;  %v283_v28 = vld [vmem:[#allocation3 + $0xa8] sm:$0xff]  ;;  %v264_v34 = vld [vmem:[#allocation3 + $0x10] sm:$0xff]  ;;  %vm2901_vm8 = vcmask 33824   ;;  %s5671_s17 = smov 5   ;;  %vm3088_vm9 = vcmask 42024  }
  0x31   :  { %v287_v29 = vld [vmem:[#allocation3 + $0xc8] sm:$0xff]  ;;  %v290_v30 = vld [vmem:[#allocation3 + $0xe0] sm:$0xff]  ;;  %v5806_v32 = vpack.c.bf16 %v283_v28, %v280_v27  ;;  %v289_v38 = vld [vmem:[#allocation3 + $0xd8] sm:$0xff]  ;;  %vm3275_vm10 = vcmask 50224   ;;  %vm3462_vm11 = vcmask 58424   ;;  %vm3649_vm12 = vcmask 66624  }
  0x32   :  { %4261 = vmatpush1.bf16.msra.mxu0 %v5776_v15  ;;  %3782 = vmatprep.subr.msk.mxu1 %vm103_vm0, %v95_v22  ;;  %v73_v31 = vld [vmem:[%s6872_s0 + $0x8] sm:$0xff]  ;;  %v5810_v36 = vpack.c.bf16 %v290_v30, %v287_v29  ;;  %v293_v39 = vld [vmem:[#allocation3 + $0xf8] sm:$0xff]  ;;  %v296_v40 = vld [vmem:[#allocation3 + $0x110] sm:$0xff]  ;;  %v78_v22 = vlaneseq  ;;  %s5672_s0 = smov 9   ;;  %s5673_s18 = smov [#allocation8]   ;;  %vm3764_vm13 = vcmask 74824  }
  0x33   :  { %4263 = vmatprep.subr.bf16.mxu0 %v5779_v16  ;;  %3783 = vmatpush1.msk.msra.mxu1 %vm103_vm0, %v74_v19  ;;  %v267_v35 = vld [vmem:[#allocation3 + $0x28] sm:$0xff]  ;;  %v286_v37 = vld [vmem:[#allocation3 + $0xc0] sm:$0xff]  ;;  %v273_v44 = vld [vmem:[#allocation3 + $0x58] sm:$0xff]  ;;  %v5820_v45 = vpack.c.bf16 %v296_v40, %v293_v39 }
  0x34   :  { %3784 = vmatmul.mubr.msk.f32.vlgmr.msra.gmra.mrb[0].mxu1 %vm96_vm1, %v72_v23  ;;  %3969 = vmatprep.subr.msk.mxu1 %vm103_vm0, %v75_v24  ;;  %v5814_v41 = vpack.c.bf16 %v267_v35, %v264_v34  ;;  %v5817_v42 = vpack.c.bf16 %v289_v38, %v286_v37  ;;  %v270_v43 = vld [vmem:[#allocation3 + $0x40] sm:$0xff]  ;;  %v292_v46 = vld [vmem:[#allocation3 + $0xf0] sm:$0xff]  ;;  %v295_v47 = vld [vmem:[#allocation3 + $0x108] sm:$0xff] }
  0x35   :  { %3970 = vmatpush3.msk.msra.mxu1 %vm103_vm0, %v75_v24  ;;  %180 = vmatprep.mubr.f32.mxu1 %v6885_v1  ;;  %v299_v48 = vld [vmem:[#allocation3 + $0x128] sm:$0xff]  ;;  %v302_v49 = vld [vmem:[#allocation3 + $0x140] sm:$0xff]  ;;  %v5824_v50 = vpack.c.bf16 %v273_v44, %v270_v43  ;;  %v5829_v51 = vpack.c.bf16 %v295_v47, %v292_v46  ;;  %v276_v52 = vld [vmem:[#allocation3 + $0x70] sm:$0xff] }
  0x36   :  { %4265 = vmatpush1.bf16.msra.mxu0 %v5791_v25  ;;  %4286 = vmatprep.subr.bf16.mxu1 %v5661_v33  ;;  %v279_v53 = vld [vmem:[#allocation3 + $0x88] sm:$0xff]  ;;  %v5833_v54 = vpack.c.bf16 %v302_v49, %v299_v48  ;;  %v298_v55 = vld [vmem:[#allocation3 + $0x120] sm:$0xff]  ;;  %v301_v56 = vld [vmem:[#allocation3 + $0x138] sm:$0xff] }
  0x37   :  { %4267 = vmatprep.subr.bf16.mxu0 %v5795_v26  ;;  %v305_v57 = vld [vmem:[#allocation3 + $0x158] sm:$0xff]  ;;  %v308_v58 = vld [vmem:[#allocation3 + $0x170] sm:$0xff]  ;;  %v5836_v59 = vpack.c.bf16 %v279_v53, %v276_v52  ;;  %v5839_v60 = vpack.c.bf16 %v301_v56, %v298_v55  ;;  %v282_v61 = vld [vmem:[#allocation3 + $0xa0] sm:$0xff] }
  0x38   :  { %3785 = vmatmul.mubr.msk.f32.gmra.mrb[2].mxu1 %vm96_vm1, %v73_v31  ;;  %v285_v62 = vld [vmem:[#allocation3 + $0xb8] sm:$0xff]  ;;  %v5843_v63 = vpack.c.bf16 %v308_v58, %v305_v57  ;;  %v304_v0 = vld [vmem:[#allocation3 + $0x150] sm:$0xff]  ;;  %v307_v2 = vld [vmem:[#allocation3 + $0x168] sm:$0xff] }
  0x39   :  { %3971 = vmatprep.mubr.msk.f32.mxu1 %vm96_vm1, %v72_v23  ;;  %v5846_v3 = vpack.c.bf16 %v285_v62, %v282_v61  ;;  %v5849_v4 = vpack.c.bf16 %v307_v2, %v304_v0  ;;  %v288_v6 = vld [vmem:[#allocation3 + $0xd0] sm:$0xff]  ;;  %v291_v7 = vld [vmem:[#allocation3 + $0xe8] sm:$0xff]  ;;  %v294_v11 = vld [vmem:[#allocation3 + $0x100] sm:$0xff]  ;;  %v79_v23 = vshrl.u32 %v78_v22, 7 }
  0x3a   :  { %4269 = vmatpush1.bf16.msra.mxu0 %v5806_v32  ;;  %v5854_v8 = vpack.c.bf16 %v291_v7, %v288_v6  ;;  %v297_v12 = vld [vmem:[#allocation3 + $0x118] sm:$0xff]  ;;  %v300_v14 = vld [vmem:[#allocation3 + $0x130] sm:$0xff]  ;;  %v303_v17 = vld [vmem:[#allocation3 + $0x148] sm:$0xff] }
  0x3b   :  { %4271 = vmatprep.subr.bf16.mxu0 %v5810_v36  ;;  %v5861_v13 = vpack.c.bf16 %v297_v12, %v294_v11  ;;  %v5868_v18 = vpack.c.bf16 %v303_v17, %v300_v14  ;;  %v306_v19 = vld [vmem:[#allocation3 + $0x160] sm:$0xff]  ;;  %v309_v20 = vld [vmem:[#allocation3 + $0x178] sm:$0xff]  ;;  %v5910_v24 = vsub.s32 0, %v79_v23  ;;  %v5915_v29 = vsub.s32 1, %v79_v23 }
  0x3c   :  { %3972 = vmatmul.mubr.msk.f32.vlgmr.msra.gmra.mrb[4].mxu1 %vm96_vm1, %v73_v31  ;;  %v5874_v21 = vpack.c.bf16 %v309_v20, %v306_v19  ;;  %v76_v27 = vld [vmem:[%s6875_s3] sm:$0x7]  ;;  %v5917_v31 = vsub.s32 2, %v79_v23  ;;  %s3772_s3 = sshll.u32 %s5673_s18, 4  ;;  %s3773_s3 = int_to_ptr.vmem [resolvable:$true] %s3772_s3 }
  0x3d   :  { %4288 = vmatpush3.bf16.msra.mxu1 %v5814_v41  ;;  %4006 = vmatprep.mubr.msk.f32.mxu1 %vm5662_vm2, %v6885_v1  ;;  %v81_v34 = vrot.slane %v76_v27, %v5910_v24  ;;  %v85_v35 = vrot.slane %v76_v27, %v5915_v29  ;;  %v5937_v7 = vld [vmem:[%s6876_s4] ss:$0 sm:$0xff]  ;;  %s5626_s19 = scalar_lea.vmem %s3773_s3, 32  ;;  %p5631_p3 = scmp.lt.s32.totalorder %s3773_s3, %s3773_s3 }
  0x3e   :  { %4273 = vmatpush1.bf16.msra.mxu0 %v5817_v42  ;;  %4289 = vmatprep.subr.bf16.mxu1 %v5661_v33  ;;  %v89_v40 = vrot.slane %v76_v27, %v5917_v31  ;;  %p5627_p2 = scmp.ne.s32.totalorder %s3773_s3, %s5626_s19  ;;  %p5632_p4 = scmp.lt.s32.totalorder %s5626_s19, %s5626_s19 }
  0x3f   :  { %4275 = vmatprep.subr.bf16.mxu0 %v5820_v45 }
  0x40   :  { %p5633_p5 = por %p5632_p4, %p5631_p3 }
  0x41   :  { %4291 = vmatpush3.bf16.msra.mxu1 %v5824_v50 }
  0x42   :  { %4277 = vmatpush1.bf16.msra.mxu0 %v5829_v51  ;;  %4292 = vmatprep.subr.bf16.mxu1 %v5661_v33  ;;  %p5634_p6 = pnand %p5633_p5, %p5627_p2 }
  0x43   :  { %4279 = vmatprep.subr.bf16.mxu0 %v5833_v54 }
  0x45   :  { %4294 = vmatpush3.bf16.msra.mxu1 %v5836_v59 }
  0x46   :  { %4281 = vmatpush1.bf16.msra.mxu0 %v5839_v60  ;;  %4295 = vmatprep.subr.bf16.mxu1 %v5661_v33 }
  0x47   :  { %4283 = vmatprep.subr.bf16.mxu0 %v5843_v63 }
  0x49   :  { %4297 = vmatpush3.bf16.msra.mxu1 %v5846_v3 }
  0x4a   :  { %4285 = vmatpush1.bf16.msra.mxu0 %v5849_v4  ;;  %4298 = vmatprep.subr.bf16.mxu1 %v5661_v33 }
  0x4b   :  { %4311 = vmatprep.subr.bf16.mxu0 %v5768_v5 }
  0x4d   :  { %376 = vmatmul.mubr.f32.vlgmr.msra.gmra.mrb[0].mxu0 %v6885_v1  ;;  %4300 = vmatpush3.bf16.msra.mxu1 %v5854_v8 }
  0x4e   :  { %4301 = vmatprep.subr.bf16.mxu1 %v5661_v33  ;;  %4313 = vmatpush1.bf16.msra.mxu0 %v5770_v9 }
  0x4f   :  { %4315 = vmatprep.subr.bf16.mxu0 %v5772_v10  ;;  %544 = vmatprep.mubr.f32.mxu0 %v6885_v1 }
  0x51   :  { %4303 = vmatpush3.bf16.msra.mxu1 %v5861_v13 }
  0x52   :  { %4304 = vmatprep.subr.bf16.mxu1 %v5661_v33  ;;  %4317 = vmatpush1.bf16.msra.mxu0 %v5776_v15 }
  0x53   :  { %4319 = vmatprep.subr.bf16.mxu0 %v5779_v16 }
  0x55   :  { %4306 = vmatpush3.bf16.msra.mxu1 %v5868_v18 }
  0x56   :  { %4307 = vmatprep.subr.bf16.mxu1 %v5661_v33  ;;  %4321 = vmatpush1.bf16.msra.mxu0 %v5791_v25 }
  0x57   :  { %4323 = vmatprep.subr.bf16.mxu0 %v5795_v26 }
  0x59   :  { %4309 = vmatpush3.bf16.msra.mxu1 %v5874_v21 }
  0x5a   :  { %4342 = vmatprep.subr.bf16.mxu1 %v5661_v33  ;;  %4325 = vmatpush1.bf16.msra.mxu0 %v5806_v32 }
  0x5b   :  { %4327 = vmatprep.subr.bf16.mxu0 %v5810_v36 }
  0x5c   :  { %4007 = vmatmul.mubr.f32.vlgmr.msra.gmra.mrb[6].mxu1 %v6885_v1 }
  0x5d   :  { %4344 = vmatpush3.bf16.msra.mxu1 %v5814_v41  ;;  %4041 = vmatprep.mubr.msk.f32.mxu1 %vm5662_vm2, %v6885_v1 }
  0x5e   :  { %4345 = vmatprep.subr.bf16.mxu1 %v5661_v33  ;;  %4329 = vmatpush1.bf16.msra.mxu0 %v5817_v42 }
  0x5f   :  { %4331 = vmatprep.subr.bf16.mxu0 %v5820_v45 }
  0x61   :  { %4347 = vmatpush3.bf16.msra.mxu1 %v5824_v50 }
  0x62   :  { %4348 = vmatprep.subr.bf16.mxu1 %v5661_v33  ;;  %4333 = vmatpush1.bf16.msra.mxu0 %v5829_v51 }
  0x63   :  { %4335 = vmatprep.subr.bf16.mxu0 %v5833_v54 }
  0x65   :  { %4350 = vmatpush3.bf16.msra.mxu1 %v5836_v59 }
  0x66   :  { %4351 = vmatprep.subr.bf16.mxu1 %v5661_v33  ;;  %4337 = vmatpush1.bf16.msra.mxu0 %v5839_v60 }
  0x67   :  { %4339 = vmatprep.subr.bf16.mxu0 %v5843_v63 }
  0x69   :  { %4353 = vmatpush3.bf16.msra.mxu1 %v5846_v3 }
  0x6a   :  { %4354 = vmatprep.subr.bf16.mxu1 %v5661_v33  ;;  %4341 = vmatpush1.bf16.msra.mxu0 %v5849_v4 }
  0x6b   :  { %4367 = vmatprep.subr.bf16.mxu0 %v5768_v5 }
  0x6d   :  { %4356 = vmatpush3.bf16.msra.mxu1 %v5854_v8 }
  0x6e   :  { %4357 = vmatprep.subr.bf16.mxu1 %v5661_v33 }
  0x71   :  { %4359 = vmatpush3.bf16.msra.mxu1 %v5861_v13 }
  0x72   :  { %4360 = vmatprep.subr.bf16.mxu1 %v5661_v33 }
  0x75   :  { %4362 = vmatpush3.bf16.msra.mxu1 %v5868_v18 }
  0x76   :  { %4363 = vmatprep.subr.bf16.mxu1 %v5661_v33 }
  0x79   :  { %4365 = vmatpush3.bf16.msra.mxu1 %v5874_v21 }
  0x7a   :  { %4398 = vmatprep.subr.bf16.mxu1 %v5661_v33 }
 0x107   :  { %v176_v28 = vpop.f32.mrb[0].mxu1 }
 0x108   :  { %v178_v30 = vpop.f32.mrb[1].mxu1  ;;  %v5928_v48 = vadd.f32 %v176_v28, %v81_v34 }
 0x109   :  { %v5931_v55 = vadd.f32 %v178_v30, %v85_v35 }
 0x10b   :  { %v182_v37 = vpop.f32.mrb[2].mxu1 }
 0x10c   :  { %v5921_v38 = vadd.f32 %v182_v37, %v81_v34  ;;  %v184_v39 = vpop.f32.mrb[3].mxu1 }
 0x10d   :  { %v5924_v43 = vadd.f32 %v184_v39, %v85_v35 }
 0x10f   :  { %v3973_v44 = vpop.f32.mrb[4].mxu1 }
 0x110   :  { %v5926_v46 = vadd.f32 %v3973_v44, %v89_v40  ;;  %v253_v47 = vpop.f32.mrb[5].mxu1 }
 0x111   :  { %v5940_v17 = vadd.f32 %v253_v47, %v89_v40 }
 0x120   :  { %v377_v49 = vpop.f32.mrb[0].mxu0 }
 0x121   :  { %v452_v52 = vadd.f32 %v377_v49, %v5928_v48  ;;  %v379_v53 = vpop.f32.mrb[1].mxu0 }
 0x122   :  { %v453_v57 = vadd.f32 %v379_v53, %v5931_v55 }
 0x123   :  { %v3789_v56 = vmul.f32 -1.442695, %v452_v52 }
 0x124   :  { %v3790_v58 = vmul.f32 -1.442695, %v453_v57 }
 0x125   :  { %5397 = vpow2.f32 %v3789_v56 }
 0x126   :  { %5399 = vpow2.f32 %v3790_v58 }
 0x12f   :  { %v5398_v61 = vpop.eup %5397  ;;  %v448_v62 = vpop.f32.mrb[6].mxu1 }
 0x130   :  { %v460_v0 = vadd.f32 1.0, %v5398_v61  ;;  %v4008_v2 = vpop.f32.mrb[7].mxu1  ;;  %v5400_v6 = vpop.eup %5399  ;;  %v472_v12 = vadd.f32 %v5937_v7, %v448_v62 }
 0x131   :  { %v461_v11 = vadd.f32 1.0, %v5400_v6 }
 0x132   :  { %5401 = vrcp.f32 %v460_v0 }
 0x133   :  { %5403 = vrcp.f32 %v461_v11 }
 0x13c   :  { %v5402_v14 = vpop.eup %5401 }
 0x13d   :  { %v473_v19 = vmul.f32 %v5402_v14, %v472_v12  ;;  %v5404_v22 = vpop.eup %5403 }
 0x13e   :  { %v476_v23 = vsub.f32 1.0, %v5404_v22  ;;  %v478_v30 = vmul.f32 0.0, %v5404_v22 }
 0x13f   :  { %v474_v20 = vadd.f32 %v473_v19, %v5940_v17 }
 0x141   :  { %5405 = vtanh.f32 %v474_v20 }
 0x14b   :  { %v5406_v27 = vpop.eup %5405 }
 0x14c   :  { %v477_v28 = vmul.f32 %v5406_v27, %v476_v23 }
 0x14e   :  { %v479_v34 = vadd.f32 %v478_v30, %v477_v28 }
 0x150   :  { %545 = vmatmul.mubr.f32.vlgmr.msra.gmra.mrb[2].mxu0 %v479_v34  ;;  %4042 = vmatmul.mubr.f32.vlgmr.msra.gmra.mrb[8].mxu1 %v479_v34  ;;  %v651_v11 = vrot.slane %v479_v34, 6 }
 0x151   :  { %4369 = vmatpush1.bf16.msra.mxu0 %v5770_v9  ;;  %4400 = vmatpush3.bf16.msra.mxu1 %v5814_v41 }
 0x152   :  { %4371 = vmatprep.subr.bf16.mxu0 %v5772_v10  ;;  %4401 = vmatprep.subr.bf16.mxu1 %v5661_v33 }
 0x153   :  { %722 = vmatprep.mubr.f32.mxu0 %v6885_v1  ;;  %4076 = vmatprep.mubr.msk.f32.mxu1 %vm5662_vm2, %v6885_v1 }
 0x155   :  { %4373 = vmatpush1.bf16.msra.mxu0 %v5776_v15  ;;  %4403 = vmatpush3.bf16.msra.mxu1 %v5824_v50 }
 0x156   :  { %4375 = vmatprep.subr.bf16.mxu0 %v5779_v16  ;;  %4404 = vmatprep.subr.bf16.mxu1 %v5661_v33 }
 0x159   :  { %4377 = vmatpush1.bf16.msra.mxu0 %v5791_v25  ;;  %4406 = vmatpush3.bf16.msra.mxu1 %v5836_v59 }
 0x15a   :  { %4379 = vmatprep.subr.bf16.mxu0 %v5795_v26  ;;  %4407 = vmatprep.subr.bf16.mxu1 %v5661_v33 }
 0x15d   :  { %4381 = vmatpush1.bf16.msra.mxu0 %v5806_v32  ;;  %4409 = vmatpush3.bf16.msra.mxu1 %v5846_v3 }
 0x15e   :  { %4383 = vmatprep.subr.bf16.mxu0 %v5810_v36  ;;  %4410 = vmatprep.subr.bf16.mxu1 %v5661_v33 }
 0x161   :  { %4385 = vmatpush1.bf16.msra.mxu0 %v5817_v42  ;;  %4412 = vmatpush3.bf16.msra.mxu1 %v5854_v8 }
 0x162   :  { %4387 = vmatprep.subr.bf16.mxu0 %v5820_v45  ;;  %4413 = vmatprep.subr.bf16.mxu1 %v5661_v33 }
 0x165   :  { %4389 = vmatpush1.bf16.msra.mxu0 %v5829_v51  ;;  %4415 = vmatpush3.bf16.msra.mxu1 %v5861_v13 }
 0x166   :  { %4391 = vmatprep.subr.bf16.mxu0 %v5833_v54  ;;  %4416 = vmatprep.subr.bf16.mxu1 %v5661_v33 }
 0x169   :  { %4393 = vmatpush1.bf16.msra.mxu0 %v5839_v60  ;;  %4418 = vmatpush3.bf16.msra.mxu1 %v5868_v18 }
 0x16a   :  { %4395 = vmatprep.subr.bf16.mxu0 %v5843_v63  ;;  %4419 = vmatprep.subr.bf16.mxu1 %v5661_v33 }
 0x16d   :  { %4397 = vmatpush1.bf16.msra.mxu0 %v5849_v4  ;;  %4421 = vmatpush3.bf16.msra.mxu1 %v5874_v21 }
 0x16e   :  { %4423 = vmatprep.subr.bf16.mxu0 %v5768_v5  ;;  %4454 = vmatprep.subr.bf16.mxu1 %v5661_v33 }
 0x223   :  { %v546_v35 = vpop.f32.mrb[2].mxu0  ;;  %v617_v37 = vpop.f32.mrb[8].mxu1 }
 0x224   :  { %v623_v39 = vrot.slane %v546_v35, 6  ;;  %v548_v40 = vpop.f32.mrb[3].mxu0  ;;  %v4043_v44 = vpop.f32.mrb[9].mxu1  ;;  %v641_v0 = vadd.f32 %v5937_v7, %v617_v37 }
 0x225   :  { %v624_v47 = vrot.slane %v548_v40, 6 }
 0x226   :  { %v627_v49 = vadd.f32 %v623_v39, %v5928_v48  ;;  %v643_v2 = vrot.slane %v641_v0, 6 }
 0x227   :  { %v628_v52 = vadd.f32 %v624_v47, %v5931_v55 }
 0x228   :  { %v3792_v53 = vmul.f32 -1.442695, %v627_v49 }
 0x229   :  { %v3793_v56 = vmul.f32 -1.442695, %v628_v52 }
 0x22a   :  { %5407 = vpow2.f32 %v3792_v53 }
 0x22b   :  { %5409 = vpow2.f32 %v3793_v56 }
 0x234   :  { %v5408_v57 = vpop.eup %5407 }
 0x235   :  { %v5410_v58 = vpop.eup %5409  ;;  %v635_v61 = vadd.f32 1.0, %v5408_v57 }
 0x236   :  { %v636_v62 = vadd.f32 1.0, %v5410_v58 }
 0x237   :  { %5411 = vrcp.f32 %v635_v61 }
 0x238   :  { %5413 = vrcp.f32 %v636_v62 }
 0x241   :  { %v5412_v6 = vpop.eup %5411 }
 0x242   :  { %v5414_v12 = vpop.eup %5413  ;;  %v645_v14 = vmul.f32 %v5412_v6, %v643_v2 }
 0x243   :  { %v653_v19 = vmul.f32 %v5414_v12, %v651_v11  ;;  %v648_v22 = vsub.f32 1.0, %v5414_v12 }
 0x244   :  { %v646_v20 = vadd.f32 %v645_v14, %v5940_v17 }
 0x246   :  { %5415 = vtanh.f32 %v646_v20 }
 0x250   :  { %v5416_v23 = vpop.eup %5415 }
 0x251   :  { %v649_v27 = vmul.f32 %v5416_v23, %v648_v22 }
 0x253   :  { %v5982_v28 = vadd.f32 %v653_v19, %v649_v27 }
 0x255   :  { %v656_v30 = vrot.slane %v5982_v28, 2  ;;  %v828_v6 = vrot.slane %v5982_v28, 6 }
 0x257   :  { %723 = vmatmul.mubr.f32.vlgmr.msra.gmra.mrb[4].mxu0 %v656_v30  ;;  %4077 = vmatmul.mubr.f32.vlgmr.msra.gmra.mrb[10].mxu1 %v656_v30 }
 0x258   :  { %4425 = vmatpush1.bf16.msra.mxu0 %v5770_v9  ;;  %4456 = vmatpush3.bf16.msra.mxu1 %v5814_v41 }
 0x259   :  { %4427 = vmatprep.subr.bf16.mxu0 %v5772_v10  ;;  %4457 = vmatprep.subr.bf16.mxu1 %v5661_v33 }
 0x25a   :  { %899 = vmatprep.mubr.f32.mxu0 %v6885_v1  ;;  %4111 = vmatprep.mubr.msk.f32.mxu1 %vm5662_vm2, %v6885_v1 }
 0x25c   :  { %4429 = vmatpush1.bf16.msra.mxu0 %v5776_v15  ;;  %4459 = vmatpush3.bf16.msra.mxu1 %v5824_v50 }
 0x25d   :  { %4431 = vmatprep.subr.bf16.mxu0 %v5779_v16  ;;  %4460 = vmatprep.subr.bf16.mxu1 %v5661_v33 }
 0x260   :  { %4433 = vmatpush1.bf16.msra.mxu0 %v5791_v25  ;;  %4462 = vmatpush3.bf16.msra.mxu1 %v5836_v59 }
 0x261   :  { %4435 = vmatprep.subr.bf16.mxu0 %v5795_v26  ;;  %4463 = vmatprep.subr.bf16.mxu1 %v5661_v33 }
 0x264   :  { %4437 = vmatpush1.bf16.msra.mxu0 %v5806_v32  ;;  %4465 = vmatpush3.bf16.msra.mxu1 %v5846_v3 }
 0x265   :  { %4439 = vmatprep.subr.bf16.mxu0 %v5810_v36  ;;  %4466 = vmatprep.subr.bf16.mxu1 %v5661_v33 }
 0x268   :  { %4441 = vmatpush1.bf16.msra.mxu0 %v5817_v42  ;;  %4468 = vmatpush3.bf16.msra.mxu1 %v5854_v8 }
 0x269   :  { %4443 = vmatprep.subr.bf16.mxu0 %v5820_v45  ;;  %4469 = vmatprep.subr.bf16.mxu1 %v5661_v33 }
 0x26c   :  { %4445 = vmatpush1.bf16.msra.mxu0 %v5829_v51  ;;  %4471 = vmatpush3.bf16.msra.mxu1 %v5861_v13 }
 0x26d   :  { %4447 = vmatprep.subr.bf16.mxu0 %v5833_v54  ;;  %4472 = vmatprep.subr.bf16.mxu1 %v5661_v33 }
 0x270   :  { %4449 = vmatpush1.bf16.msra.mxu0 %v5839_v60  ;;  %4474 = vmatpush3.bf16.msra.mxu1 %v5868_v18 }
 0x271   :  { %4451 = vmatprep.subr.bf16.mxu0 %v5843_v63  ;;  %4475 = vmatprep.subr.bf16.mxu1 %v5661_v33 }
 0x274   :  { %4453 = vmatpush1.bf16.msra.mxu0 %v5849_v4  ;;  %4477 = vmatpush3.bf16.msra.mxu1 %v5874_v21 }
 0x275   :  { %4479 = vmatprep.subr.bf16.mxu0 %v5768_v5  ;;  %4510 = vmatprep.subr.bf16.mxu1 %v5661_v33 }
 0x32a   :  { %v724_v34 = vpop.f32.mrb[4].mxu0  ;;  %v795_v35 = vpop.f32.mrb[10].mxu1 }
 0x32b   :  { %v801_v37 = vrot.slane %v724_v34, 4  ;;  %v726_v39 = vpop.f32.mrb[5].mxu0  ;;  %v4078_v40 = vpop.f32.mrb[11].mxu1  ;;  %v819_v62 = vadd.f32 %v5937_v7, %v795_v35 }
 0x32c   :  { %v802_v44 = vrot.slane %v726_v39, 4 }
 0x32d   :  { %v805_v47 = vadd.f32 %v801_v37, %v5928_v48  ;;  %v821_v0 = vrot.slane %v819_v62, 4 }
 0x32e   :  { %v806_v49 = vadd.f32 %v802_v44, %v5931_v55 }
 0x32f   :  { %v3794_v52 = vmul.f32 -1.442695, %v805_v47 }
 0x330   :  { %v3795_v53 = vmul.f32 -1.442695, %v806_v49 }
 0x331   :  { %5417 = vpow2.f32 %v3794_v52 }
 0x332   :  { %5419 = vpow2.f32 %v3795_v53 }
 0x33b   :  { %v5418_v56 = vpop.eup %5417 }
 0x33c   :  { %v5420_v57 = vpop.eup %5419  ;;  %v813_v58 = vadd.f32 1.0, %v5418_v56 }
 0x33d   :  { %v814_v61 = vadd.f32 1.0, %v5420_v57 }
 0x33e   :  { %5421 = vrcp.f32 %v813_v58 }
 0x33f   :  { %5423 = vrcp.f32 %v814_v61 }
 0x348   :  { %v5422_v2 = vpop.eup %5421 }
 0x349   :  { %v5424_v11 = vpop.eup %5423  ;;  %v823_v12 = vmul.f32 %v5422_v2, %v821_v0 }
 0x34a   :  { %v830_v14 = vmul.f32 %v5424_v11, %v828_v6  ;;  %v826_v20 = vsub.f32 1.0, %v5424_v11 }
 0x34b   :  { %v824_v19 = vadd.f32 %v823_v12, %v5940_v17 }
 0x34d   :  { %5425 = vtanh.f32 %v824_v19 }
 0x357   :  { %v5426_v22 = vpop.eup %5425 }
 0x358   :  { %v827_v23 = vmul.f32 %v5426_v22, %v826_v20 }
 0x35a   :  { %v6025_v27 = vadd.f32 %v830_v14, %v827_v23 }
 0x35c   :  { %v833_v30 = vrot.slane %v6025_v27, 4  ;;  %v1005_v2 = vrot.slane %v6025_v27, 6 }
 0x35e   :  { %900 = vmatmul.mubr.f32.vlgmr.msra.gmra.mrb[6].mxu0 %v833_v30  ;;  %4112 = vmatmul.mubr.f32.vlgmr.msra.gmra.mrb[12].mxu1 %v833_v30 }
 0x35f   :  { %4481 = vmatpush1.bf16.msra.mxu0 %v5770_v9  ;;  %4512 = vmatpush3.bf16.msra.mxu1 %v5814_v41 }
 0x360   :  { %4483 = vmatprep.subr.bf16.mxu0 %v5772_v10  ;;  %4513 = vmatprep.subr.bf16.mxu1 %v5661_v33 }
 0x361   :  { %1076 = vmatprep.mubr.f32.mxu0 %v6885_v1  ;;  %4146 = vmatprep.mubr.msk.f32.mxu1 %vm5662_vm2, %v6885_v1 }
 0x363   :  { %4485 = vmatpush1.bf16.msra.mxu0 %v5776_v15  ;;  %4515 = vmatpush3.bf16.msra.mxu1 %v5824_v50 }
 0x364   :  { %4487 = vmatprep.subr.bf16.mxu0 %v5779_v16  ;;  %4516 = vmatprep.subr.bf16.mxu1 %v5661_v33 }
 0x367   :  { %4489 = vmatpush1.bf16.msra.mxu0 %v5791_v25  ;;  %4518 = vmatpush3.bf16.msra.mxu1 %v5836_v59 }
 0x368   :  { %4491 = vmatprep.subr.bf16.mxu0 %v5795_v26  ;;  %4519 = vmatprep.subr.bf16.mxu1 %v5661_v33 }
 0x36b   :  { %4493 = vmatpush1.bf16.msra.mxu0 %v5806_v32  ;;  %4521 = vmatpush3.bf16.msra.mxu1 %v5846_v3 }
 0x36c   :  { %4495 = vmatprep.subr.bf16.mxu0 %v5810_v36  ;;  %4522 = vmatprep.subr.bf16.mxu1 %v5661_v33 }
 0x36f   :  { %4497 = vmatpush1.bf16.msra.mxu0 %v5817_v42  ;;  %4524 = vmatpush3.bf16.msra.mxu1 %v5854_v8 }
 0x370   :  { %4499 = vmatprep.subr.bf16.mxu0 %v5820_v45  ;;  %4525 = vmatprep.subr.bf16.mxu1 %v5661_v33 }
 0x373   :  { %4501 = vmatpush1.bf16.msra.mxu0 %v5829_v51  ;;  %4527 = vmatpush3.bf16.msra.mxu1 %v5861_v13 }
 0x374   :  { %4503 = vmatprep.subr.bf16.mxu0 %v5833_v54  ;;  %4528 = vmatprep.subr.bf16.mxu1 %v5661_v33 }
 0x377   :  { %4505 = vmatpush1.bf16.msra.mxu0 %v5839_v60  ;;  %4530 = vmatpush3.bf16.msra.mxu1 %v5868_v18 }
 0x378   :  { %4507 = vmatprep.subr.bf16.mxu0 %v5843_v63  ;;  %4531 = vmatprep.subr.bf16.mxu1 %v5661_v33 }
 0x37b   :  { %4509 = vmatpush1.bf16.msra.mxu0 %v5849_v4  ;;  %4533 = vmatpush3.bf16.msra.mxu1 %v5874_v21 }
 0x37c   :  { %4535 = vmatprep.subr.bf16.mxu0 %v5768_v5  ;;  %4566 = vmatprep.subr.bf16.mxu1 %v5661_v33 }
 0x431   :  { %v901_v28 = vpop.f32.mrb[6].mxu0  ;;  %v972_v34 = vpop.f32.mrb[12].mxu1 }
 0x432   :  { %v978_v35 = vrot.slane %v901_v28, 2  ;;  %v903_v37 = vpop.f32.mrb[7].mxu0  ;;  %v4113_v39 = vpop.f32.mrb[13].mxu1  ;;  %v996_v61 = vadd.f32 %v5937_v7, %v972_v34 }
 0x433   :  { %v979_v40 = vrot.slane %v903_v37, 2 }
 0x434   :  { %v982_v44 = vadd.f32 %v978_v35, %v5928_v48  ;;  %v998_v62 = vrot.slane %v996_v61, 2 }
 0x435   :  { %v983_v47 = vadd.f32 %v979_v40, %v5931_v55 }
 0x436   :  { %v3796_v49 = vmul.f32 -1.442695, %v982_v44 }
 0x437   :  { %v3797_v52 = vmul.f32 -1.442695, %v983_v47 }
 0x438   :  { %5427 = vpow2.f32 %v3796_v49 }
 0x439   :  { %5429 = vpow2.f32 %v3797_v52 }
 0x442   :  { %v5428_v53 = vpop.eup %5427 }
 0x443   :  { %v5430_v56 = vpop.eup %5429  ;;  %v990_v57 = vadd.f32 1.0, %v5428_v53 }
 0x444   :  { %v991_v58 = vadd.f32 1.0, %v5430_v56 }
 0x445   :  { %5431 = vrcp.f32 %v990_v57 }
 0x446   :  { %5433 = vrcp.f32 %v991_v58 }
 0x44f   :  { %v5432_v0 = vpop.eup %5431 }
 0x450   :  { %v5434_v6 = vpop.eup %5433  ;;  %v1000_v48 = vmul.f32 %v5432_v0, %v998_v62 }
 0x451   :  { %v1007_v11 = vmul.f32 %v5434_v6, %v1005_v2  ;;  %v1003_v12 = vsub.f32 1.0, %v5434_v6 }
 0x452   :  { %v1001_v55 = vadd.f32 %v1000_v48, %v5940_v17 }
 0x454   :  { %5435 = vtanh.f32 %v1001_v55 }
 0x45e   :  { %v5436_v14 = vpop.eup %5435 }
 0x45f   :  { %v1004_v19 = vmul.f32 %v5436_v14, %v1003_v12 }
 0x461   :  { %v1008_v20 = vadd.f32 %v1007_v11, %v1004_v19 }
 0x463   :  { %v1010_v22 = vrot.slane %v1008_v20, 6 }
 0x465   :  { %1077 = vmatmul.mubr.f32.vlgmr.msra.gmra.mrb[8].mxu0 %v1010_v22  ;;  %4147 = vmatmul.mubr.f32.vlgmr.msra.gmra.mrb[14].mxu1 %v1010_v22 }
 0x466   :  { %4537 = vmatpush1.bf16.msra.mxu0 %v5770_v9  ;;  %4568 = vmatpush3.bf16.msra.mxu1 %v5814_v41 }
 0x467   :  { %4539 = vmatprep.subr.bf16.mxu0 %v5772_v10  ;;  %4569 = vmatprep.subr.bf16.mxu1 %v5661_v33 }
 0x468   :  { %1239 = vmatprep.mubr.f32.mxu0 %v6885_v1  ;;  %4181 = vmatprep.mubr.msk.f32.mxu1 %vm5662_vm2, %v6885_v1 }
 0x46a   :  { %4541 = vmatpush1.bf16.msra.mxu0 %v5776_v15  ;;  %4571 = vmatpush3.bf16.msra.mxu1 %v5824_v50 }
 0x46b   :  { %4543 = vmatprep.subr.bf16.mxu0 %v5779_v16  ;;  %4572 = vmatprep.subr.bf16.mxu1 %v5661_v33 }
 0x46e   :  { %4545 = vmatpush1.bf16.msra.mxu0 %v5791_v25  ;;  %4574 = vmatpush3.bf16.msra.mxu1 %v5836_v59 }
 0x46f   :  { %4547 = vmatprep.subr.bf16.mxu0 %v5795_v26  ;;  %4575 = vmatprep.subr.bf16.mxu1 %v5661_v33 }
 0x472   :  { %4549 = vmatpush1.bf16.msra.mxu0 %v5806_v32  ;;  %4577 = vmatpush3.bf16.msra.mxu1 %v5846_v3 }
 0x473   :  { %4551 = vmatprep.subr.bf16.mxu0 %v5810_v36  ;;  %4578 = vmatprep.subr.bf16.mxu1 %v5661_v33 }
 0x476   :  { %4553 = vmatpush1.bf16.msra.mxu0 %v5817_v42  ;;  %4580 = vmatpush3.bf16.msra.mxu1 %v5854_v8 }
 0x477   :  { %4555 = vmatprep.subr.bf16.mxu0 %v5820_v45  ;;  %4581 = vmatprep.subr.bf16.mxu1 %v5661_v33 }
 0x47a   :  { %4557 = vmatpush1.bf16.msra.mxu0 %v5829_v51  ;;  %4583 = vmatpush3.bf16.msra.mxu1 %v5861_v13 }
 0x47b   :  { %4559 = vmatprep.subr.bf16.mxu0 %v5833_v54  ;;  %4584 = vmatprep.subr.bf16.mxu1 %v5661_v33 }
 0x47e   :  { %4561 = vmatpush1.bf16.msra.mxu0 %v5839_v60  ;;  %4586 = vmatpush3.bf16.msra.mxu1 %v5868_v18 }
 0x47f   :  { %4563 = vmatprep.subr.bf16.mxu0 %v5843_v63  ;;  %4587 = vmatprep.subr.bf16.mxu1 %v5661_v33 }
 0x482   :  { %4565 = vmatpush1.bf16.msra.mxu0 %v5849_v4  ;;  %4589 = vmatpush3.bf16.msra.mxu1 %v5874_v21 }
 0x483   :  { %4591 = vmatprep.subr.bf16.mxu0 %v5768_v5  ;;  %4622 = vmatprep.subr.bf16.mxu1 %v5661_v33 }
 0x538   :  { %v1078_v17 = vpop.f32.mrb[8].mxu0  ;;  %v1149_v23 = vpop.f32.mrb[14].mxu1 }
 0x539   :  { %v1153_v27 = vadd.f32 %v1078_v17, %v5921_v38  ;;  %v1080_v30 = vpop.f32.mrb[9].mxu0  ;;  %v4148_v28 = vpop.f32.mrb[15].mxu1  ;;  %v1167_v49 = vadd.f32 %v5937_v7, %v1149_v23 }
 0x53a   :  { %v1154_v35 = vadd.f32 %v1080_v30, %v5924_v43 }
 0x53b   :  { %v3798_v34 = vmul.f32 -1.442695, %v1153_v27 }
 0x53c   :  { %v3799_v37 = vmul.f32 -1.442695, %v1154_v35 }
 0x53d   :  { %5437 = vpow2.f32 %v3798_v34 }
 0x53e   :  { %5439 = vpow2.f32 %v3799_v37 }
 0x547   :  { %v5438_v39 = vpop.eup %5437 }
 0x548   :  { %v1161_v40 = vadd.f32 1.0, %v5438_v39  ;;  %v5440_v44 = vpop.eup %5439 }
 0x549   :  { %v1162_v47 = vadd.f32 1.0, %v5440_v44 }
 0x54a   :  { %5441 = vrcp.f32 %v1161_v40 }
 0x54b   :  { %5443 = vrcp.f32 %v1162_v47 }
 0x554   :  { %v5442_v52 = vpop.eup %5441 }
 0x555   :  { %v1168_v53 = vmul.f32 %v5442_v52, %v1167_v49  ;;  %v5444_v57 = vpop.eup %5443 }
 0x556   :  { %v1171_v58 = vsub.f32 1.0, %v5444_v57  ;;  %v1173_v0 = vmul.f32 %v5444_v57, %v1010_v22 }
 0x557   :  { %v1169_v56 = vadd.f32 %v1168_v53, %v5926_v46 }
 0x559   :  { %5445 = vtanh.f32 %v1169_v56 }
 0x563   :  { %v5446_v61 = vpop.eup %5445 }
 0x564   :  { %v1172_v62 = vmul.f32 %v5446_v61, %v1171_v58 }
 0x566   :  { %v1174_v2 = vadd.f32 %v1173_v0, %v1172_v62  ;;  %v1710_v0 = vld [vmem:[#allocation6 + $0x28] sm:$0xff] }
 0x568   :  { %1240 = vmatmul.mubr.f32.vlgmr.msra.gmra.mrb[10].mxu0 %v1174_v2  ;;  %4182 = vmatmul.mubr.f32.vlgmr.msra.gmra.mrb[16].mxu1 %v1174_v2  ;;  %v1346_v37 = vrot.slane %v1174_v2, 6  ;;  %v1708_v2 = vld [vmem:[#allocation6 + $0x18] sm:$0xff] }
 0x569   :  { %4593 = vmatpush1.bf16.msra.mxu0 %v5770_v9  ;;  %4624 = vmatpush3.bf16.msra.mxu1 %v5814_v41 }
 0x56a   :  { %4595 = vmatprep.subr.bf16.mxu0 %v5772_v10  ;;  %4625 = vmatprep.subr.bf16.mxu1 %v5661_v33 }
 0x56b   :  { %1417 = vmatprep.mubr.f32.mxu0 %v6885_v1  ;;  %4216 = vmatprep.mubr.msk.f32.mxu1 %vm5662_vm2, %v6885_v1 }
 0x56d   :  { %4597 = vmatpush1.bf16.msra.mxu0 %v5776_v15  ;;  %4627 = vmatpush3.bf16.msra.mxu1 %v5824_v50 }
 0x56e   :  { %4599 = vmatprep.subr.bf16.mxu0 %v5779_v16  ;;  %4628 = vmatprep.subr.bf16.mxu1 %v5661_v33 }
 0x571   :  { %4601 = vmatpush1.bf16.msra.mxu0 %v5791_v25  ;;  %4630 = vmatpush3.bf16.msra.mxu1 %v5836_v59 }
 0x572   :  { %4603 = vmatprep.subr.bf16.mxu0 %v5795_v26  ;;  %4631 = vmatprep.subr.bf16.mxu1 %v5661_v33 }
 0x575   :  { %4605 = vmatpush1.bf16.msra.mxu0 %v5806_v32  ;;  %4633 = vmatpush3.bf16.msra.mxu1 %v5846_v3 }
 0x576   :  { %4607 = vmatprep.subr.bf16.mxu0 %v5810_v36  ;;  %4634 = vmatprep.subr.bf16.mxu1 %v5661_v33 }
 0x579   :  { %4609 = vmatpush1.bf16.msra.mxu0 %v5817_v42  ;;  %4636 = vmatpush3.bf16.msra.mxu1 %v5854_v8 }
 0x57a   :  { %4611 = vmatprep.subr.bf16.mxu0 %v5820_v45  ;;  %4637 = vmatprep.subr.bf16.mxu1 %v5661_v33 }
 0x57d   :  { %4613 = vmatpush1.bf16.msra.mxu0 %v5829_v51  ;;  %4639 = vmatpush3.bf16.msra.mxu1 %v5861_v13 }
 0x57e   :  { %4615 = vmatprep.subr.bf16.mxu0 %v5833_v54  ;;  %4640 = vmatprep.subr.bf16.mxu1 %v5661_v33 }
 0x581   :  { %4617 = vmatpush1.bf16.msra.mxu0 %v5839_v60  ;;  %4642 = vmatpush3.bf16.msra.mxu1 %v5868_v18 }
 0x582   :  { %4619 = vmatprep.subr.bf16.mxu0 %v5843_v63  ;;  %4643 = vmatprep.subr.bf16.mxu1 %v5661_v33 }
 0x585   :  { %4621 = vmatpush1.bf16.msra.mxu0 %v5849_v4  ;;  %4645 = vmatpush3.bf16.msra.mxu1 %v5874_v21 }
 0x586   :  { %4647 = vmatprep.subr.bf16.mxu0 %v5768_v5  ;;  %4678 = vmatprep.subr.bf16.mxu1 %v5661_v33 }
 0x63b   :  { %v1241_v6 = vpop.f32.mrb[10].mxu0  ;;  %v1312_v48 = vpop.f32.mrb[16].mxu1 }
 0x63c   :  { %v1318_v11 = vrot.slane %v1241_v6, 6  ;;  %v1243_v55 = vpop.f32.mrb[11].mxu0  ;;  %v4183_v12 = vpop.f32.mrb[17].mxu1  ;;  %v1336_v28 = vadd.f32 %v5937_v7, %v1312_v48  ;;  %v1712_v48 = vld [vmem:[#allocation6 + $0x38] sm:$0xff] }
 0x63d   :  { %v1319_v14 = vrot.slane %v1243_v55, 6  ;;  %v1709_v55 = vld [vmem:[#allocation6 + $0x20] sm:$0xff]  ;;  %v6190_v12 = vpack.c.bf16 %v1712_v48, %v1708_v2  ;;  %v1743_v2 = vld [vmem:[#allocation6 + $0x130] sm:$0xff]  ;;  %v1746_v48 = vld [vmem:[#allocation6 + $0x148] sm:$0xff] }
 0x63e   :  { %v1322_v19 = vadd.f32 %v1318_v11, %v5921_v38  ;;  %v1338_v34 = vrot.slane %v1336_v28, 6  ;;  %v1705_v11 = vld [vmem:[#allocation6] sm:$0xff] }
 0x63f   :  { %v1323_v20 = vadd.f32 %v1319_v14, %v5924_v43  ;;  %v6192_v14 = vpack.c.bf16 %v1709_v55, %v1705_v11  ;;  %v1713_v28 = vld [vmem:[#allocation6 + $0x40] sm:$0xff]  ;;  %v1750_v55 = vld [vmem:[#allocation6 + $0x168] sm:$0xff] }
 0x640   :  { %v3800_v22 = vmul.f32 -1.442695, %v1322_v19  ;;  %v1707_v19 = vld [vmem:[#allocation6 + $0x10] sm:$0xff] }
 0x641   :  { %v3801_v17 = vmul.f32 -1.442695, %v1323_v20  ;;  %v1711_v20 = vld [vmem:[#allocation6 + $0x30] sm:$0xff] }
 0x642   :  { %5447 = vpow2.f32 %v3800_v22  ;;  %v6195_v22 = vpack.c.bf16 %v1711_v20, %v1707_v19  ;;  %v1748_v19 = vld [vmem:[#allocation6 + $0x158] sm:$0xff] }
 0x643   :  { %5449 = vpow2.f32 %v3801_v17  ;;  %v1714_v17 = vld [vmem:[#allocation6 + $0x48] sm:$0xff]  ;;  %v1752_v20 = vld [vmem:[#allocation6 + $0x178] sm:$0xff] }
 0x64c   :  { %v5448_v23 = vpop.eup %5447 }
 0x64d   :  { %v5450_v27 = vpop.eup %5449  ;;  %v1330_v30 = vadd.f32 1.0, %v5448_v23  ;;  %v1718_v23 = vld [vmem:[#allocation6 + $0x68] sm:$0xff] }
 0x64e   :  { %v1331_v5 = vadd.f32 1.0, %v5450_v27  ;;  %v1716_v27 = vld [vmem:[#allocation6 + $0x58] sm:$0xff] }
 0x64f   :  { %5451 = vrcp.f32 %v1330_v30  ;;  %v6200_v30 = vpack.c.bf16 %v1718_v23, %v1714_v17  ;;  %v6247_v17 = vpack.c.bf16 %v1750_v55, %v1746_v48  ;;  %v6249_v23 = vpack.c.bf16 %v1752_v20, %v1748_v19 }
 0x650   :  { %5453 = vrcp.f32 %v1331_v5  ;;  %v1720_v5 = vld [vmem:[#allocation6 + $0x78] sm:$0xff] }
 0x659   :  { %v5452_v35 = vpop.eup %5451 }
 0x65a   :  { %v5454_v39 = vpop.eup %5453  ;;  %v1340_v40 = vmul.f32 %v5452_v35, %v1338_v34  ;;  %v1717_v34 = vld [vmem:[#allocation6 + $0x60] sm:$0xff]  ;;  %v6202_v35 = vpack.c.bf16 %v1720_v5, %v1716_v27 }
 0x65b   :  { %v1348_v44 = vmul.f32 %v5454_v39, %v1346_v37  ;;  %v1343_v49 = vsub.f32 1.0, %v5454_v39  ;;  %v6204_v37 = vpack.c.bf16 %v1717_v34, %v1713_v28  ;;  %v1715_v39 = vld [vmem:[#allocation6 + $0x50] sm:$0xff]  ;;  %v1745_v27 = vld [vmem:[#allocation6 + $0x140] sm:$0xff] }
 0x65c   :  { %v1341_v47 = vadd.f32 %v1340_v40, %v5926_v46  ;;  %v1719_v40 = vld [vmem:[#allocation6 + $0x70] sm:$0xff]  ;;  %v1749_v5 = vld [vmem:[#allocation6 + $0x160] sm:$0xff] }
 0x65d   :  { %v1747_v28 = vld [vmem:[#allocation6 + $0x150] sm:$0xff]  ;;  %v6252_v34 = vpack.c.bf16 %v1749_v5, %v1745_v27 }
 0x65e   :  { %5455 = vtanh.f32 %v1341_v47  ;;  %v1722_v47 = vld [vmem:[#allocation6 + $0x88] sm:$0xff] }
 0x668   :  { %v5456_v52 = vpop.eup %5455 }
 0x669   :  { %v1344_v53 = vmul.f32 %v5456_v52, %v1343_v49  ;;  %v1726_v49 = vld [vmem:[#allocation6 + $0xa8] sm:$0xff]  ;;  %v1724_v52 = vld [vmem:[#allocation6 + $0x98] sm:$0xff] }
 0x66b   :  { %v1349_v56 = vadd.f32 %v1348_v44, %v1344_v53  ;;  %v6207_v44 = vpack.c.bf16 %v1719_v40, %v1715_v39  ;;  %v6212_v53 = vpack.c.bf16 %v1726_v49, %v1722_v47  ;;  %v1751_v39 = vld [vmem:[#allocation6 + $0x170] sm:$0xff]  ;;  %v1754_v40 = vld [vmem:[#allocation6 + $0x188] sm:$0xff] }
 0x66c   :  { %v1758_v47 = vld [vmem:[#allocation6 + $0x1a8] sm:$0xff]  ;;  %v6256_v49 = vpack.c.bf16 %v1751_v39, %v1747_v28 }
 0x66d   :  { %v1351_v57 = vrot.slane %v1349_v56, 2 }
 0x66f   :  { %1418 = vmatmul.mubr.f32.vlgmr.msra.gmra.mrb[12].mxu0 %v1351_v57  ;;  %4217 = vmatmul.mubr.f32.vlgmr.msra.gmra.mrb[18].mxu1 %v1351_v57  ;;  %v1721_v57 = vld [vmem:[#allocation6 + $0x80] sm:$0xff] }
 0x670   :  { %4649 = vmatpush1.bf16.msra.mxu0 %v5770_v9  ;;  %4680 = vmatpush3.bf16.msra.mxu1 %v5814_v41 }
 0x671   :  { %4651 = vmatprep.subr.bf16.mxu0 %v5772_v10  ;;  %4681 = vmatprep.subr.bf16.mxu1 %v5661_v33 }
 0x672   :  { %1594 = vmatprep.mubr.f32.mxu0 %v6885_v1  ;;  %4251 = vmatprep.mubr.msk.f32.mxu1 %vm5662_vm2, %v6885_v1 }
 0x674   :  { %4653 = vmatpush1.bf16.msra.mxu0 %v5776_v15  ;;  %4683 = vmatpush3.bf16.msra.mxu1 %v5824_v50 }
 0x675   :  { %4655 = vmatprep.subr.bf16.mxu0 %v5779_v16  ;;  %4684 = vmatprep.subr.bf16.mxu1 %v5661_v33 }
 0x678   :  { %4657 = vmatpush1.bf16.msra.mxu0 %v5791_v25  ;;  %4686 = vmatpush3.bf16.msra.mxu1 %v5836_v59 }
 0x679   :  { %4659 = vmatprep.subr.bf16.mxu0 %v5795_v26  ;;  %4687 = vmatprep.subr.bf16.mxu1 %v5661_v33 }
 0x67c   :  { %4661 = vmatpush1.bf16.msra.mxu0 %v5806_v32  ;;  %4689 = vmatpush3.bf16.msra.mxu1 %v5846_v3 }
 0x67d   :  { %4663 = vmatprep.subr.bf16.mxu0 %v5810_v36  ;;  %4690 = vmatprep.subr.bf16.mxu1 %v5661_v33 }
 0x680   :  { %4665 = vmatpush1.bf16.msra.mxu0 %v5817_v42  ;;  %4692 = vmatpush3.bf16.msra.mxu1 %v5854_v8 }
 0x681   :  { %4667 = vmatprep.subr.bf16.mxu0 %v5820_v45  ;;  %4693 = vmatprep.subr.bf16.mxu1 %v5661_v33 }
 0x684   :  { %4669 = vmatpush1.bf16.msra.mxu0 %v5829_v51  ;;  %4695 = vmatpush3.bf16.msra.mxu1 %v5861_v13 }
 0x685   :  { %4671 = vmatprep.subr.bf16.mxu0 %v5833_v54  ;;  %4696 = vmatprep.subr.bf16.mxu1 %v5661_v33 }
 0x688   :  { %4673 = vmatpush1.bf16.msra.mxu0 %v5839_v60  ;;  %4698 = vmatpush3.bf16.msra.mxu1 %v5868_v18 }
 0x689   :  { %4675 = vmatprep.subr.bf16.mxu0 %v5843_v63  ;;  %4699 = vmatprep.subr.bf16.mxu1 %v5661_v33  ;;  %v1523_v63 = vrot.slane %v1349_v56, 6  ;;  %v1728_v56 = vld [vmem:[#allocation6 + $0xb8] sm:$0xff] }
 0x68c   :  { %4677 = vmatpush1.bf16.msra.mxu0 %v5849_v4  ;;  %4701 = vmatpush3.bf16.msra.mxu1 %v5874_v21 }
 0x68d   :  { %4735 = vmatprep.subr.bf16.mxu1 %v6190_v12 }
 0x742   :  { %v1419_v9 = vpop.f32.mrb[12].mxu0  ;;  %v1490_v10 = vpop.f32.mrb[18].mxu1 }
 0x743   :  { %v1496_v15 = vrot.slane %v1419_v9, 4  ;;  %v1421_v16 = vpop.f32.mrb[13].mxu0  ;;  %v4218_v25 = vpop.f32.mrb[19].mxu1  ;;  %v1514_v54 = vadd.f32 %v5937_v7, %v1490_v10  ;;  %v1706_v7 = vld [vmem:[#allocation6 + $0x8] sm:$0xff]  ;;  %v1725_v9 = vld [vmem:[#allocation6 + $0xa0] sm:$0xff]  ;;  %v6214_v10 = vpack.c.bf16 %v1728_v56, %v1724_v52  ;;  %v6258_v52 = vpack.c.bf16 %v1758_v47, %v1754_v40  ;;  %v1756_v56 = vld [vmem:[#allocation6 + $0x198] sm:$0xff] }
 0x744   :  { %v1497_v26 = vrot.slane %v1421_v16, 4  ;;  %v6188_v6 = vpack.c.bf16 %v1710_v0, %v1706_v7  ;;  %v1723_v16 = vld [vmem:[#allocation6 + $0x90] sm:$0xff] }
 0x745   :  { %v1500_v32 = vadd.f32 %v1496_v15, %v5921_v38  ;;  %v1516_v59 = vrot.slane %v1514_v54, 4  ;;  %v6216_v15 = vpack.c.bf16 %v1725_v9, %v1721_v57  ;;  %v1727_v25 = vld [vmem:[#allocation6 + $0xb0] sm:$0xff]  ;;  %v1760_v57 = vld [vmem:[#allocation6 + $0x1b8] sm:$0xff]  ;;  %v1753_v9 = vld [vmem:[#allocation6 + $0x180] sm:$0xff] }
 0x746   :  { %v1501_v36 = vadd.f32 %v1497_v26, %v5924_v43  ;;  %4703 = vmatprep.subr.bf16.mxu0 %v6188_v6  ;;  %v6219_v26 = vpack.c.bf16 %v1727_v25, %v1723_v16  ;;  %v1739_v0 = vld [vmem:[#allocation6 + $0x110] sm:$0xff]  ;;  %v6260_v16 = vpack.c.bf16 %v1760_v57, %v1756_v56  ;;  %v1757_v25 = vld [vmem:[#allocation6 + $0x1a0] sm:$0xff] }
 0x747   :  { %v3802_v41 = vmul.f32 -1.442695, %v1500_v32  ;;  %v1730_v32 = vld [vmem:[#allocation6 + $0xc8] sm:$0xff]  ;;  %v6243_v11 = vpack.c.bf16 %v1743_v2, %v1739_v0 }
 0x748   :  { %v3803_v42 = vmul.f32 -1.442695, %v1501_v36  ;;  %v1734_v36 = vld [vmem:[#allocation6 + $0xe8] sm:$0xff] }
 0x749   :  { %5457 = vpow2.f32 %v3802_v41  ;;  %v1732_v41 = vld [vmem:[#allocation6 + $0xd8] sm:$0xff] }
 0x74a   :  { %5459 = vpow2.f32 %v3803_v42  ;;  %v6224_v42 = vpack.c.bf16 %v1734_v36, %v1730_v32  ;;  %v1755_v32 = vld [vmem:[#allocation6 + $0x190] sm:$0xff] }
 0x74b   :  { %v1759_v36 = vld [vmem:[#allocation6 + $0x1b0] sm:$0xff] }
 0x753   :  { %v5458_v45 = vpop.eup %5457 }
 0x754   :  { %v5460_v33 = vpop.eup %5459  ;;  %v1508_v50 = vadd.f32 1.0, %v5458_v45  ;;  %v1736_v45 = vld [vmem:[#allocation6 + $0xf8] sm:$0xff] }
 0x755   :  { %v1509_v51 = vadd.f32 1.0, %v5460_v33  ;;  %v1729_v33 = vld [vmem:[#allocation6 + $0xc0] sm:$0xff] }
 0x756   :  { %5461 = vrcp.f32 %v1508_v50  ;;  %v1733_v50 = vld [vmem:[#allocation6 + $0xe0] sm:$0xff] }
 0x757   :  { %5463 = vrcp.f32 %v1509_v51  ;;  %v6226_v51 = vpack.c.bf16 %v1736_v45, %v1732_v41  ;;  %v6228_v54 = vpack.c.bf16 %v1733_v50, %v1729_v33  ;;  %v6263_v41 = vpack.c.bf16 %v1757_v25, %v1753_v9  ;;  %v1762_v45 = vld [vmem:[#allocation6 + $0x1c8] sm:$0xff]  ;;  %v1764_v50 = vld [vmem:[#allocation6 + $0x1d8] sm:$0xff] }
 0x758   :  { %v1766_v33 = vld [vmem:[#allocation6 + $0x1e8] sm:$0xff] }
 0x760   :  { %v5462_v60 = vpop.eup %5461 }
 0x761   :  { %v5464_v3 = vpop.eup %5463  ;;  %v1518_v4 = vmul.f32 %v5462_v60, %v1516_v59  ;;  %v1731_v59 = vld [vmem:[#allocation6 + $0xd0] sm:$0xff] }
 0x762   :  { %v1525_v8 = vmul.f32 %v5464_v3, %v1523_v63  ;;  %v1521_v18 = vsub.f32 1.0, %v5464_v3  ;;  %v1735_v60 = vld [vmem:[#allocation6 + $0xf0] sm:$0xff]  ;;  %v1738_v3 = vld [vmem:[#allocation6 + $0x108] sm:$0xff] }
 0x763   :  { %v1519_v13 = vadd.f32 %v1518_v4, %v5926_v46  ;;  %v6231_v63 = vpack.c.bf16 %v1735_v60, %v1731_v59  ;;  %v1742_v4 = vld [vmem:[#allocation6 + $0x128] sm:$0xff]  ;;  %v6267_v59 = vpack.c.bf16 %v1759_v36, %v1755_v32  ;;  %v6269_v60 = vpack.c.bf16 %v1766_v33, %v1762_v45  ;;  %v5577_v32 = vld [vmem:[%s6876_s4] ss:$0 sm:$0xff] }
 0x765   :  { %5465 = vtanh.f32 %v1519_v13  ;;  %v6236_v13 = vpack.c.bf16 %v1742_v4, %v1738_v3  ;;  %v1768_v3 = vld [vmem:[#allocation6 + $0x1f8] sm:$0xff]  ;;  %v1761_v4 = vld [vmem:[#allocation6 + $0x1c0] sm:$0xff] }
 0x76f   :  { %v5466_v21 = vpop.eup %5465 }
 0x770   :  { %v1522_v58 = vmul.f32 %v5466_v21, %v1521_v18  ;;  %v1744_v18 = vld [vmem:[#allocation6 + $0x138] sm:$0xff]  ;;  %v1737_v21 = vld [vmem:[#allocation6 + $0x100] sm:$0xff] }
 0x772   :  { %v6183_v61 = vadd.f32 %v1525_v8, %v1522_v58  ;;  %v1740_v8 = vld [vmem:[#allocation6 + $0x118] sm:$0xff]  ;;  %v1741_v58 = vld [vmem:[#allocation6 + $0x120] sm:$0xff] }
 0x773   :  { %v6240_v7 = vpack.c.bf16 %v1741_v58, %v1737_v21  ;;  %v1763_v21 = vld [vmem:[#allocation6 + $0x1d0] sm:$0xff] }
 0x774   :  { %v1528_v62 = vrot.slane %v6183_v61, 4  ;;  %v1767_v58 = vld [vmem:[#allocation6 + $0x1f0] sm:$0xff] }
 0x775   :  { %v6279_v2 = vpack.c.bf16 %v1767_v58, %v1763_v21 }
 0x776   :  { %1595 = vmatmul.mubr.f32.vlgmr.msra.gmra.mrb[14].mxu0 %v1528_v62  ;;  %4252 = vmatmul.mubr.f32.vlgmr.msra.gmra.mrb[20].mxu1 %v1528_v62  ;;  %v6238_v62 = vpack.c.bf16 %v1744_v18, %v1740_v8  ;;  %v1765_v8 = vld [vmem:[#allocation6 + $0x1e0] sm:$0xff]  ;;  %v6272_v18 = vpack.c.bf16 %v1768_v3, %v1764_v50 }
 0x777   :  { %1841 = vmatprep.mubr.f32.mxu0 %v6885_v1  ;;  %1912 = vmatprep.mubr.f32.mxu1 %v6885_v1  ;;  %v6275_v0 = vpack.c.bf16 %v1765_v8, %v1761_v4 }
 0x778   :  { %4705 = vmatpush1.bf16.msra.mxu0 %v6192_v14  ;;  %4737 = vmatpush1.bf16.msra.mxu1 %v6195_v22 }
 0x779   :  { %4707 = vmatprep.subr.bf16.mxu0 %v6200_v30  ;;  %4739 = vmatprep.subr.bf16.mxu1 %v6202_v35 }
 0x77c   :  { %4709 = vmatpush1.bf16.msra.mxu0 %v6204_v37  ;;  %4741 = vmatpush1.bf16.msra.mxu1 %v6207_v44 }
 0x77d   :  { %4711 = vmatprep.subr.bf16.mxu0 %v6212_v53  ;;  %4743 = vmatprep.subr.bf16.mxu1 %v6214_v10 }
 0x780   :  { %4713 = vmatpush1.bf16.msra.mxu0 %v6216_v15  ;;  %4745 = vmatpush1.bf16.msra.mxu1 %v6219_v26 }
 0x781   :  { %4715 = vmatprep.subr.bf16.mxu0 %v6224_v42  ;;  %4747 = vmatprep.subr.bf16.mxu1 %v6226_v51 }
 0x784   :  { %4717 = vmatpush1.bf16.msra.mxu0 %v6228_v54  ;;  %4749 = vmatpush1.bf16.msra.mxu1 %v6231_v63 }
 0x785   :  { %4719 = vmatprep.subr.bf16.mxu0 %v6236_v13  ;;  %4751 = vmatprep.subr.bf16.mxu1 %v6238_v62 }
 0x788   :  { %4721 = vmatpush1.bf16.msra.mxu0 %v6240_v7  ;;  %4753 = vmatpush1.bf16.msra.mxu1 %v6243_v11 }
 0x789   :  { %4723 = vmatprep.subr.bf16.mxu0 %v6247_v17  ;;  %4755 = vmatprep.subr.bf16.mxu1 %v6249_v23 }
 0x78c   :  { %4725 = vmatpush1.bf16.msra.mxu0 %v6252_v34  ;;  %4757 = vmatpush1.bf16.msra.mxu1 %v6256_v49 }
 0x78d   :  { %4727 = vmatprep.subr.bf16.mxu0 %v6258_v52  ;;  %4759 = vmatprep.subr.bf16.mxu1 %v6260_v16 }
 0x790   :  { %4729 = vmatpush1.bf16.msra.mxu0 %v6263_v41  ;;  %4761 = vmatpush1.bf16.msra.mxu1 %v6267_v59 }
 0x791   :  { %4731 = vmatprep.subr.bf16.mxu0 %v6269_v60  ;;  %4763 = vmatprep.subr.bf16.mxu1 %v6272_v18 }
 0x794   :  { %4733 = vmatpush1.bf16.msra.mxu0 %v6275_v0  ;;  %4765 = vmatpush1.bf16.msra.mxu1 %v6279_v2 }
 0x795   :  { %4767 = vmatprep.subr.bf16.mxu0 %v6188_v6  ;;  %4799 = vmatprep.subr.bf16.mxu1 %v6190_v12 }
 0x849   :  { %v1596_v48 = vpop.f32.mrb[14].mxu0  ;;  %v1667_v55 = vpop.f32.mrb[20].mxu1 }
 0x84a   :  { %v1673_v19 = vrot.slane %v1596_v48, 2  ;;  %v1598_v20 = vpop.f32.mrb[15].mxu0  ;;  %v4253_v27 = vpop.f32.mrb[21].mxu1  ;;  %v1691_v36 = vadd.f32 %v5577_v32, %v1667_v55  ;;  %v1769_v55 = vld [vmem:[%s6879_s7] sm:$0x7] }
 0x84b   :  { %v1674_v5 = vrot.slane %v1598_v20, 2  ;;  %v6344_v27 = vrot.slane %v1769_v55, %v5910_v24 }
 0x84c   :  { %v1677_v28 = vadd.f32 %v1673_v19, %v5921_v38  ;;  %v1693_v45 = vrot.slane %v1691_v36, 2  ;;  %v1700_v38 = vrot.slane %v6183_v61, 6 }
 0x84d   :  { %v1678_v39 = vadd.f32 %v1674_v5, %v5924_v43 }
 0x84e   :  { %v3804_v40 = vmul.f32 -1.442695, %v1677_v28  ;;  %v6348_v28 = vrot.slane %v1769_v55, %v5915_v29 }
 0x84f   :  { %v3805_v47 = vmul.f32 -1.442695, %v1678_v39 }
 0x850   :  { %5467 = vpow2.f32 %v3804_v40 }
 0x851   :  { %5469 = vpow2.f32 %v3805_v47 }
 0x85a   :  { %v5468_v56 = vpop.eup %5467 }
 0x85b   :  { %v5470_v57 = vpop.eup %5469  ;;  %v1685_v9 = vadd.f32 1.0, %v5468_v56 }
 0x85c   :  { %v1686_v25 = vadd.f32 1.0, %v5470_v57 }
 0x85d   :  { %5471 = vrcp.f32 %v1685_v9 }
 0x85e   :  { %5473 = vrcp.f32 %v1686_v25 }
 0x867   :  { %v5472_v33 = vpop.eup %5471 }
 0x868   :  { %v5474_v43 = vpop.eup %5473  ;;  %v1695_v50 = vmul.f32 %v5472_v33, %v1693_v45 }
 0x869   :  { %v1702_v3 = vmul.f32 %v5474_v43, %v1700_v38  ;;  %v1698_v8 = vsub.f32 1.0, %v5474_v43 }
 0x86a   :  { %v1696_v4 = vadd.f32 %v1695_v50, %v5926_v46  ;;  %v1704_v46 = vld [vmem:[%s6877_s5] sm:$0x7]  ;;  %v6357_v50 = vrot.slane %v1769_v55, %v5917_v31 }
 0x86b   :  { %v6335_v61 = vrot.slane %v1704_v46, %v5910_v24  ;;  %v6341_v20 = vrot.slane %v1704_v46, %v5915_v29  ;;  %v6354_v29 = vrot.slane %v1704_v46, %v5917_v31 }
 0x86c   :  { %5475 = vtanh.f32 %v1696_v4  ;;  %v6363_v4 = vld [vmem:[%s6880_s8] ss:$0 sm:$0xff] }
 0x86d   :  { %v1934_v5 = vmul.f32 0.0, %v6335_v61  ;;  %v1935_v39 = vmul.f32 0.0, %v6341_v20 }
 0x86f   :  { %v1953_v40 = vadd.f32 %v6344_v27, %v1934_v5  ;;  %v1954_v57 = vadd.f32 %v6348_v28, %v1935_v39 }
 0x876   :  { %v5476_v21 = vpop.eup %5475 }
 0x877   :  { %v1699_v58 = vmul.f32 %v5476_v21, %v1698_v8 }
 0x879   :  { %v1703_v48 = vadd.f32 %v1702_v3, %v1699_v58  ;;  %v1936_v3 = vmul.f32 0.0, %v6354_v29 }
 0x87b   :  { %v6293_v19 = vrot.slane %v1703_v48, 6  ;;  %v1955_v21 = vadd.f32 %v6357_v50, %v1936_v3  ;;  %v6419_v3 = vld [vmem:[#allocation2] ss:$0 sm:$0xff] }
 0x87d   :  { %1842 = vmatmul.mubr.f32.vlgmr.msra.gmra.mrb[16].mxu0 %v6293_v19  ;;  %1913 = vmatmul.mubr.f32.vlgmr.msra.gmra.mrb[22].mxu1 %v6293_v19 }
 0x87e   :  { %4769 = vmatpush1.bf16.msra.mxu0 %v6192_v14  ;;  %4801 = vmatpush1.bf16.msra.mxu1 %v6195_v22 }
 0x87f   :  { %4771 = vmatprep.subr.bf16.mxu0 %v6200_v30  ;;  %4803 = vmatprep.subr.bf16.mxu1 %v6202_v35 }
 0x880   :  { %2048 = vmatprep.mubr.f32.mxu0 %v6885_v1  ;;  %2119 = vmatprep.mubr.f32.mxu1 %v6885_v1 }
 0x882   :  { %4773 = vmatpush1.bf16.msra.mxu0 %v6204_v37  ;;  %4805 = vmatpush1.bf16.msra.mxu1 %v6207_v44 }
 0x883   :  { %4775 = vmatprep.subr.bf16.mxu0 %v6212_v53  ;;  %4807 = vmatprep.subr.bf16.mxu1 %v6214_v10 }
 0x886   :  { %4777 = vmatpush1.bf16.msra.mxu0 %v6216_v15  ;;  %4809 = vmatpush1.bf16.msra.mxu1 %v6219_v26 }
 0x887   :  { %4779 = vmatprep.subr.bf16.mxu0 %v6224_v42  ;;  %4811 = vmatprep.subr.bf16.mxu1 %v6226_v51 }
 0x88a   :  { %4781 = vmatpush1.bf16.msra.mxu0 %v6228_v54  ;;  %4813 = vmatpush1.bf16.msra.mxu1 %v6231_v63 }
 0x88b   :  { %4783 = vmatprep.subr.bf16.mxu0 %v6236_v13  ;;  %4815 = vmatprep.subr.bf16.mxu1 %v6238_v62 }
 0x88e   :  { %4785 = vmatpush1.bf16.msra.mxu0 %v6240_v7  ;;  %4817 = vmatpush1.bf16.msra.mxu1 %v6243_v11 }
 0x88f   :  { %4787 = vmatprep.subr.bf16.mxu0 %v6247_v17  ;;  %4819 = vmatprep.subr.bf16.mxu1 %v6249_v23 }
 0x892   :  { %4789 = vmatpush1.bf16.msra.mxu0 %v6252_v34  ;;  %4821 = vmatpush1.bf16.msra.mxu1 %v6256_v49 }
 0x893   :  { %4791 = vmatprep.subr.bf16.mxu0 %v6258_v52  ;;  %4823 = vmatprep.subr.bf16.mxu1 %v6260_v16 }
 0x896   :  { %4793 = vmatpush1.bf16.msra.mxu0 %v6263_v41  ;;  %4825 = vmatpush1.bf16.msra.mxu1 %v6267_v59 }
 0x897   :  { %4795 = vmatprep.subr.bf16.mxu0 %v6269_v60  ;;  %4827 = vmatprep.subr.bf16.mxu1 %v6272_v18 }
 0x89a   :  { %4797 = vmatpush1.bf16.msra.mxu0 %v6275_v0  ;;  %4829 = vmatpush1.bf16.msra.mxu1 %v6279_v2 }
 0x89b   :  { %4831 = vmatprep.subr.bf16.mxu0 %v6188_v6  ;;  %4863 = vmatprep.subr.bf16.mxu1 %v6190_v12 }
 0x950   :  { %v1843_v47 = vpop.f32.mrb[16].mxu0  ;;  %v1914_v56 = vpop.f32.mrb[22].mxu1 }
 0x951   :  { %v1956_v9 = vadd.f32 %v1953_v40, %v1843_v47  ;;  %v1845_v25 = vpop.f32.mrb[17].mxu0  ;;  %v1916_v32 = vpop.f32.mrb[23].mxu1  ;;  %v1976_v58 = vadd.f32 %v6363_v4, %v1914_v56 }
 0x952   :  { %v1957_v45 = vadd.f32 %v1954_v57, %v1845_v25 }
 0x953   :  { %v3806_v36 = vmul.f32 -1.442695, %v1956_v9 }
 0x954   :  { %v3807_v24 = vmul.f32 -1.442695, %v1957_v45  ;;  %v6415_v45 = vld [vmem:[%s6882_s10] ss:$0 sm:$0xff] }
 0x955   :  { %5477 = vpow2.f32 %v3806_v36 }
 0x956   :  { %5479 = vpow2.f32 %v3807_v24 }
 0x95f   :  { %v5478_v33 = vpop.eup %5477 }
 0x960   :  { %v1964_v38 = vadd.f32 1.0, %v5478_v33  ;;  %v5480_v43 = vpop.eup %5479 }
 0x961   :  { %v1965_v8 = vadd.f32 1.0, %v5480_v43  ;;  %v5663_v43 = vmov 0  }
 0x962   :  { %5481 = vrcp.f32 %v1964_v38  ;;  %5394 = vset.pattern.permute.xlu0 %v5663_v43  ;;  %5395 = vset.pattern.permute.xlu1 %v5663_v43 }
 0x963   :  { %5483 = vrcp.f32 %v1965_v8 }
 0x96c   :  { %v5482_v48 = vpop.eup %5481 }
 0x96d   :  { %v1977_v5 = vmul.f32 %v5482_v48, %v1976_v58  ;;  %v5484_v39 = vpop.eup %5483 }
 0x96e   :  { %v1980_v31 = vsub.f32 1.0, %v5484_v39  ;;  %v1982_v47 = vmul.f32 %v5484_v39, %v6293_v19  ;;  %v6409_v19 = vld [vmem:[%s6881_s9] ss:$0 sm:$0xff] }
 0x96f   :  { %v1978_v46 = vadd.f32 %v1977_v5, %v1955_v21 }
 0x971   :  { %5485 = vtanh.f32 %v1978_v46 }
 0x97b   :  { %v5486_v55 = vpop.eup %5485 }
 0x97c   :  { %v1981_v40 = vmul.f32 %v5486_v55, %v1980_v31 }
 0x97e   :  { %v6368_v57 = vadd.f32 %v1982_v47, %v1981_v40 }
 0x980   :  { %2049 = vmatmul.mubr.f32.vlgmr.msra.gmra.mrb[18].mxu0 %v6368_v57  ;;  %2120 = vmatmul.mubr.f32.vlgmr.msra.gmra.mrb[24].mxu1 %v6368_v57 }
 0x981   :  { %4833 = vmatpush1.bf16.msra.mxu0 %v6192_v14  ;;  %4865 = vmatpush1.bf16.msra.mxu1 %v6195_v22 }
 0x982   :  { %4835 = vmatprep.subr.bf16.mxu0 %v6200_v30  ;;  %4867 = vmatprep.subr.bf16.mxu1 %v6202_v35 }
 0x983   :  { %2251 = vmatprep.mubr.f32.mxu0 %v6885_v1  ;;  %2322 = vmatprep.mubr.f32.mxu1 %v6885_v1 }
 0x985   :  { %4837 = vmatpush1.bf16.msra.mxu0 %v6204_v37  ;;  %4869 = vmatpush1.bf16.msra.mxu1 %v6207_v44 }
 0x986   :  { %4839 = vmatprep.subr.bf16.mxu0 %v6212_v53  ;;  %4871 = vmatprep.subr.bf16.mxu1 %v6214_v10 }
 0x989   :  { %4841 = vmatpush1.bf16.msra.mxu0 %v6216_v15  ;;  %4873 = vmatpush1.bf16.msra.mxu1 %v6219_v26 }
 0x98a   :  { %4843 = vmatprep.subr.bf16.mxu0 %v6224_v42  ;;  %4875 = vmatprep.subr.bf16.mxu1 %v6226_v51 }
 0x98d   :  { %4845 = vmatpush1.bf16.msra.mxu0 %v6228_v54  ;;  %4877 = vmatpush1.bf16.msra.mxu1 %v6231_v63 }
 0x98e   :  { %4847 = vmatprep.subr.bf16.mxu0 %v6236_v13  ;;  %4879 = vmatprep.subr.bf16.mxu1 %v6238_v62 }
 0x991   :  { %4849 = vmatpush1.bf16.msra.mxu0 %v6240_v7  ;;  %4881 = vmatpush1.bf16.msra.mxu1 %v6243_v11 }
 0x992   :  { %4851 = vmatprep.subr.bf16.mxu0 %v6247_v17  ;;  %4883 = vmatprep.subr.bf16.mxu1 %v6249_v23 }
 0x995   :  { %4853 = vmatpush1.bf16.msra.mxu0 %v6252_v34  ;;  %4885 = vmatpush1.bf16.msra.mxu1 %v6256_v49 }
 0x996   :  { %4855 = vmatprep.subr.bf16.mxu0 %v6258_v52  ;;  %4887 = vmatprep.subr.bf16.mxu1 %v6260_v16 }
 0x999   :  { %4857 = vmatpush1.bf16.msra.mxu0 %v6263_v41  ;;  %4889 = vmatpush1.bf16.msra.mxu1 %v6267_v59 }
 0x99a   :  { %4859 = vmatprep.subr.bf16.mxu0 %v6269_v60  ;;  %4891 = vmatprep.subr.bf16.mxu1 %v6272_v18 }
 0x99d   :  { %4861 = vmatpush1.bf16.msra.mxu0 %v6275_v0  ;;  %4893 = vmatpush1.bf16.msra.mxu1 %v6279_v2 }
 0x99e   :  { %4895 = vmatprep.subr.bf16.mxu0 %v6188_v6  ;;  %4927 = vmatprep.subr.bf16.mxu1 %v6190_v12 }
 0xa53   :  { %v2050_v56 = vpop.f32.mrb[18].mxu0  ;;  %v2121_v9 = vpop.f32.mrb[24].mxu1 }
 0xa54   :  { %v2052_v25 = vpop.f32.mrb[19].mxu0  ;;  %v2123_v32 = vpop.f32.mrb[25].mxu1  ;;  %v2179_v43 = vadd.f32 %v6363_v4, %v2121_v9 }
 0xa55   :  { %v2132_v36 = vadd.f32 %v6409_v19, %v2123_v32 }
 0xa57   :  { %v2133_v24 = vmax.f32 %v2132_v36, 0.0 }
 0xa59   :  { %v2140_v33 = vmul.f32 %v6415_v45, %v2133_v24 }
 0xa5b   :  { %v2142_v38 = vsel %vm2141_vm3, %v2140_v33, 0.0 }
 0xa5c   :  { %2143 = vadd.xlane.f32.xlu0 %v2142_v38 }
 0xae9   :  { %v2144_v8 = vpop.xlane.xlu0 %2143 }
 0xaea   :  { %v2151_v21 = vadd.f32 %v6419_v3, %v2144_v8 }
 0xaec   :  { %2153 = vst.msk [vmem:[#allocation8] sm:$0x3] %vm2152_vm4, %v2151_v21  ;;  %2156 = vperm.xlu0 %5394, %v2151_v21  }
 0xb6b   :  { %v2157_v58 = vpop.permute.xlu0 %2156 }
 0xb6c   :  { %v2159_v48 = vmul.f32 %v2157_v58, %v6335_v61  ;;  %v2160_v5 = vmul.f32 %v2157_v58, %v6341_v20  ;;  %v2161_v33 = vmul.f32 %v2157_v58, %v6354_v29 }
 0xb6e   :  { %v2162_v46 = vadd.f32 %v2159_v48, %v6344_v27  ;;  %v2163_v39 = vadd.f32 %v2160_v5, %v6348_v28  ;;  %v2164_v21 = vadd.f32 %v2161_v33, %v6357_v50 }
 0xb70   :  { %v2165_v31 = vadd.f32 %v2162_v46, %v2050_v56  ;;  %v2166_v40 = vadd.f32 %v2163_v39, %v2052_v25 }
 0xb72   :  { %v3812_v55 = vmul.f32 -1.442695, %v2165_v31  ;;  %v3813_v47 = vmul.f32 -1.442695, %v2166_v40 }
 0xb74   :  { %5487 = vpow2.f32 %v3812_v55 }
 0xb75   :  { %5489 = vpow2.f32 %v3813_v47 }
 0xb7e   :  { %v5488_v32 = vpop.eup %5487 }
 0xb7f   :  { %v2173_v36 = vadd.f32 1.0, %v5488_v32  ;;  %v5490_v24 = vpop.eup %5489 }
 0xb80   :  { %v2174_v38 = vadd.f32 1.0, %v5490_v24 }
 0xb81   :  { %5491 = vrcp.f32 %v2173_v36 }
 0xb82   :  { %5493 = vrcp.f32 %v2174_v38 }
 0xb8b   :  { %v5492_v8 = vpop.eup %5491 }
 0xb8c   :  { %v2180_v48 = vmul.f32 %v5492_v8, %v2179_v43  ;;  %v5494_v25 = vpop.eup %5493 }
 0xb8d   :  { %v2183_v5 = vsub.f32 1.0, %v5494_v25  ;;  %v2185_v31 = vmul.f32 %v5494_v25, %v6368_v57 }
 0xb8e   :  { %v2181_v56 = vadd.f32 %v2180_v48, %v2164_v21 }
 0xb90   :  { %5495 = vtanh.f32 %v2181_v56 }
 0xb9a   :  { %v5496_v46 = vpop.eup %5495 }
 0xb9b   :  { %v2184_v39 = vmul.f32 %v5496_v46, %v2183_v5 }
 0xb9d   :  { %v6430_v55 = vadd.f32 %v2185_v31, %v2184_v39 }
 0xb9f   :  { %2252 = vmatmul.mubr.f32.vlgmr.msra.gmra.mrb[20].mxu0 %v6430_v55  ;;  %2323 = vmatmul.mubr.f32.vlgmr.msra.gmra.mrb[26].mxu1 %v6430_v55 }
 0xba0   :  { %4897 = vmatpush1.bf16.msra.mxu0 %v6192_v14  ;;  %4929 = vmatpush1.bf16.msra.mxu1 %v6195_v22 }
 0xba1   :  { %4899 = vmatprep.subr.bf16.mxu0 %v6200_v30  ;;  %4931 = vmatprep.subr.bf16.mxu1 %v6202_v35 }
 0xba2   :  { %2438 = vmatprep.mubr.f32.mxu0 %v6885_v1  ;;  %2509 = vmatprep.mubr.f32.mxu1 %v6885_v1 }
 0xba4   :  { %4901 = vmatpush1.bf16.msra.mxu0 %v6204_v37  ;;  %4933 = vmatpush1.bf16.msra.mxu1 %v6207_v44 }
 0xba5   :  { %4903 = vmatprep.subr.bf16.mxu0 %v6212_v53  ;;  %4935 = vmatprep.subr.bf16.mxu1 %v6214_v10 }
 0xba8   :  { %4905 = vmatpush1.bf16.msra.mxu0 %v6216_v15  ;;  %4937 = vmatpush1.bf16.msra.mxu1 %v6219_v26 }
 0xba9   :  { %4907 = vmatprep.subr.bf16.mxu0 %v6224_v42  ;;  %4939 = vmatprep.subr.bf16.mxu1 %v6226_v51 }
 0xbac   :  { %4909 = vmatpush1.bf16.msra.mxu0 %v6228_v54  ;;  %4941 = vmatpush1.bf16.msra.mxu1 %v6231_v63 }
 0xbad   :  { %4911 = vmatprep.subr.bf16.mxu0 %v6236_v13  ;;  %4943 = vmatprep.subr.bf16.mxu1 %v6238_v62 }
 0xbb0   :  { %4913 = vmatpush1.bf16.msra.mxu0 %v6240_v7  ;;  %4945 = vmatpush1.bf16.msra.mxu1 %v6243_v11 }
 0xbb1   :  { %4915 = vmatprep.subr.bf16.mxu0 %v6247_v17  ;;  %4947 = vmatprep.subr.bf16.mxu1 %v6249_v23 }
 0xbb4   :  { %4917 = vmatpush1.bf16.msra.mxu0 %v6252_v34  ;;  %4949 = vmatpush1.bf16.msra.mxu1 %v6256_v49 }
 0xbb5   :  { %4919 = vmatprep.subr.bf16.mxu0 %v6258_v52  ;;  %4951 = vmatprep.subr.bf16.mxu1 %v6260_v16 }
 0xbb8   :  { %4921 = vmatpush1.bf16.msra.mxu0 %v6263_v41  ;;  %4953 = vmatpush1.bf16.msra.mxu1 %v6267_v59 }
 0xbb9   :  { %4923 = vmatprep.subr.bf16.mxu0 %v6269_v60  ;;  %4955 = vmatprep.subr.bf16.mxu1 %v6272_v18 }
 0xbbc   :  { %4925 = vmatpush1.bf16.msra.mxu0 %v6275_v0  ;;  %4957 = vmatpush1.bf16.msra.mxu1 %v6279_v2 }
 0xbbd   :  { %4959 = vmatprep.subr.bf16.mxu0 %v6188_v6  ;;  %4991 = vmatprep.subr.bf16.mxu1 %v6190_v12 }
 0xc72   :  { %v2253_v57 = vpop.f32.mrb[20].mxu0  ;;  %v2324_v9 = vpop.f32.mrb[26].mxu1 }
 0xc73   :  { %v2255_v58 = vpop.f32.mrb[21].mxu0  ;;  %v2326_v40 = vpop.f32.mrb[27].mxu1 }
 0xc74   :  { %v2329_v47 = vadd.f32 %v6409_v19, %v2326_v40 }
 0xc76   :  { %v2330_v32 = vmax.f32 %v2329_v47, 0.0 }
 0xc78   :  { %v2331_v36 = vmul.f32 %v6415_v45, %v2330_v32 }
 0xc7a   :  { %v2332_v24 = vsel %vm2141_vm3, %v2331_v36, 0.0 }
 0xc7b   :  { %2333 = vadd.xlane.f32.xlu1 %v2332_v24  ;;  %v2366_v24 = vadd.f32 %v6363_v4, %v2324_v9 }
 0xd08   :  { %v2334_v33 = vpop.xlane.xlu1 %2333 }
 0xd09   :  { %v6472_v38 = vadd.f32 %v6419_v3, %v2334_v33 }
 0xd0b   :  { %2343 = vperm.xlu1 %5395, %v6472_v38  }
 0xd8a   :  { %v2344_v43 = vpop.permute.xlu1 %2343 }
 0xd8b   :  { %v2346_v8 = vmul.f32 %v2344_v43, %v6335_v61  ;;  %v2347_v21 = vmul.f32 %v2344_v43, %v6341_v20  ;;  %v2348_v32 = vmul.f32 %v2344_v43, %v6354_v29 }
 0xd8d   :  { %v2349_v48 = vadd.f32 %v2346_v8, %v6344_v27  ;;  %v2350_v56 = vadd.f32 %v2347_v21, %v6348_v28  ;;  %v2351_v8 = vadd.f32 %v2348_v32, %v6357_v50 }
 0xd8f   :  { %v2352_v25 = vadd.f32 %v2349_v48, %v2253_v57  ;;  %v2353_v46 = vadd.f32 %v2350_v56, %v2255_v58 }
 0xd91   :  { %v3814_v5 = vmul.f32 -1.442695, %v2352_v25  ;;  %v3815_v39 = vmul.f32 -1.442695, %v2353_v46 }
 0xd93   :  { %5497 = vpow2.f32 %v3814_v5 }
 0xd94   :  { %5499 = vpow2.f32 %v3815_v39 }
 0xd9d   :  { %v5498_v31 = vpop.eup %5497 }
 0xd9e   :  { %v2360_v40 = vadd.f32 1.0, %v5498_v31  ;;  %v5500_v47 = vpop.eup %5499 }
 0xd9f   :  { %v2361_v36 = vadd.f32 1.0, %v5500_v47 }
 0xda0   :  { %5501 = vrcp.f32 %v2360_v40 }
 0xda1   :  { %5503 = vrcp.f32 %v2361_v36 }
 0xdaa   :  { %v5502_v33 = vpop.eup %5501 }
 0xdab   :  { %v2367_v21 = vmul.f32 %v5502_v33, %v2366_v24  ;;  %v5504_v58 = vpop.eup %5503 }
 0xdac   :  { %v2370_v48 = vsub.f32 1.0, %v5504_v58  ;;  %v2372_v5 = vmul.f32 %v5504_v58, %v6430_v55 }
 0xdad   :  { %v2368_v57 = vadd.f32 %v2367_v21, %v2351_v8 }
 0xdaf   :  { %5505 = vtanh.f32 %v2368_v57 }
 0xdb9   :  { %v5506_v56 = vpop.eup %5505 }
 0xdba   :  { %v2371_v25 = vmul.f32 %v5506_v56, %v2370_v48 }
 0xdbc   :  { %v6483_v46 = vadd.f32 %v2372_v5, %v2371_v25 }
 0xdbe   :  { %2439 = vmatmul.mubr.f32.vlgmr.msra.gmra.mrb[22].mxu0 %v6483_v46  ;;  %2510 = vmatmul.mubr.f32.vlgmr.msra.gmra.mrb[28].mxu1 %v6483_v46 }
 0xdbf   :  { %4961 = vmatpush1.bf16.msra.mxu0 %v6192_v14  ;;  %4993 = vmatpush1.bf16.msra.mxu1 %v6195_v22 }
 0xdc0   :  { %4963 = vmatprep.subr.bf16.mxu0 %v6200_v30  ;;  %4995 = vmatprep.subr.bf16.mxu1 %v6202_v35 }
 0xdc1   :  { %2625 = vmatprep.mubr.f32.mxu0 %v6885_v1  ;;  %2696 = vmatprep.mubr.f32.mxu1 %v6885_v1 }
 0xdc3   :  { %4965 = vmatpush1.bf16.msra.mxu0 %v6204_v37  ;;  %4997 = vmatpush1.bf16.msra.mxu1 %v6207_v44 }
 0xdc4   :  { %4967 = vmatprep.subr.bf16.mxu0 %v6212_v53  ;;  %4999 = vmatprep.subr.bf16.mxu1 %v6214_v10 }
 0xdc7   :  { %4969 = vmatpush1.bf16.msra.mxu0 %v6216_v15  ;;  %5001 = vmatpush1.bf16.msra.mxu1 %v6219_v26 }
 0xdc8   :  { %4971 = vmatprep.subr.bf16.mxu0 %v6224_v42  ;;  %5003 = vmatprep.subr.bf16.mxu1 %v6226_v51 }
 0xdcb   :  { %4973 = vmatpush1.bf16.msra.mxu0 %v6228_v54  ;;  %5005 = vmatpush1.bf16.msra.mxu1 %v6231_v63 }
 0xdcc   :  { %4975 = vmatprep.subr.bf16.mxu0 %v6236_v13  ;;  %5007 = vmatprep.subr.bf16.mxu1 %v6238_v62 }
 0xdcf   :  { %4977 = vmatpush1.bf16.msra.mxu0 %v6240_v7  ;;  %5009 = vmatpush1.bf16.msra.mxu1 %v6243_v11 }
 0xdd0   :  { %4979 = vmatprep.subr.bf16.mxu0 %v6247_v17  ;;  %5011 = vmatprep.subr.bf16.mxu1 %v6249_v23 }
 0xdd3   :  { %4981 = vmatpush1.bf16.msra.mxu0 %v6252_v34  ;;  %5013 = vmatpush1.bf16.msra.mxu1 %v6256_v49 }
 0xdd4   :  { %4983 = vmatprep.subr.bf16.mxu0 %v6258_v52  ;;  %5015 = vmatprep.subr.bf16.mxu1 %v6260_v16 }
 0xdd7   :  { %4985 = vmatpush1.bf16.msra.mxu0 %v6263_v41  ;;  %5017 = vmatpush1.bf16.msra.mxu1 %v6267_v59 }
 0xdd8   :  { %4987 = vmatprep.subr.bf16.mxu0 %v6269_v60  ;;  %5019 = vmatprep.subr.bf16.mxu1 %v6272_v18 }
 0xddb   :  { %4989 = vmatpush1.bf16.msra.mxu0 %v6275_v0  ;;  %5021 = vmatpush1.bf16.msra.mxu1 %v6279_v2 }
 0xddc   :  { %5023 = vmatprep.subr.bf16.mxu0 %v6188_v6  ;;  %5055 = vmatprep.subr.bf16.mxu1 %v6190_v12 }
 0xe91   :  { %v2440_v55 = vpop.f32.mrb[22].mxu0  ;;  %v2511_v9 = vpop.f32.mrb[28].mxu1 }
 0xe92   :  { %v2442_v43 = vpop.f32.mrb[23].mxu0  ;;  %v2513_v39 = vpop.f32.mrb[29].mxu1 }
 0xe93   :  { %v2516_v31 = vadd.f32 %v6409_v19, %v2513_v39 }
 0xe95   :  { %v2517_v40 = vmax.f32 %v2516_v31, 0.0 }
 0xe97   :  { %v2518_v47 = vmul.f32 %v6415_v45, %v2517_v40 }
 0xe99   :  { %v2519_v32 = vsel %vm2141_vm3, %v2518_v47, 0.0 }
 0xe9a   :  { %2520 = vadd.xlane.f32.xlu1 %v2519_v32 }
 0xf27   :  { %v2521_v36 = vpop.xlane.xlu1 %2520 }
 0xf28   :  { %v6525_v24 = vadd.f32 %v6419_v3, %v2521_v36  ;;  %v2553_v36 = vadd.f32 %v6363_v4, %v2511_v9 }
 0xf2a   :  { %6891 = vst [vmem:[#allocation12_spill] sm:$0xff] %v6525_v24  ;;  %2530 = vperm.xlu0 %5394, %v6525_v24  }
 0xfa9   :  { %v2531_v33 = vpop.permute.xlu0 %2530 }
 0xfaa   :  { %v2533_v8 = vmul.f32 %v2531_v33, %v6335_v61  ;;  %v2534_v21 = vmul.f32 %v2531_v33, %v6341_v20  ;;  %v2535_v47 = vmul.f32 %v2531_v33, %v6354_v29 }
 0xfac   :  { %v2536_v57 = vadd.f32 %v2533_v8, %v6344_v27  ;;  %v2537_v58 = vadd.f32 %v2534_v21, %v6348_v28  ;;  %v2538_v8 = vadd.f32 %v2535_v47, %v6357_v50 }
 0xfae   :  { %v2539_v48 = vadd.f32 %v2536_v57, %v2440_v55  ;;  %v2540_v25 = vadd.f32 %v2537_v58, %v2442_v43 }
 0xfb0   :  { %v3816_v56 = vmul.f32 -1.442695, %v2539_v48  ;;  %v3817_v5 = vmul.f32 -1.442695, %v2540_v25 }
 0xfb2   :  { %5507 = vpow2.f32 %v3816_v56 }
 0xfb3   :  { %5509 = vpow2.f32 %v3817_v5 }
 0xfbc   :  { %v5508_v39 = vpop.eup %5507 }
 0xfbd   :  { %v2547_v31 = vadd.f32 1.0, %v5508_v39  ;;  %v5510_v40 = vpop.eup %5509 }
 0xfbe   :  { %v2548_v32 = vadd.f32 1.0, %v5510_v40 }
 0xfbf   :  { %5511 = vrcp.f32 %v2547_v31 }
 0xfc0   :  { %5513 = vrcp.f32 %v2548_v32 }
 0xfc9   :  { %v5512_v1 = vpop.eup %5511 }
 0xfca   :  { %v2554_v21 = vmul.f32 %v5512_v1, %v2553_v36  ;;  %v5514_v43 = vpop.eup %5513  ;;  %v6892_v1 = vmov 0.0  }
 0xfcb   :  { %v2557_v57 = vsub.f32 1.0, %v5514_v43  ;;  %v2559_v56 = vmul.f32 %v5514_v43, %v6483_v46 }
 0xfcc   :  { %v2555_v55 = vadd.f32 %v2554_v21, %v2538_v8 }
 0xfce   :  { %5515 = vtanh.f32 %v2555_v55 }
 0xfd8   :  { %v5516_v58 = vpop.eup %5515 }
 0xfd9   :  { %v2558_v48 = vmul.f32 %v5516_v58, %v2557_v57 }
 0xfdb   :  { %v6536_v25 = vadd.f32 %v2559_v56, %v2558_v48 }
 0xfdd   :  { %2626 = vmatmul.mubr.f32.vlgmr.msra.gmra.mrb[24].mxu0 %v6536_v25  ;;  %2697 = vmatmul.mubr.f32.vlgmr.msra.gmra.mrb[30].mxu1 %v6536_v25 }
 0xfde   :  { %5025 = vmatpush1.bf16.msra.mxu0 %v6192_v14  ;;  %5057 = vmatpush1.bf16.msra.mxu1 %v6195_v22 }
 0xfdf   :  { %5027 = vmatprep.subr.bf16.mxu0 %v6200_v30  ;;  %5059 = vmatprep.subr.bf16.mxu1 %v6202_v35 }
 0xfe0   :  { %2812 = vmatprep.mubr.f32.mxu0 %v6892_v1  ;;  %2883 = vmatprep.mubr.f32.mxu1 %v6892_v1 }
 0xfe2   :  { %5029 = vmatpush1.bf16.msra.mxu0 %v6204_v37  ;;  %5061 = vmatpush1.bf16.msra.mxu1 %v6207_v44 }
 0xfe3   :  { %5031 = vmatprep.subr.bf16.mxu0 %v6212_v53  ;;  %5063 = vmatprep.subr.bf16.mxu1 %v6214_v10 }
 0xfe6   :  { %5033 = vmatpush1.bf16.msra.mxu0 %v6216_v15  ;;  %5065 = vmatpush1.bf16.msra.mxu1 %v6219_v26 }
 0xfe7   :  { %5035 = vmatprep.subr.bf16.mxu0 %v6224_v42  ;;  %5067 = vmatprep.subr.bf16.mxu1 %v6226_v51 }
 0xfea   :  { %5037 = vmatpush1.bf16.msra.mxu0 %v6228_v54  ;;  %5069 = vmatpush1.bf16.msra.mxu1 %v6231_v63 }
 0xfeb   :  { %5039 = vmatprep.subr.bf16.mxu0 %v6236_v13  ;;  %5071 = vmatprep.subr.bf16.mxu1 %v6238_v62 }
 0xfee   :  { %5041 = vmatpush1.bf16.msra.mxu0 %v6240_v7  ;;  %5073 = vmatpush1.bf16.msra.mxu1 %v6243_v11 }
 0xfef   :  { %5043 = vmatprep.subr.bf16.mxu0 %v6247_v17  ;;  %5075 = vmatprep.subr.bf16.mxu1 %v6249_v23 }
 0xff2   :  { %5045 = vmatpush1.bf16.msra.mxu0 %v6252_v34  ;;  %5077 = vmatpush1.bf16.msra.mxu1 %v6256_v49 }
 0xff3   :  { %5047 = vmatprep.subr.bf16.mxu0 %v6258_v52  ;;  %5079 = vmatprep.subr.bf16.mxu1 %v6260_v16 }
 0xff6   :  { %5049 = vmatpush1.bf16.msra.mxu0 %v6263_v41  ;;  %5081 = vmatpush1.bf16.msra.mxu1 %v6267_v59 }
 0xff7   :  { %5051 = vmatprep.subr.bf16.mxu0 %v6269_v60  ;;  %5083 = vmatprep.subr.bf16.mxu1 %v6272_v18 }
 0xffa   :  { %5053 = vmatpush1.bf16.msra.mxu0 %v6275_v0  ;;  %5085 = vmatpush1.bf16.msra.mxu1 %v6279_v2 }
 0xffb   :  { %5087 = vmatprep.subr.bf16.mxu0 %v6188_v6  ;;  %5119 = vmatprep.subr.bf16.mxu1 %v6190_v12 }
0x10b0   :  { %v2627_v46 = vpop.f32.mrb[24].mxu0  ;;  %v2698_v9 = vpop.f32.mrb[30].mxu1 }
0x10b1   :  { %v2629_v33 = vpop.f32.mrb[25].mxu0  ;;  %v2700_v5 = vpop.f32.mrb[31].mxu1 }
0x10b2   :  { %v2703_v39 = vadd.f32 %v6409_v19, %v2700_v5 }
0x10b4   :  { %v2704_v31 = vmax.f32 %v2703_v39, 0.0 }
0x10b6   :  { %v2705_v40 = vmul.f32 %v6415_v45, %v2704_v31 }
0x10b8   :  { %v2706_v47 = vsel %vm2141_vm3, %v2705_v40, 0.0 }
0x10b9   :  { %2707 = vadd.xlane.f32.xlu0 %v2706_v47 }
0x1146   :  { %v2708_v32 = vpop.xlane.xlu0 %2707 }
0x1147   :  { %v6578_v36 = vadd.f32 %v6419_v3, %v2708_v32 }
0x1149   :  { %6893 = vst [vmem:[#allocation13_spill] sm:$0xff] %v6578_v36  ;;  %2717 = vperm.xlu1 %5395, %v6578_v36   ;;  %v2740_v36 = vadd.f32 %v6363_v4, %v2698_v9 }
0x11c8   :  { %v2718_v8 = vpop.permute.xlu1 %2717 }
0x11c9   :  { %v2720_v21 = vmul.f32 %v2718_v8, %v6335_v61  ;;  %v2721_v55 = vmul.f32 %v2718_v8, %v6341_v20  ;;  %v2722_v47 = vmul.f32 %v2718_v8, %v6354_v29 }
0x11cb   :  { %v2723_v43 = vadd.f32 %v2720_v21, %v6344_v27  ;;  %v2724_v57 = vadd.f32 %v2721_v55, %v6348_v28  ;;  %v2725_v21 = vadd.f32 %v2722_v47, %v6357_v50 }
0x11cd   :  { %v2726_v58 = vadd.f32 %v2723_v43, %v2627_v46  ;;  %v2727_v56 = vadd.f32 %v2724_v57, %v2629_v33 }
0x11cf   :  { %v3818_v48 = vmul.f32 -1.442695, %v2726_v58  ;;  %v3819_v5 = vmul.f32 -1.442695, %v2727_v56 }
0x11d1   :  { %5517 = vpow2.f32 %v3818_v48 }
0x11d2   :  { %5519 = vpow2.f32 %v3819_v5 }
0x11db   :  { %v5518_v39 = vpop.eup %5517 }
0x11dc   :  { %v2734_v31 = vadd.f32 1.0, %v5518_v39  ;;  %v5520_v40 = vpop.eup %5519 }
0x11dd   :  { %v2735_v32 = vadd.f32 1.0, %v5520_v40 }
0x11de   :  { %5521 = vrcp.f32 %v2734_v31 }
0x11df   :  { %5523 = vrcp.f32 %v2735_v32 }
0x11e8   :  { %v5522_v24 = vpop.eup %5521 }
0x11e9   :  { %v2741_v55 = vmul.f32 %v5522_v24, %v2740_v36  ;;  %v5524_v33 = vpop.eup %5523 }
0x11ea   :  { %v2744_v43 = vsub.f32 1.0, %v5524_v33  ;;  %v2746_v48 = vmul.f32 %v5524_v33, %v6536_v25 }
0x11eb   :  { %v2742_v46 = vadd.f32 %v2741_v55, %v2725_v21 }
0x11ed   :  { %5525 = vtanh.f32 %v2742_v46 }
0x11f7   :  { %v5526_v57 = vpop.eup %5525 }
0x11f8   :  { %v2745_v58 = vmul.f32 %v5526_v57, %v2744_v43 }
0x11fa   :  { %v6589_v56 = vadd.f32 %v2746_v48, %v2745_v58 }
0x11fc   :  { %2813 = vmatmul.mubr.f32.vlgmr.msra.gmra.mrb[26].mxu0 %v6589_v56  ;;  %2884 = vmatmul.mubr.f32.vlgmr.msra.gmra.mrb[32].mxu1 %v6589_v56 }
0x11fd   :  { %5089 = vmatpush1.bf16.msra.mxu0 %v6192_v14  ;;  %5121 = vmatpush1.bf16.msra.mxu1 %v6195_v22 }
0x11fe   :  { %5091 = vmatprep.subr.bf16.mxu0 %v6200_v30  ;;  %5123 = vmatprep.subr.bf16.mxu1 %v6202_v35 }
0x11ff   :  { %2999 = vmatprep.mubr.f32.mxu0 %v6892_v1  ;;  %3070 = vmatprep.mubr.f32.mxu1 %v6892_v1 }
0x1201   :  { %5093 = vmatpush1.bf16.msra.mxu0 %v6204_v37  ;;  %5125 = vmatpush1.bf16.msra.mxu1 %v6207_v44 }
0x1202   :  { %5095 = vmatprep.subr.bf16.mxu0 %v6212_v53  ;;  %5127 = vmatprep.subr.bf16.mxu1 %v6214_v10 }
0x1205   :  { %5097 = vmatpush1.bf16.msra.mxu0 %v6216_v15  ;;  %5129 = vmatpush1.bf16.msra.mxu1 %v6219_v26 }
0x1206   :  { %5099 = vmatprep.subr.bf16.mxu0 %v6224_v42  ;;  %5131 = vmatprep.subr.bf16.mxu1 %v6226_v51 }
0x1209   :  { %5101 = vmatpush1.bf16.msra.mxu0 %v6228_v54  ;;  %5133 = vmatpush1.bf16.msra.mxu1 %v6231_v63 }
0x120a   :  { %5103 = vmatprep.subr.bf16.mxu0 %v6236_v13  ;;  %5135 = vmatprep.subr.bf16.mxu1 %v6238_v62 }
0x120d   :  { %5105 = vmatpush1.bf16.msra.mxu0 %v6240_v7  ;;  %5137 = vmatpush1.bf16.msra.mxu1 %v6243_v11 }
0x120e   :  { %5107 = vmatprep.subr.bf16.mxu0 %v6247_v17  ;;  %5139 = vmatprep.subr.bf16.mxu1 %v6249_v23 }
0x1211   :  { %5109 = vmatpush1.bf16.msra.mxu0 %v6252_v34  ;;  %5141 = vmatpush1.bf16.msra.mxu1 %v6256_v49 }
0x1212   :  { %5111 = vmatprep.subr.bf16.mxu0 %v6258_v52  ;;  %5143 = vmatprep.subr.bf16.mxu1 %v6260_v16 }
0x1215   :  { %5113 = vmatpush1.bf16.msra.mxu0 %v6263_v41  ;;  %5145 = vmatpush1.bf16.msra.mxu1 %v6267_v59 }
0x1216   :  { %5115 = vmatprep.subr.bf16.mxu0 %v6269_v60  ;;  %5147 = vmatprep.subr.bf16.mxu1 %v6272_v18 }
0x1219   :  { %5117 = vmatpush1.bf16.msra.mxu0 %v6275_v0  ;;  %5149 = vmatpush1.bf16.msra.mxu1 %v6279_v2 }
0x121a   :  { %5151 = vmatprep.subr.bf16.mxu0 %v6188_v6  ;;  %5183 = vmatprep.subr.bf16.mxu1 %v6190_v12 }
0x12cf   :  { %v2814_v24 = vpop.f32.mrb[26].mxu0  ;;  %v2885_v25 = vpop.f32.mrb[32].mxu1 }
0x12d0   :  { %v2816_v9 = vpop.f32.mrb[27].mxu0  ;;  %v2887_v36 = vpop.f32.mrb[33].mxu1 }
0x12d1   :  { %v2890_v8 = vadd.f32 %v6409_v19, %v2887_v36 }
0x12d3   :  { %v2891_v5 = vmax.f32 %v2890_v8, 0.0 }
0x12d5   :  { %v2892_v39 = vmul.f32 %v6415_v45, %v2891_v5 }
0x12d7   :  { %v2893_v31 = vsel %vm2141_vm3, %v2892_v39, 0.0 }
0x12d8   :  { %2894 = vadd.xlane.f32.xlu1 %v2893_v31 }
0x1365   :  { %v2895_v40 = vpop.xlane.xlu1 %2894 }
0x1366   :  { %v6631_v47 = vadd.f32 %v6419_v3, %v2895_v40  ;;  %v2927_v40 = vadd.f32 %v6363_v4, %v2885_v25 }
0x1368   :  { %6894 = vst [vmem:[#allocation14_spill] sm:$0xff] %v6631_v47  ;;  %2904 = vperm.xlu0 %5394, %v6631_v47  }
0x13e7   :  { %v2905_v32 = vpop.permute.xlu0 %2904 }
0x13e8   :  { %v2907_v21 = vmul.f32 %v2905_v32, %v6335_v61  ;;  %v2908_v55 = vmul.f32 %v2905_v32, %v6341_v20  ;;  %v2909_v39 = vmul.f32 %v2905_v32, %v6354_v29 }
0x13ea   :  { %v2910_v46 = vadd.f32 %v2907_v21, %v6344_v27  ;;  %v2911_v33 = vadd.f32 %v2908_v55, %v6348_v28  ;;  %v2912_v21 = vadd.f32 %v2909_v39, %v6357_v50 }
0x13ec   :  { %v2913_v43 = vadd.f32 %v2910_v46, %v2814_v24  ;;  %v2914_v58 = vadd.f32 %v2911_v33, %v2816_v9 }
0x13ee   :  { %v3820_v57 = vmul.f32 -1.442695, %v2913_v43  ;;  %v3821_v48 = vmul.f32 -1.442695, %v2914_v58 }
0x13f0   :  { %5527 = vpow2.f32 %v3820_v57 }
0x13f1   :  { %5529 = vpow2.f32 %v3821_v48 }
0x13fa   :  { %v5528_v36 = vpop.eup %5527 }
0x13fb   :  { %v2921_v8 = vadd.f32 1.0, %v5528_v36  ;;  %v5530_v5 = vpop.eup %5529 }
0x13fc   :  { %v2922_v31 = vadd.f32 1.0, %v5530_v5 }
0x13fd   :  { %5531 = vrcp.f32 %v2921_v8 }
0x13fe   :  { %5533 = vrcp.f32 %v2922_v31 }
0x1407   :  { %v5532_v47 = vpop.eup %5531 }
0x1408   :  { %v2928_v55 = vmul.f32 %v5532_v47, %v2927_v40  ;;  %v5534_v9 = vpop.eup %5533 }
0x1409   :  { %v2931_v46 = vsub.f32 1.0, %v5534_v9  ;;  %v2933_v57 = vmul.f32 %v5534_v9, %v6589_v56 }
0x140a   :  { %v2929_v24 = vadd.f32 %v2928_v55, %v2912_v21 }
0x140c   :  { %5535 = vtanh.f32 %v2929_v24 }
0x1416   :  { %v5536_v33 = vpop.eup %5535 }
0x1417   :  { %v2932_v43 = vmul.f32 %v5536_v33, %v2931_v46 }
0x1419   :  { %v6642_v58 = vadd.f32 %v2933_v57, %v2932_v43 }
0x141b   :  { %3000 = vmatmul.mubr.f32.vlgmr.msra.gmra.mrb[28].mxu0 %v6642_v58  ;;  %3071 = vmatmul.mubr.f32.vlgmr.msra.gmra.mrb[34].mxu1 %v6642_v58 }
0x141c   :  { %5153 = vmatpush1.bf16.msra.mxu0 %v6192_v14  ;;  %5185 = vmatpush1.bf16.msra.mxu1 %v6195_v22 }
0x141d   :  { %5155 = vmatprep.subr.bf16.mxu0 %v6200_v30  ;;  %5187 = vmatprep.subr.bf16.mxu1 %v6202_v35 }
0x141e   :  { %3186 = vmatprep.mubr.f32.mxu0 %v6892_v1  ;;  %3257 = vmatprep.mubr.f32.mxu1 %v6892_v1 }
0x1420   :  { %5157 = vmatpush1.bf16.msra.mxu0 %v6204_v37  ;;  %5189 = vmatpush1.bf16.msra.mxu1 %v6207_v44 }
0x1421   :  { %5159 = vmatprep.subr.bf16.mxu0 %v6212_v53  ;;  %5191 = vmatprep.subr.bf16.mxu1 %v6214_v10 }
0x1424   :  { %5161 = vmatpush1.bf16.msra.mxu0 %v6216_v15  ;;  %5193 = vmatpush1.bf16.msra.mxu1 %v6219_v26 }
0x1425   :  { %5163 = vmatprep.subr.bf16.mxu0 %v6224_v42  ;;  %5195 = vmatprep.subr.bf16.mxu1 %v6226_v51 }
0x1428   :  { %5165 = vmatpush1.bf16.msra.mxu0 %v6228_v54  ;;  %5197 = vmatpush1.bf16.msra.mxu1 %v6231_v63 }
0x1429   :  { %5167 = vmatprep.subr.bf16.mxu0 %v6236_v13  ;;  %5199 = vmatprep.subr.bf16.mxu1 %v6238_v62 }
0x142c   :  { %5169 = vmatpush1.bf16.msra.mxu0 %v6240_v7  ;;  %5201 = vmatpush1.bf16.msra.mxu1 %v6243_v11 }
0x142d   :  { %5171 = vmatprep.subr.bf16.mxu0 %v6247_v17  ;;  %5203 = vmatprep.subr.bf16.mxu1 %v6249_v23 }
0x1430   :  { %5173 = vmatpush1.bf16.msra.mxu0 %v6252_v34  ;;  %5205 = vmatpush1.bf16.msra.mxu1 %v6256_v49 }
0x1431   :  { %5175 = vmatprep.subr.bf16.mxu0 %v6258_v52  ;;  %5207 = vmatprep.subr.bf16.mxu1 %v6260_v16 }
0x1434   :  { %5177 = vmatpush1.bf16.msra.mxu0 %v6263_v41  ;;  %5209 = vmatpush1.bf16.msra.mxu1 %v6267_v59 }
0x1435   :  { %5179 = vmatprep.subr.bf16.mxu0 %v6269_v60  ;;  %5211 = vmatprep.subr.bf16.mxu1 %v6272_v18 }
0x1438   :  { %5181 = vmatpush1.bf16.msra.mxu0 %v6275_v0  ;;  %5213 = vmatpush1.bf16.msra.mxu1 %v6279_v2 }
0x1439   :  { %5215 = vmatprep.subr.bf16.mxu0 %v6188_v6  ;;  %5247 = vmatprep.subr.bf16.mxu1 %v6190_v12 }
0x14ee   :  { %v3001_v56 = vpop.f32.mrb[28].mxu0  ;;  %v3072_v25 = vpop.f32.mrb[34].mxu1 }
0x14ef   :  { %v3003_v47 = vpop.f32.mrb[29].mxu0  ;;  %v3074_v32 = vpop.f32.mrb[35].mxu1 }
0x14f0   :  { %v3077_v48 = vadd.f32 %v6409_v19, %v3074_v32 }
0x14f2   :  { %v3078_v36 = vmax.f32 %v3077_v48, 0.0 }
0x14f4   :  { %v3079_v8 = vmul.f32 %v6415_v45, %v3078_v36 }
0x14f6   :  { %v3080_v5 = vsel %vm2141_vm3, %v3079_v8, 0.0 }
0x14f7   :  { %3081 = vadd.xlane.f32.xlu0 %v3080_v5 }
0x1584   :  { %v3082_v39 = vpop.xlane.xlu0 %3081 }
0x1585   :  { %v6684_v31 = vadd.f32 %v6419_v3, %v3082_v39  ;;  %v3114_v39 = vadd.f32 %v6363_v4, %v3072_v25 }
0x1587   :  { %6895 = vst [vmem:[#allocation15_spill] sm:$0xff] %v6684_v31  ;;  %3091 = vperm.xlu1 %5395, %v6684_v31  }
0x1606   :  { %v3092_v40 = vpop.permute.xlu1 %3091 }
0x1607   :  { %v3094_v21 = vmul.f32 %v3092_v40, %v6335_v61  ;;  %v3095_v55 = vmul.f32 %v3092_v40, %v6341_v20  ;;  %v3096_v8 = vmul.f32 %v3092_v40, %v6354_v29 }
0x1609   :  { %v3097_v24 = vadd.f32 %v3094_v21, %v6344_v27  ;;  %v3098_v9 = vadd.f32 %v3095_v55, %v6348_v28  ;;  %v3099_v21 = vadd.f32 %v3096_v8, %v6357_v50 }
0x160b   :  { %v3100_v46 = vadd.f32 %v3097_v24, %v3001_v56  ;;  %v3101_v43 = vadd.f32 %v3098_v9, %v3003_v47 }
0x160d   :  { %v3822_v33 = vmul.f32 -1.442695, %v3100_v46  ;;  %v3823_v57 = vmul.f32 -1.442695, %v3101_v43 }
0x160f   :  { %5537 = vpow2.f32 %v3822_v33 }
0x1610   :  { %5539 = vpow2.f32 %v3823_v57 }
0x1619   :  { %v5538_v32 = vpop.eup %5537 }
0x161a   :  { %v3108_v48 = vadd.f32 1.0, %v5538_v32  ;;  %v5540_v36 = vpop.eup %5539 }
0x161b   :  { %v3109_v5 = vadd.f32 1.0, %v5540_v36 }
0x161c   :  { %5541 = vrcp.f32 %v3108_v48 }
0x161d   :  { %5543 = vrcp.f32 %v3109_v5 }
0x1626   :  { %v5542_v31 = vpop.eup %5541 }
0x1627   :  { %v3115_v55 = vmul.f32 %v5542_v31, %v3114_v39  ;;  %v5544_v47 = vpop.eup %5543 }
0x1628   :  { %v3118_v24 = vsub.f32 1.0, %v5544_v47  ;;  %v3120_v33 = vmul.f32 %v5544_v47, %v6642_v58 }
0x1629   :  { %v3116_v56 = vadd.f32 %v3115_v55, %v3099_v21 }
0x162b   :  { %5545 = vtanh.f32 %v3116_v56 }
0x1635   :  { %v5546_v9 = vpop.eup %5545 }
0x1636   :  { %v3119_v46 = vmul.f32 %v5546_v9, %v3118_v24 }
0x1638   :  { %v6695_v43 = vadd.f32 %v3120_v33, %v3119_v46 }
0x163a   :  { %3187 = vmatmul.mubr.f32.vlgmr.msra.gmra.mrb[30].mxu0 %v6695_v43  ;;  %3258 = vmatmul.mubr.f32.vlgmr.msra.gmra.mrb[36].mxu1 %v6695_v43 }
0x163b   :  { %5217 = vmatpush1.bf16.msra.mxu0 %v6192_v14  ;;  %5249 = vmatpush1.bf16.msra.mxu1 %v6195_v22 }
0x163c   :  { %5219 = vmatprep.subr.bf16.mxu0 %v6200_v30  ;;  %5251 = vmatprep.subr.bf16.mxu1 %v6202_v35 }
0x163d   :  { %3373 = vmatprep.mubr.f32.mxu0 %v6892_v1  ;;  %3444 = vmatprep.mubr.f32.mxu1 %v6892_v1 }
0x163f   :  { %5221 = vmatpush1.bf16.msra.mxu0 %v6204_v37  ;;  %5253 = vmatpush1.bf16.msra.mxu1 %v6207_v44 }
0x1640   :  { %5223 = vmatprep.subr.bf16.mxu0 %v6212_v53  ;;  %5255 = vmatprep.subr.bf16.mxu1 %v6214_v10 }
0x1643   :  { %5225 = vmatpush1.bf16.msra.mxu0 %v6216_v15  ;;  %5257 = vmatpush1.bf16.msra.mxu1 %v6219_v26 }
0x1644   :  { %5227 = vmatprep.subr.bf16.mxu0 %v6224_v42  ;;  %5259 = vmatprep.subr.bf16.mxu1 %v6226_v51 }
0x1647   :  { %5229 = vmatpush1.bf16.msra.mxu0 %v6228_v54  ;;  %5261 = vmatpush1.bf16.msra.mxu1 %v6231_v63 }
0x1648   :  { %5231 = vmatprep.subr.bf16.mxu0 %v6236_v13  ;;  %5263 = vmatprep.subr.bf16.mxu1 %v6238_v62 }
0x164b   :  { %5233 = vmatpush1.bf16.msra.mxu0 %v6240_v7  ;;  %5265 = vmatpush1.bf16.msra.mxu1 %v6243_v11 }
0x164c   :  { %5235 = vmatprep.subr.bf16.mxu0 %v6247_v17  ;;  %5267 = vmatprep.subr.bf16.mxu1 %v6249_v23 }
0x164f   :  { %5237 = vmatpush1.bf16.msra.mxu0 %v6252_v34  ;;  %5269 = vmatpush1.bf16.msra.mxu1 %v6256_v49 }
0x1650   :  { %5239 = vmatprep.subr.bf16.mxu0 %v6258_v52  ;;  %5271 = vmatprep.subr.bf16.mxu1 %v6260_v16 }
0x1653   :  { %5241 = vmatpush1.bf16.msra.mxu0 %v6263_v41  ;;  %5273 = vmatpush1.bf16.msra.mxu1 %v6267_v59 }
0x1654   :  { %5243 = vmatprep.subr.bf16.mxu0 %v6269_v60  ;;  %5275 = vmatprep.subr.bf16.mxu1 %v6272_v18 }
0x1657   :  { %5245 = vmatpush1.bf16.msra.mxu0 %v6275_v0  ;;  %5277 = vmatpush1.bf16.msra.mxu1 %v6279_v2 }
0x1658   :  { %5279 = vmatprep.subr.bf16.mxu0 %v6188_v6  ;;  %5311 = vmatprep.subr.bf16.mxu1 %v6190_v12 }
0x170d   :  { %v3188_v4 = vpop.f32.mrb[30].mxu0  ;;  %v3259_v58 = vpop.f32.mrb[36].mxu1 }
0x170e   :  { %v3190_v25 = vpop.f32.mrb[31].mxu0  ;;  %v3261_v31 = vpop.f32.mrb[37].mxu1 }
0x170f   :  { %v3264_v40 = vadd.f32 %v6409_v19, %v3261_v31  ;;  %v6748_v31 = vld [vmem:[%s6880_s8] ss:$0 sm:$0xff] }
0x1711   :  { %v3265_v57 = vmax.f32 %v3264_v40, 0.0  ;;  %v3301_v40 = vadd.f32 %v6748_v31, %v3259_v58 }
0x1713   :  { %v3266_v32 = vmul.f32 %v6415_v45, %v3265_v57 }
0x1715   :  { %v3267_v48 = vsel %vm2141_vm3, %v3266_v32, 0.0 }
0x1716   :  { %3268 = vadd.xlane.f32.xlu1 %v3267_v48 }
0x17a3   :  { %v3269_v36 = vpop.xlane.xlu1 %3268 }
0x17a4   :  { %v6737_v8 = vadd.f32 %v6419_v3, %v3269_v36 }
0x17a6   :  { %3278 = vperm.xlu0 %5394, %v6737_v8  }
0x1825   :  { %v3279_v6 = vpop.permute.xlu0 %3278 }
0x1826   :  { %v3281_v5 = vmul.f32 %v3279_v6, %v6335_v61  ;;  %v3282_v39 = vmul.f32 %v3279_v6, %v6341_v20  ;;  %v3283_v46 = vmul.f32 %v3279_v6, %v6354_v29 }
0x1828   :  { %v3284_v21 = vadd.f32 %v3281_v5, %v6344_v27  ;;  %v3285_v19 = vadd.f32 %v3282_v39, %v6348_v28 }
0x182a   :  { %v3287_v55 = vadd.f32 %v3284_v21, %v3188_v4  ;;  %v3288_v56 = vadd.f32 %v3285_v19, %v3190_v25  ;;  %v3286_v25 = vadd.f32 %v3283_v46, %v6357_v50 }
0x182c   :  { %v3824_v45 = vmul.f32 -1.442695, %v3287_v55  ;;  %v3825_v47 = vmul.f32 -1.442695, %v3288_v56 }
0x182e   :  { %5547 = vpow2.f32 %v3824_v45 }
0x182f   :  { %5549 = vpow2.f32 %v3825_v47 }
0x1838   :  { %v5548_v24 = vpop.eup %5547 }
0x1839   :  { %v3295_v3 = vadd.f32 1.0, %v5548_v24  ;;  %v5550_v9 = vpop.eup %5549 }
0x183a   :  { %v3296_v33 = vadd.f32 1.0, %v5550_v9 }
0x183b   :  { %5551 = vrcp.f32 %v3295_v3 }
0x183c   :  { %5553 = vrcp.f32 %v3296_v33 }
0x1845   :  { %v5552_v4 = vpop.eup %5551 }
0x1846   :  { %v3302_v57 = vmul.f32 %v5552_v4, %v3301_v40  ;;  %v5554_v48 = vpop.eup %5553 }
0x1847   :  { %v3305_v36 = vsub.f32 1.0, %v5554_v48  ;;  %v3307_v6 = vmul.f32 %v5554_v48, %v6695_v43 }
0x1848   :  { %v3303_v32 = vadd.f32 %v3302_v57, %v3286_v25 }
0x184a   :  { %5555 = vtanh.f32 %v3303_v32 }
0x1854   :  { %v5556_v5 = vpop.eup %5555 }
0x1855   :  { %v3306_v39 = vmul.f32 %v5556_v5, %v3305_v36 }
0x1857   :  { %v6753_v21 = vadd.f32 %v3307_v6, %v3306_v39 }
0x1859   :  { %3374 = vmatmul.mubr.f32.vlgmr.msra.gmra.mrb[32].mxu0 %v6753_v21  ;;  %3445 = vmatmul.mubr.f32.vlgmr.msra.gmra.mrb[38].mxu1 %v6753_v21 }
0x185a   :  { %5281 = vmatpush1.bf16.msra.mxu0 %v6192_v14  ;;  %5313 = vmatpush1.bf16.msra.mxu1 %v6195_v22 }
0x185b   :  { %5283 = vmatprep.subr.bf16.mxu0 %v6200_v30  ;;  %5315 = vmatprep.subr.bf16.mxu1 %v6202_v35 }
0x185c   :  { %3560 = vmatprep.mubr.f32.mxu0 %v6892_v1  ;;  %3631 = vmatprep.mubr.f32.mxu1 %v6892_v1 }
0x185e   :  { %5285 = vmatpush1.bf16.msra.mxu0 %v6204_v37  ;;  %5317 = vmatpush1.bf16.msra.mxu1 %v6207_v44 }
0x185f   :  { %5287 = vmatprep.subr.bf16.mxu0 %v6212_v53  ;;  %5319 = vmatprep.subr.bf16.mxu1 %v6214_v10 }
0x1862   :  { %5289 = vmatpush1.bf16.msra.mxu0 %v6216_v15  ;;  %5321 = vmatpush1.bf16.msra.mxu1 %v6219_v26  ;;  %v6793_v15 = vld [vmem:[%s6881_s9] ss:$0 sm:$0xff]  ;;  %s5664_s9 = smov 1  }
0x1863   :  { %5291 = vmatprep.subr.bf16.mxu0 %v6224_v42  ;;  %5323 = vmatprep.subr.bf16.mxu1 %v6226_v51 }
0x1866   :  { %5293 = vmatpush1.bf16.msra.mxu0 %v6228_v54  ;;  %5325 = vmatpush1.bf16.msra.mxu1 %v6231_v63 }
0x1867   :  { %5295 = vmatprep.subr.bf16.mxu0 %v6236_v13  ;;  %5327 = vmatprep.subr.bf16.mxu1 %v6238_v62  ;;  %v6799_v13 = vld [vmem:[%s6882_s10] ss:$0 sm:$0xff]  ;;  %s5665_s10 = smov 2  }
0x186a   :  { %5297 = vmatpush1.bf16.msra.mxu0 %v6240_v7  ;;  %5329 = vmatpush1.bf16.msra.mxu1 %v6243_v11 }
0x186b   :  { %5299 = vmatprep.subr.bf16.mxu0 %v6247_v17  ;;  %5331 = vmatprep.subr.bf16.mxu1 %v6249_v23 }
0x186e   :  { %5301 = vmatpush1.bf16.msra.mxu0 %v6252_v34  ;;  %5333 = vmatpush1.bf16.msra.mxu1 %v6256_v49  ;;  %v6803_v34 = vld [vmem:[#allocation2] ss:$0 sm:$0xff] }
0x186f   :  { %5303 = vmatprep.subr.bf16.mxu0 %v6258_v52  ;;  %5335 = vmatprep.subr.bf16.mxu1 %v6260_v16 }
0x1872   :  { %5305 = vmatpush1.bf16.msra.mxu0 %v6263_v41  ;;  %5337 = vmatpush1.bf16.msra.mxu1 %v6267_v59 }
0x1873   :  { %5307 = vmatprep.subr.bf16.mxu0 %v6269_v60  ;;  %5339 = vmatprep.subr.bf16.mxu1 %v6272_v18 }
0x1876   :  { %5309 = vmatpush1.bf16.msra.mxu0 %v6275_v0  ;;  %5341 = vmatpush1.bf16.msra.mxu1 %v6279_v2 }
0x1877   :  { %5343 = vmatprep.subr.bf16.mxu0 %v6190_v12 }
0x192c   :  { %v3375_v14 = vpop.f32.mrb[32].mxu0  ;;  %v3446_v30 = vpop.f32.mrb[38].mxu1 }
0x192d   :  { %v3377_v37 = vpop.f32.mrb[33].mxu0  ;;  %v3448_v53 = vpop.f32.mrb[39].mxu1  ;;  %v3488_v33 = vadd.f32 %v6748_v31, %v3446_v30 }
0x192e   :  { %v3451_v42 = vadd.f32 %v6793_v15, %v3448_v53 }
0x1930   :  { %v3452_v54 = vmax.f32 %v3451_v42, 0.0 }
0x1932   :  { %v3453_v7 = vmul.f32 %v6799_v13, %v3452_v54 }
0x1934   :  { %v3454_v12 = vsel %vm2141_vm3, %v3453_v7, 0.0 }
0x1935   :  { %3455 = vadd.xlane.f32.xlu0 %v3454_v12 }
0x19c2   :  { %v3456_v17 = vpop.xlane.xlu0 %3455 }
0x19c3   :  { %v6806_v52 = vadd.f32 %v6803_v34, %v3456_v17 }
0x19c5   :  { %3465 = vperm.xlu1 %5395, %v6806_v52  }
0x1a44   :  { %v3466_v41 = vpop.permute.xlu1 %3465 }
0x1a45   :  { %v3468_v60 = vmul.f32 %v3466_v41, %v6335_v61  ;;  %v3469_v0 = vmul.f32 %v3466_v41, %v6341_v20  ;;  %v3470_v9 = vmul.f32 %v3466_v41, %v6354_v29 }
0x1a47   :  { %v3471_v43 = vadd.f32 %v3468_v60, %v6344_v27  ;;  %v3472_v58 = vadd.f32 %v3469_v0, %v6348_v28  ;;  %v3473_v4 = vadd.f32 %v3470_v9, %v6357_v50  ;;  %v6899_v9 = vld [vmem:[#allocation15_spill] sm:$0xff] }
0x1a49   :  { %v3474_v19 = vadd.f32 %v3471_v43, %v3375_v14  ;;  %v3475_v45 = vadd.f32 %v3472_v58, %v3377_v37 }
0x1a4b   :  { %v3826_v55 = vmul.f32 -1.442695, %v3474_v19  ;;  %v3827_v56 = vmul.f32 -1.442695, %v3475_v45 }
0x1a4d   :  { %5557 = vpow2.f32 %v3826_v55 }
0x1a4e   :  { %5559 = vpow2.f32 %v3827_v56 }
0x1a57   :  { %v5558_v47 = vpop.eup %5557 }
0x1a58   :  { %v3482_v24 = vadd.f32 1.0, %v5558_v47  ;;  %v5560_v3 = vpop.eup %5559 }
0x1a59   :  { %v3483_v46 = vadd.f32 1.0, %v5560_v3 }
0x1a5a   :  { %5561 = vrcp.f32 %v3482_v24 }
0x1a5b   :  { %5563 = vrcp.f32 %v3483_v46 }
0x1a64   :  { %v5562_v40 = vpop.eup %5561 }
0x1a65   :  { %v3489_v25 = vmul.f32 %v5562_v40, %v3488_v33  ;;  %v5564_v32 = vpop.eup %5563 }
0x1a66   :  { %v3492_v48 = vsub.f32 1.0, %v5564_v32  ;;  %v3494_v39 = vmul.f32 %v5564_v32, %v6753_v21 }
0x1a67   :  { %v3490_v57 = vadd.f32 %v3489_v25, %v3473_v4 }
0x1a69   :  { %5565 = vtanh.f32 %v3490_v57 }
0x1a73   :  { %v5566_v36 = vpop.eup %5565 }
0x1a74   :  { %v3493_v5 = vmul.f32 %v5566_v36, %v3492_v48 }
0x1a76   :  { %v6817_v6 = vadd.f32 %v3494_v39, %v3493_v5 }
0x1a78   :  { %3561 = vmatmul.mubr.f32.vlgmr.msra.gmra.mrb[34].mxu0 %v6817_v6  ;;  %3632 = vmatmul.mubr.f32.vlgmr.msra.gmra.mrb[40].mxu1 %v6817_v6 }
0x1a79   :  { %5345 = vmatpush1.bf16.msra.mxu0 %v6195_v22  ;;  %3747 = vmatprep.mubr.f32.mxu0 %v6892_v1 }
0x1a7a   :  { %5347 = vmatprep.subr.bf16.mxu0 %v6202_v35 }
0x1a7d   :  { %5349 = vmatpush1.bf16.msra.mxu0 %v6207_v44 }
0x1a7e   :  { %5351 = vmatprep.subr.bf16.mxu0 %v6214_v10 }
0x1a81   :  { %5353 = vmatpush1.bf16.msra.mxu0 %v6219_v26 }
0x1a82   :  { %5355 = vmatprep.subr.bf16.mxu0 %v6226_v51 }
0x1a85   :  { %5357 = vmatpush1.bf16.msra.mxu0 %v6231_v63 }
0x1a86   :  { %5359 = vmatprep.subr.bf16.mxu0 %v6238_v62 }
0x1a89   :  { %5361 = vmatpush1.bf16.msra.mxu0 %v6243_v11  ;;  %v6896_v11 = vld [vmem:[#allocation12_spill] sm:$0xff] }
0x1a8a   :  { %5363 = vmatprep.subr.bf16.mxu0 %v6249_v23  ;;  %v6897_v23 = vld [vmem:[#allocation13_spill] sm:$0xff] }
0x1a8d   :  { %5365 = vmatpush1.bf16.msra.mxu0 %v6256_v49  ;;  %v6898_v49 = vld [vmem:[#allocation14_spill] sm:$0xff] }
0x1a8e   :  { %5367 = vmatprep.subr.bf16.mxu0 %v6260_v16 }
0x1a91   :  { %5369 = vmatpush1.bf16.msra.mxu0 %v6267_v59 }
0x1a92   :  { %5371 = vmatprep.subr.bf16.mxu0 %v6272_v18 }
0x1a95   :  { %5373 = vmatpush1.bf16.msra.mxu0 %v6279_v2 }
0x1b4b   :  { %v3562_v22 = vpop.f32.mrb[34].mxu0  ;;  %v3633_v35 = vpop.f32.mrb[40].mxu1 }
0x1b4c   :  { %v3564_v44 = vpop.f32.mrb[35].mxu0  ;;  %v3635_v10 = vpop.f32.mrb[41].mxu1 }
0x1b4d   :  { %v3638_v26 = vadd.f32 %v6793_v15, %v3635_v10 }
0x1b4f   :  { %v3639_v51 = vmax.f32 %v3638_v26, 0.0 }
0x1b51   :  { %v3640_v63 = vmul.f32 %v6799_v13, %v3639_v51 }
0x1b53   :  { %v3641_v62 = vsel %vm2141_vm3, %v3640_v63, 0.0 }
0x1b54   :  { %3642 = vadd.xlane.f32.xlu1 %v3641_v62 }
0x1b65   :  { %2337 = vrot.lane.b32.xlu1 %v6472_v38, %s5664_s9 }
0x1b69   :  { %2524 = vrot.lane.b32.xlu1 %v6896_v11, %s5665_s10 }
0x1b6d   :  { %2711 = vrot.lane.b32.xlu1 %v6897_v23, %s5666_s11 }
0x1b71   :  { %2898 = vrot.lane.b32.xlu1 %v6898_v49, %s5667_s14 }
0x1b75   :  { %3272 = vrot.lane.b32.xlu1 %v6737_v8, %s5668_s15 }
0x1b79   :  { %3459 = vrot.lane.b32.xlu1 %v6806_v52, %s5669_s16 }
0x1be1   :  { %v3643_v16 = vpop.xlane.xlu1 %3642 }
0x1be2   :  { %v3644_v59 = vadd.f32 %v6803_v34, %v3643_v16 }
0x1be4   :  { %3646 = vrot.lane.b32.xlu1 %v3644_v59, %s5670_s1  ;;  %3652 = vperm.xlu0 %5394, %v3644_v59  }
0x1be5   :  { %v2338_v18 = vpop.permute.xlu1 %2337 }
0x1be6   :  { %2341 = vst.msk [vmem:[#allocation8] sm:$0x3] %vm2340_vm5, %v2338_v18 }
0x1be9   :  { %v2525_v2 = vpop.permute.xlu1 %2524 }
0x1bea   :  { %2528 = vst.msk [vmem:[#allocation8] sm:$0x3] %vm2527_vm6, %v2525_v2 }
0x1bed   :  { %v2712_v38 = vpop.permute.xlu1 %2711 }
0x1bee   :  { %2715 = vst.msk [vmem:[#allocation8] sm:$0x3] %vm2714_vm7, %v2712_v38 }
0x1bf1   :  { %v2899_v1 = vpop.permute.xlu1 %2898 }
0x1bf2   :  { %2902 = vst.msk [vmem:[#allocation8] sm:$0x3] %vm2901_vm8, %v2899_v1 }
0x1bf5   :  { %v3273_v46 = vpop.permute.xlu1 %3272 }
0x1bf9   :  { %v3460_v4 = vpop.permute.xlu1 %3459 }
0x1c63   :  { %v3653_v8 = vpop.permute.xlu0 %3652 }
0x1c64   :  { %v3655_v21 = vmul.f32 %v3653_v8, %v6335_v61  ;;  %v3656_v14 = vmul.f32 %v3653_v8, %v6341_v20  ;;  %v3657_v41 = vmul.f32 %v3653_v8, %v6354_v29  ;;  %v3675_v61 = vadd.f32 %v6748_v31, %v3633_v35 }
0x1c66   :  { %v3658_v30 = vadd.f32 %v3655_v21, %v6344_v27  ;;  %v3659_v37 = vadd.f32 %v3656_v14, %v6348_v28  ;;  %v3660_v27 = vadd.f32 %v3657_v41, %v6357_v50 }
0x1c68   :  { %v3661_v53 = vadd.f32 %v3658_v30, %v3562_v22  ;;  %v3662_v54 = vadd.f32 %v3659_v37, %v3564_v44 }
0x1c6a   :  { %v3828_v42 = vmul.f32 -1.442695, %v3661_v53  ;;  %v3829_v7 = vmul.f32 -1.442695, %v3662_v54 }
0x1c6c   :  { %5567 = vpow2.f32 %v3828_v42 }
0x1c6d   :  { %5569 = vpow2.f32 %v3829_v7 }
0x1c76   :  { %v5568_v12 = vpop.eup %5567 }
0x1c77   :  { %v3669_v17 = vadd.f32 1.0, %v5568_v12  ;;  %v5570_v52 = vpop.eup %5569 }
0x1c78   :  { %v3670_v60 = vadd.f32 1.0, %v5570_v52 }
0x1c79   :  { %5571 = vrcp.f32 %v3669_v17 }
0x1c7a   :  { %5573 = vrcp.f32 %v3670_v60 }
0x1c83   :  { %v5572_v20 = vpop.eup %5571 }
0x1c84   :  { %v3676_v28 = vmul.f32 %v5572_v20, %v3675_v61  ;;  %v5574_v43 = vpop.eup %5573 }
0x1c85   :  { %v3679_v58 = vsub.f32 1.0, %v5574_v43  ;;  %v3681_v45 = vmul.f32 %v5574_v43, %v6817_v6 }
0x1c86   :  { %v3677_v0 = vadd.f32 %v3676_v28, %v3660_v27 }
0x1c88   :  { %5575 = vtanh.f32 %v3677_v0 }
0x1c92   :  { %v5576_v19 = vpop.eup %5575 }
0x1c93   :  { %v3680_v55 = vmul.f32 %v5576_v19, %v3679_v58 }
0x1c95   :  { %v3682_v56 = vadd.f32 %v3681_v45, %v3680_v55 }
0x1c97   :  { %3748 = vmatmul.mubr.f32.vlgmr.msra.gmra.mrb[36].mxu0 %v3682_v56 }
0x1d6a   :  { %v3749_v47 = vpop.f32.mrb[36].mxu0 }
0x1d6b   :  { %v3750_v29 = vpop.f32.mrb[37].mxu0 }
0x1d6c   :  { %v3753_v24 = vadd.f32 %v6793_v15, %v3750_v29  ;;  %v3647_v15 = vpop.permute.xlu1 %3646 }
0x1d6e   :  { %v3754_v31 = vmax.f32 %v3753_v24, 0.0 }
0x1d70   :  { %v3755_v3 = vmul.f32 %v6799_v13, %v3754_v31 }
0x1d72   :  { %v3756_v50 = vsel %vm2141_vm3, %v3755_v3, 0.0 }
0x1d73   :  { %3757 = vadd.xlane.f32.xlu0 %v3756_v50 }
0x1d89   :  { %3085 = vrot.lane.b32.xlu0 %v6899_v9, %s5671_s17 }
0x1e00   :  { %v3758_v33 = vpop.xlane.xlu0 %3757 }
0x1e01   :  { %v3759_v40 = vadd.f32 %v6803_v34, %v3758_v33 }
0x1e03   :  { %3761 = vrot.lane.b32.xlu1 %v3759_v40, %s5672_s0 }
0x1e04   :  { %v3086_v25 = vpop.permute.xlu0 %3085 }
0x1e05   :  { %3089 = vst.msk [vmem:[#allocation8] sm:$0x3] %vm3088_vm9, %v3086_v25 }
0x1e06   :  { %3276 = vst.msk [vmem:[#allocation8] sm:$0x3] %vm3275_vm10, %v3273_v46 }
0x1e07   :  { %3463 = vst.msk [vmem:[#allocation8] sm:$0x3] %vm3462_vm11, %v3460_v4 }
0x1e08   :  { %3650 = vst.msk [vmem:[#allocation8] sm:$0x3] %vm3649_vm12, %v3647_v15 }
0x1e75   :  { %v3762_v13 = vpop.permute.xlu1 %3761 }
0x1e76   :  { %3765 = vst.msk [vmem:[#allocation8] sm:$0x3] %vm3764_vm13, %v3762_v13 }
0x1e77   :  { %5637 = shalt.err (!%p5634_p6)
}
0x1e78   :  { %s5638_s4 = scalar_lea.hbm %s6884_s12, 32 }
0x1e79   :  { %p5639_p7 = scmp.ne.s32.totalorder %s6884_s12, %s5638_s4  ;;  %p5642_p8 = scmp.lt.u32.totalorder %s5638_s4, %s6884_s12 }
0x1e7b   :  { %p5644_p9 = pnand %p5642_p8, %p5639_p7 }
0x1e7d   :  { %5647 = shalt.err (!%p5644_p9)
}
0x1e7e   :  { %3775 = dma.vmem_to_hbm [thread:$0]  %s3773_s3, 32, %s6884_s12, [#allocation5]  }
0x1e7f   :  { %5652 = dma.done.wait [#allocation5], 32  }
0x1e80   :  { %5653 = vsyncadd [#allocation5], 4294967264 }
0x1e81   :  { %3779 = vsyncpa [#allocation4], 1 }
0x1e82   :  { %3780 = vsyncpa [#allocation7], 1 }
0x1e83   :  { %3781 = vsyncpa [#allocation5], 1 }

</bundles_post_ra>
